<compile_context>
chip_gen: v7x
topology: tpu7x:2x2x1
jax: 0.10.0
libtpu: 0.0.40
codegen_flags: <defaults>
</compile_context>

<pallas_src>
import functools

import jax
import jax.numpy as jnp
from jax.experimental import pallas as pl
from jax.experimental.pallas import tpu as pltpu

HIDDEN = 100          # logical hidden size (nn.Linear(input_size, 100))
OUT = 10              # logical output size (nn.Linear(100, 10))
H_PAD = 128           # lane-padded hidden size
O_PAD = 128           # lane-padded output size
LN_EPS = 1e-5


def ffn_kernel(x_ref, gamma_ref, beta_ref, w1_ref, b1_ref, w2_ref, b2_ref, o_ref):
    # x_ref: (TR, D) tile of input rows; all feature axes map to lanes.
    x = x_ref[...].astype(jnp.float32)

    # ---- LayerNorm over last (feature) axis, one-pass variance ----
    mean = jnp.mean(x, axis=-1, keepdims=True)
    mean_sq = jnp.mean(x * x, axis=-1, keepdims=True)
    var = mean_sq - mean * mean
    xn = (x - mean) * jax.lax.rsqrt(var + LN_EPS)
    xn = xn * gamma_ref[...] + beta_ref[...]

    # ---- Linear(D -> H_PAD) + bias (columns >= HIDDEN are zero-padded) ----
    h = jnp.dot(xn, w1_ref[...], preferred_element_type=jnp.float32) + b1_ref[...]

    # ---- Swish / SiLU: h * sigmoid(h)  (padded lanes stay exactly 0) ----
    h = h * jax.nn.sigmoid(h)

    # ---- Dropout: identity at inference ----
    # TODO(synk): train-mode dropout (pltpu.prng_* + mask/scale) not implemented; eval semantics only.

    # ---- Linear(H_PAD -> O_PAD) + bias (rows/cols beyond 100/10 are zero) ----
    y = jnp.dot(h, w2_ref[...], preferred_element_type=jnp.float32) + b2_ref[...]

    # ---- second Dropout: identity at inference ----
    o_ref[...] = y.astype(o_ref.dtype)


@functools.partial(jax.jit, static_argnames=("row_tile",))
def feed_forward_net(x, params, *, row_tile=512):
    """x: (B, S, D) float32. Returns (B, S, OUT)."""
    gamma, beta, w1, b1, w2, b2 = params
    B, S, D = x.shape
    R = B * S
    x2 = x.reshape(R, D)

    # ---- zero-pad weights to lane-dense shapes (numerically a no-op) ----
    w1p = jnp.zeros((D, H_PAD), w1.dtype).at[:, :HIDDEN].set(w1)
    b1p = jnp.zeros((1, H_PAD), b1.dtype).at[:, :HIDDEN].set(b1)
    w2p = jnp.zeros((H_PAD, O_PAD), w2.dtype).at[:HIDDEN, :OUT].set(w2)
    b2p = jnp.zeros((1, O_PAD), b2.dtype).at[:, :OUT].set(b2)

    # ---- pad rows so every grid step sees a full row_tile block ----
    r_pad = pl.cdiv(R, row_tile) * row_tile
    if r_pad != R:
        x2 = jnp.pad(x2, ((0, r_pad - R), (0, 0)))

    grid = (r_pad // row_tile,)

    # Advisory cost hint for XLA's scheduler (mem-bound custom call).
    param_bytes = (D * H_PAD + H_PAD + H_PAD * O_PAD + O_PAD + 2 * D) * 4
    cost = pl.CostEstimate(
        flops=2 * r_pad * D * H_PAD + 2 * r_pad * H_PAD * O_PAD,
        transcendentals=r_pad * H_PAD,                       # sigmoid
        bytes_accessed=r_pad * D * 4 + r_pad * O_PAD * 4 + param_bytes,
    )

    out = pl.pallas_call(
        ffn_kernel,
        out_shape=jax.ShapeDtypeStruct((r_pad, O_PAD), x.dtype),
        grid_spec=pltpu.PrefetchScalarGridSpec(
            num_scalar_prefetch=0,
            grid=grid,
            in_specs=[
                pl.BlockSpec((row_tile, D), lambda i: (i, 0)),   # x rows
                pl.BlockSpec((1, D), lambda i: (0, 0)),          # LN gamma
                pl.BlockSpec((1, D), lambda i: (0, 0)),          # LN beta
                pl.BlockSpec((D, H_PAD), lambda i: (0, 0)),      # W1 (padded)
                pl.BlockSpec((1, H_PAD), lambda i: (0, 0)),      # b1 (padded)
                pl.BlockSpec((H_PAD, O_PAD), lambda i: (0, 0)),  # W2 (padded)
                pl.BlockSpec((1, O_PAD), lambda i: (0, 0)),      # b2 (padded)
            ],
            out_specs=pl.BlockSpec((row_tile, O_PAD), lambda i: (i, 0)),
        ),
        compiler_params=pltpu.CompilerParams(
            dimension_semantics=("parallel",)),
        cost_estimate=cost,
    )(x2, gamma, beta, w1p, b1p, w2p, b2p)

    # slice away row padding and the lane padding of the output
    return out[:R, :OUT].reshape(B, S, OUT)


def init_params(key, input_size):
    """Deterministic synthetic parameters matching the PyTorch module's shapes.
    Linear weights stored as (in, out) so the kernel does x @ W (equivalent to
    PyTorch's x @ W.T with W of shape (out, in))."""
    k1, k2, k3, k4 = jax.random.split(key, 4)
    bound1 = 1.0 / jnp.sqrt(input_size)
    bound2 = 1.0 / jnp.sqrt(HIDDEN)
    gamma = jnp.ones((1, input_size), jnp.float32)   # LayerNorm weight
    beta = jnp.zeros((1, input_size), jnp.float32)   # LayerNorm bias
    w1 = jax.random.uniform(k1, (input_size, HIDDEN), jnp.float32, -bound1, bound1)
    b1 = jax.random.uniform(k2, (1, HIDDEN), jnp.float32, -bound1, bound1)
    w2 = jax.random.uniform(k3, (HIDDEN, OUT), jnp.float32, -bound2, bound2)
    b2 = jax.random.uniform(k4, (1, OUT), jnp.float32, -bound2, bound2)
    return gamma, beta, w1, b1, w2, b2


def reference(x, params):
    """Pure-JAX reference for sanity checking."""
    gamma, beta, w1, b1, w2, b2 = params
    mean = jnp.mean(x, axis=-1, keepdims=True)
    var = jnp.mean((x - mean) ** 2, axis=-1, keepdims=True)
    xn = (x - mean) / jnp.sqrt(var + LN_EPS)
    xn = xn * gamma[0] + beta[0]
    h = xn @ w1 + b1[0]
    h = h * jax.nn.sigmoid(h)
    return h @ w2 + b2[0]


if __name__ == "__main__":
    key = jax.random.PRNGKey(0)
    kx, kp = jax.random.split(key)

    B, S, D = 2, 8, 32  # batch, seq, input_size
    x = jax.random.normal(kx, (B, S, D), jnp.float32)
    params = init_params(kp, D)

    y = feed_forward_net(x, params)
    y = jax.block_until_ready(y)

    y_ref = reference(x, params)
    assert y.shape == (B, S, OUT)
    assert jnp.allclose(y, y_ref, atol=1e-5, rtol=1e-5), "mismatch vs reference"

    print("KERNEL_OK")
</pallas_src>

<mosaic_0001>
module attributes {stable_mosaic.version = 11 : i64} {
  func.func @ffn_kernel(%arg0: i32, %arg1: memref<512x32xf32, #tpu.memory_space<vmem>>, %arg2: memref<1x32xf32, #tpu.memory_space<vmem>>, %arg3: memref<1x32xf32, #tpu.memory_space<vmem>>, %arg4: memref<32x128xf32, #tpu.memory_space<vmem>>, %arg5: memref<1x128xf32, #tpu.memory_space<vmem>>, %arg6: memref<128x128xf32, #tpu.memory_space<vmem>>, %arg7: memref<1x128xf32, #tpu.memory_space<vmem>>, %arg8: memref<512x128xf32, #tpu.memory_space<vmem>>) attributes {dimension_semantics = [#tpu.dimension_semantics<parallel>], iteration_bounds = array<i64: 1>, scalar_prefetch = 0 : i64, scratch_operands = 0 : i64, tpu.core_type = #tpu.core_type<tc>, window_params = [{transform_indices = @transform_0, window_bounds = array<i64: 512, 32>}, {pipeline_mode = #tpu.pipeline_mode<synchronous>, transform_indices = @transform_1, window_bounds = array<i64: 1, 32>}, {pipeline_mode = #tpu.pipeline_mode<synchronous>, transform_indices = @transform_2, window_bounds = array<i64: 1, 32>}, {pipeline_mode = #tpu.pipeline_mode<synchronous>, transform_indices = @transform_3, window_bounds = array<i64: 32, 128>}, {pipeline_mode = #tpu.pipeline_mode<synchronous>, transform_indices = @transform_4, window_bounds = array<i64: 1, 128>}, {pipeline_mode = #tpu.pipeline_mode<synchronous>, transform_indices = @transform_5, window_bounds = array<i64: 128, 128>}, {pipeline_mode = #tpu.pipeline_mode<synchronous>, transform_indices = @transform_6, window_bounds = array<i64: 1, 128>}, {transform_indices = @transform_7, window_bounds = array<i64: 512, 128>}]} {
    %c0 = arith.constant 0 : index
    %c0_0 = arith.constant 0 : index
    %0 = vector.load %arg1[%c0, %c0_0] : memref<512x32xf32, #tpu.memory_space<vmem>>, vector<512x32xf32>
    %cst = arith.constant dense<0.000000e+00> : vector<512xf32>
    %1 = vector.multi_reduction <add>, %0, %cst [1] : vector<512x32xf32> to vector<512xf32>
    %2 = vector.shape_cast %1 : vector<512xf32> to vector<512x1xf32>
    %cst_1 = arith.constant 3.200000e+01 : f32
    %3 = vector.broadcast %cst_1 : f32 to vector<512x1xf32>
    %4 = arith.divf %2, %3 : vector<512x1xf32>
    %5 = arith.mulf %0, %0 : vector<512x32xf32>
    %cst_2 = arith.constant dense<0.000000e+00> : vector<512xf32>
    %6 = vector.multi_reduction <add>, %5, %cst_2 [1] : vector<512x32xf32> to vector<512xf32>
    %7 = vector.shape_cast %6 : vector<512xf32> to vector<512x1xf32>
    %cst_3 = arith.constant 3.200000e+01 : f32
    %8 = vector.broadcast %cst_3 : f32 to vector<512x1xf32>
    %9 = arith.divf %7, %8 : vector<512x1xf32>
    %10 = arith.mulf %4, %4 : vector<512x1xf32>
    %11 = arith.subf %9, %10 : vector<512x1xf32>
    %12 = vector.broadcast %4 : vector<512x1xf32> to vector<512x32xf32>
    %13 = arith.subf %0, %12 : vector<512x32xf32>
    %cst_4 = arith.constant 9.99999974E-6 : f32
    %14 = vector.broadcast %cst_4 : f32 to vector<512x1xf32>
    %15 = arith.addf %11, %14 : vector<512x1xf32>
    %16 = math.rsqrt %15 : vector<512x1xf32>
    %17 = vector.broadcast %16 : vector<512x1xf32> to vector<512x32xf32>
    %18 = arith.mulf %13, %17 : vector<512x32xf32>
    %c0_5 = arith.constant 0 : index
    %c0_6 = arith.constant 0 : index
    %19 = vector.load %arg2[%c0_5, %c0_6] : memref<1x32xf32, #tpu.memory_space<vmem>>, vector<1x32xf32>
    %20 = vector.broadcast %19 : vector<1x32xf32> to vector<512x32xf32>
    %21 = arith.mulf %18, %20 : vector<512x32xf32>
    %c0_7 = arith.constant 0 : index
    %c0_8 = arith.constant 0 : index
    %22 = vector.load %arg3[%c0_7, %c0_8] : memref<1x32xf32, #tpu.memory_space<vmem>>, vector<1x32xf32>
    %23 = vector.broadcast %22 : vector<1x32xf32> to vector<512x32xf32>
    %24 = arith.addf %21, %23 : vector<512x32xf32>
    %c0_9 = arith.constant 0 : index
    %c0_10 = arith.constant 0 : index
    %25 = vector.load %arg4[%c0_9, %c0_10] : memref<32x128xf32, #tpu.memory_space<vmem>>, vector<32x128xf32>
    %cst_11 = arith.constant dense<0.000000e+00> : vector<512x128xf32>
    %26 = tpu.matmul %24, %25, %cst_11 {dimension_numbers = #tpu.dot_dimension_numbers<[1], [0], [0], [1], [0, 0, 1, 1], [], []>} : vector<512x32xf32>, vector<32x128xf32>, vector<512x128xf32> -> vector<512x128xf32>
    %c0_12 = arith.constant 0 : index
    %c0_13 = arith.constant 0 : index
    %27 = vector.load %arg5[%c0_12, %c0_13] : memref<1x128xf32, #tpu.memory_space<vmem>>, vector<1x128xf32>
    %28 = vector.broadcast %27 : vector<1x128xf32> to vector<512x128xf32>
    %29 = arith.addf %26, %28 : vector<512x128xf32>
    %30 = arith.negf %29 : vector<512x128xf32>
    %31 = math.exp %30 : vector<512x128xf32>
    %cst_14 = arith.constant 1.000000e+00 : f32
    %32 = vector.broadcast %cst_14 : f32 to vector<512x128xf32>
    %33 = arith.addf %32, %31 : vector<512x128xf32>
    %34 = arith.divf %32, %33 : vector<512x128xf32>
    %35 = arith.mulf %29, %34 : vector<512x128xf32>
    %c0_15 = arith.constant 0 : index
    %c0_16 = arith.constant 0 : index
    %36 = vector.load %arg6[%c0_15, %c0_16] : memref<128x128xf32, #tpu.memory_space<vmem>>, vector<128x128xf32>
    %cst_17 = arith.constant dense<0.000000e+00> : vector<512x128xf32>
    %37 = tpu.matmul %35, %36, %cst_17 {dimension_numbers = #tpu.dot_dimension_numbers<[1], [0], [0], [1], [0, 0, 1, 1], [], []>} : vector<512x128xf32>, vector<128x128xf32>, vector<512x128xf32> -> vector<512x128xf32>
    %c0_18 = arith.constant 0 : index
    %c0_19 = arith.constant 0 : index
    %38 = vector.load %arg7[%c0_18, %c0_19] : memref<1x128xf32, #tpu.memory_space<vmem>>, vector<1x128xf32>
    %39 = vector.broadcast %38 : vector<1x128xf32> to vector<512x128xf32>
    %40 = arith.addf %37, %39 : vector<512x128xf32>
    %c0_20 = arith.constant 0 : index
    %c0_21 = arith.constant 0 : index
    %41 = vector.load %arg8[%c0_20, %c0_21] : memref<512x128xf32, #tpu.memory_space<vmem>>, vector<512x128xf32>
    tpu.vector_store %arg8[%c0_20, %c0_21], %40 {strides = array<i32>} : memref<512x128xf32, #tpu.memory_space<vmem>>, vector<512x128xf32>,
    return
  }
  func.func @transform_0(%arg0: i32) -> (i32, i32) {
    %c0_i32 = arith.constant 0 : i32
    %c0_i32_0 = arith.constant 0 : i32
    return %arg0, %c0_i32 : i32, i32
  }
  func.func @transform_1(%arg0: i32) -> (i32, i32) {
    %c0_i32 = arith.constant 0 : i32
    %c0_i32_0 = arith.constant 0 : i32
    %c0_i32_1 = arith.constant 0 : i32
    return %c0_i32, %c0_i32_0 : i32, i32
  }
  func.func @transform_2(%arg0: i32) -> (i32, i32) {
    %c0_i32 = arith.constant 0 : i32
    %c0_i32_0 = arith.constant 0 : i32
    %c0_i32_1 = arith.constant 0 : i32
    return %c0_i32, %c0_i32_0 : i32, i32
  }
  func.func @transform_3(%arg0: i32) -> (i32, i32) {
    %c0_i32 = arith.constant 0 : i32
    %c0_i32_0 = arith.constant 0 : i32
    %c0_i32_1 = arith.constant 0 : i32
    return %c0_i32, %c0_i32_0 : i32, i32
  }
  func.func @transform_4(%arg0: i32) -> (i32, i32) {
    %c0_i32 = arith.constant 0 : i32
    %c0_i32_0 = arith.constant 0 : i32
    %c0_i32_1 = arith.constant 0 : i32
    return %c0_i32, %c0_i32_0 : i32, i32
  }
  func.func @transform_5(%arg0: i32) -> (i32, i32) {
    %c0_i32 = arith.constant 0 : i32
    %c0_i32_0 = arith.constant 0 : i32
    %c0_i32_1 = arith.constant 0 : i32
    return %c0_i32, %c0_i32_0 : i32, i32
  }
  func.func @transform_6(%arg0: i32) -> (i32, i32) {
    %c0_i32 = arith.constant 0 : i32
    %c0_i32_0 = arith.constant 0 : i32
    %c0_i32_1 = arith.constant 0 : i32
    return %c0_i32, %c0_i32_0 : i32, i32
  }
  func.func @transform_7(%arg0: i32) -> (i32, i32) {
    %c0_i32 = arith.constant 0 : i32
    %c0_i32_0 = arith.constant 0 : i32
    return %arg0, %c0_i32 : i32, i32
  }
}

</mosaic_0001>

<bundles_post_ra>
// kernel: feed_forward_net.1
= control target key start
LH: loop header
LB: loop body
LE: loop exit
PB: predicated region body
PF: predicated region fallthrough
CT: control target
= control target key end

     0   :  { %vm90_vm0 = vcmask 261120   ;;  %s5506_s0 = inlined_call_operand.vmem [shape: f32[512,32], index: 0, kind: input, shape index: {}]   ;;  %s5507_s3 = inlined_call_operand.vmem [shape: f32[32,128], index: 3, kind: input, shape index: {}]   ;;  %s5508_s1 = inlined_call_operand.vmem [shape: f32[1,32], index: 1, kind: input, shape index: {}]   ;;  %s5509_s2 = inlined_call_operand.vmem [shape: f32[1,32], index: 2, kind: input, shape index: {}]   ;;  %s5510_s5 = inlined_call_operand.vmem [shape: f32[128,128], index: 5, kind: input, shape index: {}]   ;;  %s5511_s4 = inlined_call_operand.vmem [shape: f32[1,128], index: 4, kind: input, shape index: {}]   ;;  %s5512_s6 = inlined_call_operand.vmem [shape: f32[1,128], index: 6, kind: input, shape index: {}]   ;;  %s5513_s7 = inlined_call_operand.vmem [shape: f32[512,128], index: 7, kind: output, shape index: {}]  }
   0x1   :  { %v3753_v0 = vld [vmem:[%s5506_s0] sm:$0xff]  ;;  %v3758_v1 = vld [vmem:[%s5506_s0 + $0x8] sm:$0xff]  ;;  %v3772_v7 = vld [vmem:[%s5506_s0 + $0x10] sm:$0xff] }
   0x2   :  { %v91_v2 = vsel %vm90_vm0, %v3753_v0, 0.0  ;;  %v348_v3 = vmul.f32 %v3753_v0, %v3753_v0  ;;  %v349_v4 = vmul.f32 %v3758_v1, %v3758_v1  ;;  %v94_v6 = vsel %vm90_vm0, %v3758_v1, 0.0  ;;  %v3778_v9 = vld [vmem:[%s5506_s0 + $0x18] sm:$0xff]  ;;  %v3792_v15 = vld [vmem:[%s5506_s0 + $0x20] sm:$0xff]  ;;  %v3798_v17 = vld [vmem:[%s5506_s0 + $0x28] sm:$0xff] }
   0x3   :  { %92 = vadd.xlane.f32.xlu0 %v91_v2  ;;  %v97_v10 = vsel %vm90_vm0, %v3772_v7, 0.0  ;;  %v350_v11 = vmul.f32 %v3772_v7, %v3772_v7  ;;  %v100_v12 = vsel %vm90_vm0, %v3778_v9, 0.0  ;;  %v351_v13 = vmul.f32 %v3778_v9, %v3778_v9  ;;  %v3812_v23 = vld [vmem:[%s5506_s0 + $0x30] sm:$0xff]  ;;  %v3818_v25 = vld [vmem:[%s5506_s0 + $0x38] sm:$0xff]  ;;  %v3832_v31 = vld [vmem:[%s5506_s0 + $0x40] sm:$0xff] }
   0x4   :  { %v412_v5 = vsel %vm90_vm0, %v348_v3, 0.0  ;;  %v415_v8 = vsel %vm90_vm0, %v349_v4, 0.0  ;;  %v103_v18 = vsel %vm90_vm0, %v3792_v15, 0.0  ;;  %v352_v19 = vmul.f32 %v3792_v15, %v3792_v15  ;;  %v3838_v33 = vld [vmem:[%s5506_s0 + $0x48] sm:$0xff]  ;;  %v1194_v39 = vld [vmem:[%s5507_s3] sm:$0xff]  ;;  %v3858_v41 = vld [vmem:[%s5506_s0 + $0x50] sm:$0xff] }
   0x5   :  { %413 = vadd.xlane.f32.xlu1 %v412_v5  ;;  %v418_v14 = vsel %vm90_vm0, %v350_v11, 0.0  ;;  %v421_v16 = vsel %vm90_vm0, %v351_v13, 0.0  ;;  %v106_v20 = vsel %vm90_vm0, %v3798_v17, 0.0  ;;  %v353_v21 = vmul.f32 %v3798_v17, %v3798_v17  ;;  %v1195_v40 = vld [vmem:[%s5507_s3 + $0x8] sm:$0xff]  ;;  %v3864_v44 = vld [vmem:[%s5506_s0 + $0x58] sm:$0xff]  ;;  %v1196_v47 = vld [vmem:[%s5507_s3 + $0x10] sm:$0xff] }
   0x6   :  { %v424_v22 = vsel %vm90_vm0, %v352_v19, 0.0  ;;  %v109_v26 = vsel %vm90_vm0, %v3812_v23, 0.0  ;;  %v354_v27 = vmul.f32 %v3812_v23, %v3812_v23  ;;  %v112_v28 = vsel %vm90_vm0, %v3818_v25, 0.0  ;;  %v1197_v48 = vld [vmem:[%s5507_s3 + $0x18] sm:$0xff]  ;;  %v3884_v53 = vld [vmem:[%s5506_s0 + $0x60] sm:$0xff]  ;;  %v3890_v55 = vld [vmem:[%s5506_s0 + $0x68] sm:$0xff] }
   0x7   :  { %95 = vadd.xlane.f32.xlu0 %v94_v6  ;;  %v427_v24 = vsel %vm90_vm0, %v353_v21, 0.0  ;;  %v355_v29 = vmul.f32 %v3818_v25, %v3818_v25  ;;  %v115_v34 = vsel %vm90_vm0, %v3832_v31, 0.0  ;;  %v356_v35 = vmul.f32 %v3832_v31, %v3832_v31  ;;  %v3904_v61 = vld [vmem:[%s5506_s0 + $0x70] sm:$0xff]  ;;  %v3910_v63 = vld [vmem:[%s5506_s0 + $0x78] sm:$0xff]  ;;  %v43_v11 = vld [vmem:[%s5506_s0 + $0x88] sm:$0xff] }
   0x8   :  { %v430_v30 = vsel %vm90_vm0, %v354_v27, 0.0  ;;  %v118_v36 = vsel %vm90_vm0, %v3838_v33, 0.0  ;;  %v357_v37 = vmul.f32 %v3838_v33, %v3838_v33  ;;  %v3218_v42 = vpack.c.bf16 %v1195_v40, %v1194_v39  ;;  %v44_v19 = vld [vmem:[%s5506_s0 + $0x90] sm:$0xff]  ;;  %v45_v21 = vld [vmem:[%s5506_s0 + $0x98] sm:$0xff] }
   0x9   :  { %416 = vadd.xlane.f32.xlu1 %v415_v8  ;;  %v433_v32 = vsel %vm90_vm0, %v355_v29, 0.0  ;;  %v436_v38 = vsel %vm90_vm0, %v356_v35, 0.0  ;;  %v121_v45 = vsel %vm90_vm0, %v3858_v41, 0.0  ;;  %v358_v46 = vmul.f32 %v3858_v41, %v3858_v41  ;;  %v3924_v8 = vld [vmem:[%s5506_s0 + $0x80] sm:$0xff]  ;;  %v48_v39 = vld [vmem:[%s5506_s0 + $0xb0] sm:$0xff] }
   0xa   :  { %v439_v43 = vsel %vm90_vm0, %v357_v37, 0.0  ;;  %3219 = vmatprep.subr.bf16.mxu0 %v3218_v42  ;;  %v3222_v49 = vpack.c.bf16 %v1197_v48, %v1196_v47  ;;  %v124_v50 = vsel %vm90_vm0, %v3864_v44, 0.0  ;;  %v359_v51 = vmul.f32 %v3864_v44, %v3864_v44  ;;  %v46_v29 = vld [vmem:[%s5506_s0 + $0xa0] sm:$0xff] }
   0xb   :  { %98 = vadd.xlane.f32.xlu0 %v97_v10  ;;  %3221 = vmatpush3.bf16.msra.mxu0 %v3218_v42  ;;  %v442_v52 = vsel %vm90_vm0, %v358_v46, 0.0  ;;  %v127_v56 = vsel %vm90_vm0, %v3884_v53, 0.0  ;;  %v360_v57 = vmul.f32 %v3884_v53, %v3884_v53  ;;  %v130_v58 = vsel %vm90_vm0, %v3890_v55, 0.0  ;;  %v49_v42 = vld [vmem:[%s5506_s0 + $0xb8] sm:$0xff] }
   0xc   :  { %3223 = vmatprep.subr.bf16.mxu0 %v3222_v49  ;;  %v445_v54 = vsel %vm90_vm0, %v359_v51, 0.0  ;;  %v361_v59 = vmul.f32 %v3890_v55, %v3890_v55  ;;  %v133_v2 = vsel %vm90_vm0, %v3904_v61, 0.0  ;;  %v362_v3 = vmul.f32 %v3904_v61, %v3904_v61  ;;  %v51_v51 = vld [vmem:[%s5506_s0 + $0xc8] sm:$0xff] }
   0xd   :  { %101 = vadd.xlane.f32.xlu1 %v100_v12  ;;  %v448_v60 = vsel %vm90_vm0, %v360_v57, 0.0  ;;  %v136_v4 = vsel %vm90_vm0, %v3910_v63, 0.0  ;;  %v363_v5 = vmul.f32 %v3910_v63, %v3910_v63  ;;  %v139_v12 = vsel %vm90_vm0, %v3924_v8, 0.0 }
   0xe   :  { %v451_v62 = vsel %vm90_vm0, %v361_v59, 0.0  ;;  %v454_v6 = vsel %vm90_vm0, %v362_v3, 0.0  ;;  %v364_v13 = vmul.f32 %v3924_v8, %v3924_v8  ;;  %v367_v27 = vmul.f32 %v45_v21, %v45_v21  ;;  %v52_v59 = vld [vmem:[%s5506_s0 + $0xd0] sm:$0xff] }
   0xf   :  { %419 = vadd.xlane.f32.xlu0 %v418_v14  ;;  %3225 = vmatpush3.bf16.msra.mxu0 %v3222_v49  ;;  %v457_v10 = vsel %vm90_vm0, %v363_v5, 0.0  ;;  %v142_v14 = vsel %vm90_vm0, %v43_v11, 0.0  ;;  %v368_v35 = vmul.f32 %v46_v29, %v46_v29  ;;  %v160_v46 = vsel %vm90_vm0, %v49_v42, 0.0  ;;  %v50_v49 = vld [vmem:[%s5506_s0 + $0xc0] sm:$0xff] }
  0x10   :  { %v371_v47 = vmul.f32 %v49_v42, %v49_v42  ;;  %v373_v57 = vmul.f32 %v51_v51, %v51_v51  ;;  %v374_v3 = vmul.f32 %v52_v59, %v52_v59 }
  0x11   :  { %422 = vadd.xlane.f32.xlu1 %v421_v16  ;;  %v365_v16 = vmul.f32 %v43_v11, %v43_v11 }
  0x13   :  { %104 = vadd.xlane.f32.xlu0 %v103_v18  ;;  %v460_v18 = vsel %vm90_vm0, %v364_v13, 0.0 }
  0x15   :  { %107 = vadd.xlane.f32.xlu1 %v106_v20  ;;  %v463_v20 = vsel %vm90_vm0, %v365_v16, 0.0 }
  0x17   :  { %425 = vadd.xlane.f32.xlu0 %v424_v22  ;;  %v145_v22 = vsel %vm90_vm0, %v44_v19, 0.0 }
  0x19   :  { %428 = vadd.xlane.f32.xlu1 %v427_v24  ;;  %v366_v24 = vmul.f32 %v44_v19, %v44_v19 }
  0x1b   :  { %110 = vadd.xlane.f32.xlu0 %v109_v26  ;;  %v148_v26 = vsel %vm90_vm0, %v45_v21, 0.0 }
  0x1d   :  { %113 = vadd.xlane.f32.xlu1 %v112_v28  ;;  %v466_v28 = vsel %vm90_vm0, %v366_v24, 0.0 }
  0x1f   :  { %431 = vadd.xlane.f32.xlu0 %v430_v30  ;;  %v469_v30 = vsel %vm90_vm0, %v367_v27, 0.0 }
  0x21   :  { %434 = vadd.xlane.f32.xlu1 %v433_v32  ;;  %v47_v32 = vld [vmem:[%s5506_s0 + $0xa8] sm:$0xff] }
  0x22   :  { %v369_v37 = vmul.f32 %v47_v32, %v47_v32 }
  0x23   :  { %116 = vadd.xlane.f32.xlu0 %v115_v34  ;;  %v151_v34 = vsel %vm90_vm0, %v46_v29, 0.0 }
  0x24   :  { %v475_v40 = vsel %vm90_vm0, %v369_v37, 0.0 }
  0x25   :  { %119 = vadd.xlane.f32.xlu1 %v118_v36  ;;  %v154_v36 = vsel %vm90_vm0, %v47_v32, 0.0 }
  0x27   :  { %437 = vadd.xlane.f32.xlu0 %v436_v38  ;;  %v472_v38 = vsel %vm90_vm0, %v368_v35, 0.0 }
  0x29   :  { %440 = vadd.xlane.f32.xlu1 %v439_v43  ;;  %v157_v43 = vsel %vm90_vm0, %v48_v39, 0.0 }
  0x2b   :  { %122 = vadd.xlane.f32.xlu0 %v121_v45  ;;  %v370_v45 = vmul.f32 %v48_v39, %v48_v39 }
  0x2d   :  { %125 = vadd.xlane.f32.xlu1 %v124_v50  ;;  %v478_v48 = vsel %vm90_vm0, %v370_v45, 0.0  ;;  %v481_v50 = vsel %vm90_vm0, %v371_v47, 0.0 }
  0x2f   :  { %443 = vadd.xlane.f32.xlu0 %v442_v52  ;;  %v163_v52 = vsel %vm90_vm0, %v50_v49, 0.0 }
  0x31   :  { %446 = vadd.xlane.f32.xlu1 %v445_v54  ;;  %v372_v54 = vmul.f32 %v50_v49, %v50_v49 }
  0x33   :  { %128 = vadd.xlane.f32.xlu0 %v127_v56  ;;  %v166_v56 = vsel %vm90_vm0, %v51_v51, 0.0 }
  0x35   :  { %131 = vadd.xlane.f32.xlu1 %v130_v58  ;;  %v484_v58 = vsel %vm90_vm0, %v372_v54, 0.0 }
  0x37   :  { %449 = vadd.xlane.f32.xlu0 %v448_v60  ;;  %v487_v60 = vsel %vm90_vm0, %v373_v57, 0.0 }
  0x39   :  { %452 = vadd.xlane.f32.xlu1 %v451_v62  ;;  %v53_v62 = vld [vmem:[%s5506_s0 + $0xd8] sm:$0xff] }
  0x3a   :  { %v375_v5 = vmul.f32 %v53_v62, %v53_v62 }
  0x3b   :  { %134 = vadd.xlane.f32.xlu0 %v133_v2  ;;  %v169_v2 = vsel %vm90_vm0, %v52_v59, 0.0 }
  0x3c   :  { %v493_v11 = vsel %vm90_vm0, %v375_v5, 0.0 }
  0x3d   :  { %137 = vadd.xlane.f32.xlu1 %v136_v4  ;;  %v172_v4 = vsel %vm90_vm0, %v53_v62, 0.0 }
  0x3f   :  { %455 = vadd.xlane.f32.xlu0 %v454_v6  ;;  %v490_v6 = vsel %vm90_vm0, %v374_v3, 0.0 }
  0x41   :  { %458 = vadd.xlane.f32.xlu1 %v457_v10  ;;  %v54_v10 = vld [vmem:[%s5506_s0 + $0xe0] sm:$0xff] }
  0x42   :  { %v175_v13 = vsel %vm90_vm0, %v54_v10, 0.0 }
  0x43   :  { %140 = vadd.xlane.f32.xlu0 %v139_v12  ;;  %v55_v12 = vld [vmem:[%s5506_s0 + $0xe8] sm:$0xff] }
  0x44   :  { %v178_v16 = vsel %vm90_vm0, %v55_v12, 0.0 }
  0x45   :  { %143 = vadd.xlane.f32.xlu1 %v142_v14  ;;  %v376_v14 = vmul.f32 %v54_v10, %v54_v10 }
  0x47   :  { %461 = vadd.xlane.f32.xlu0 %v460_v18  ;;  %v377_v18 = vmul.f32 %v55_v12, %v55_v12  ;;  %v496_v19 = vsel %vm90_vm0, %v376_v14, 0.0 }
  0x49   :  { %464 = vadd.xlane.f32.xlu1 %v463_v20  ;;  %v56_v20 = vld [vmem:[%s5506_s0 + $0xf0] sm:$0xff]  ;;  %v499_v21 = vsel %vm90_vm0, %v377_v18, 0.0 }
  0x4a   :  { %v181_v24 = vsel %vm90_vm0, %v56_v20, 0.0 }
  0x4b   :  { %146 = vadd.xlane.f32.xlu0 %v145_v22  ;;  %v57_v22 = vld [vmem:[%s5506_s0 + $0xf8] sm:$0xff] }
  0x4c   :  { %v184_v27 = vsel %vm90_vm0, %v57_v22, 0.0 }
  0x4d   :  { %149 = vadd.xlane.f32.xlu1 %v148_v26  ;;  %v378_v26 = vmul.f32 %v56_v20, %v56_v20 }
  0x4f   :  { %467 = vadd.xlane.f32.xlu0 %v466_v28  ;;  %v379_v28 = vmul.f32 %v57_v22, %v57_v22  ;;  %v502_v29 = vsel %vm90_vm0, %v378_v26, 0.0 }
  0x51   :  { %470 = vadd.xlane.f32.xlu1 %v469_v30  ;;  %v58_v30 = vld [vmem:[%s5506_s0 + $0x100] sm:$0xff]  ;;  %v505_v32 = vsel %vm90_vm0, %v379_v28, 0.0 }
  0x52   :  { %v187_v35 = vsel %vm90_vm0, %v58_v30, 0.0 }
  0x53   :  { %152 = vadd.xlane.f32.xlu0 %v151_v34  ;;  %v59_v34 = vld [vmem:[%s5506_s0 + $0x108] sm:$0xff] }
  0x54   :  { %v190_v37 = vsel %vm90_vm0, %v59_v34, 0.0 }
  0x55   :  { %155 = vadd.xlane.f32.xlu1 %v154_v36  ;;  %v380_v36 = vmul.f32 %v58_v30, %v58_v30 }
  0x57   :  { %473 = vadd.xlane.f32.xlu0 %v472_v38  ;;  %v381_v38 = vmul.f32 %v59_v34, %v59_v34  ;;  %v508_v39 = vsel %vm90_vm0, %v380_v36, 0.0 }
  0x59   :  { %476 = vadd.xlane.f32.xlu1 %v475_v40  ;;  %v60_v40 = vld [vmem:[%s5506_s0 + $0x110] sm:$0xff]  ;;  %v511_v42 = vsel %vm90_vm0, %v381_v38, 0.0  ;;  %v66_v38 = vld [vmem:[%s5506_s0 + $0x140] sm:$0xff] }
  0x5a   :  { %v193_v45 = vsel %vm90_vm0, %v60_v40, 0.0 }
  0x5b   :  { %158 = vadd.xlane.f32.xlu0 %v157_v43  ;;  %v61_v43 = vld [vmem:[%s5506_s0 + $0x118] sm:$0xff] }
  0x5c   :  { %v196_v47 = vsel %vm90_vm0, %v61_v43, 0.0 }
  0x5d   :  { %161 = vadd.xlane.f32.xlu1 %v160_v46  ;;  %v382_v46 = vmul.f32 %v60_v40, %v60_v40 }
  0x5f   :  { %479 = vadd.xlane.f32.xlu0 %v478_v48  ;;  %v383_v48 = vmul.f32 %v61_v43, %v61_v43  ;;  %v514_v49 = vsel %vm90_vm0, %v382_v46, 0.0  ;;  %v67_v46 = vld [vmem:[%s5506_s0 + $0x148] sm:$0xff] }
  0x61   :  { %482 = vadd.xlane.f32.xlu1 %v481_v50  ;;  %v62_v50 = vld [vmem:[%s5506_s0 + $0x120] sm:$0xff]  ;;  %v517_v51 = vsel %vm90_vm0, %v383_v48, 0.0  ;;  %v211_v48 = vsel %vm90_vm0, %v66_v38, 0.0 }
  0x62   :  { %v384_v57 = vmul.f32 %v62_v50, %v62_v50 }
  0x63   :  { %164 = vadd.xlane.f32.xlu0 %v163_v52  ;;  %v63_v52 = vld [vmem:[%s5506_s0 + $0x128] sm:$0xff] }
  0x64   :  { %v385_v62 = vmul.f32 %v63_v52, %v63_v52  ;;  %v520_v5 = vsel %vm90_vm0, %v384_v57, 0.0  ;;  %v214_v57 = vsel %vm90_vm0, %v67_v46, 0.0 }
  0x65   :  { %167 = vadd.xlane.f32.xlu1 %v166_v56  ;;  %v199_v56 = vsel %vm90_vm0, %v62_v50, 0.0 }
  0x67   :  { %485 = vadd.xlane.f32.xlu0 %v484_v58 }
  0x69   :  { %488 = vadd.xlane.f32.xlu1 %v487_v60  ;;  %v202_v60 = vsel %vm90_vm0, %v63_v52, 0.0 }
  0x6b   :  { %170 = vadd.xlane.f32.xlu0 %v169_v2 }
  0x6d   :  { %173 = vadd.xlane.f32.xlu1 %v172_v4 }
  0x6f   :  { %491 = vadd.xlane.f32.xlu0 %v490_v6 }
  0x71   :  { %494 = vadd.xlane.f32.xlu1 %v493_v11  ;;  %v64_v11 = vld [vmem:[%s5506_s0 + $0x130] sm:$0xff] }
  0x72   :  { %v386_v22 = vmul.f32 %v64_v11, %v64_v11 }
  0x73   :  { %176 = vadd.xlane.f32.xlu0 %v175_v13  ;;  %v523_v13 = vsel %vm90_vm0, %v385_v62, 0.0 }
  0x74   :  { %v526_v36 = vsel %vm90_vm0, %v386_v22, 0.0 }
  0x75   :  { %179 = vadd.xlane.f32.xlu1 %v178_v16 }
  0x77   :  { %497 = vadd.xlane.f32.xlu0 %v496_v19  ;;  %v65_v19 = vld [vmem:[%s5506_s0 + $0x138] sm:$0xff] }
  0x78   :  { %v208_v28 = vsel %vm90_vm0, %v65_v19, 0.0 }
  0x79   :  { %500 = vadd.xlane.f32.xlu1 %v499_v21  ;;  %v205_v21 = vsel %vm90_vm0, %v64_v11, 0.0  ;;  %v4088_v11 = vld [vmem:[%s5509_s2] ss:$0 sm:$0xff] }
  0x7b   :  { %182 = vadd.xlane.f32.xlu0 %v181_v24 }
  0x7d   :  { %185 = vadd.xlane.f32.xlu1 %v184_v27 }
  0x7f   :  { %503 = vadd.xlane.f32.xlu0 %v502_v29  ;;  %v387_v29 = vmul.f32 %v65_v19, %v65_v19 }
  0x81   :  { %506 = vadd.xlane.f32.xlu1 %v505_v32  ;;  %v529_v40 = vsel %vm90_vm0, %v387_v29, 0.0 }
  0x83   :  { %188 = vadd.xlane.f32.xlu0 %v187_v35 }
  0x85   :  { %191 = vadd.xlane.f32.xlu1 %v190_v37 }
  0x87   :  { %509 = vadd.xlane.f32.xlu0 %v508_v39 }
  0x89   :  { %512 = vadd.xlane.f32.xlu1 %v511_v42 }
  0x8b   :  { %194 = vadd.xlane.f32.xlu0 %v193_v45 }
  0x8d   :  { %197 = vadd.xlane.f32.xlu1 %v196_v47 }
  0x8f   :  { %515 = vadd.xlane.f32.xlu0 %v514_v49  ;;  %v388_v49 = vmul.f32 %v66_v38, %v66_v38 }
  0x90   :  { %v93_v54 = vpop.xlane.xlu0 %92 }
  0x91   :  { %v4034_v58 = vmul.f32 0.03125, %v93_v54  ;;  %518 = vadd.xlane.f32.xlu1 %v517_v51 }
  0x92   :  { %v414_v59 = vpop.xlane.xlu1 %413 }
  0x93   :  { %v668_v2 = vmul.f32 %v4034_v58, %v4034_v58  ;;  %v604_v3 = vmul.f32 0.03125, %v414_v59  ;;  %200 = vadd.xlane.f32.xlu0 %v199_v56  ;;  %v796_v54 = vsub.f32 %v3753_v0, %v4034_v58  ;;  %v389_v59 = vmul.f32 %v67_v46, %v67_v46 }
  0x94   :  { %v96_v4 = vpop.xlane.xlu0 %95  ;;  %v532_v0 = vsel %vm90_vm0, %v388_v49, 0.0 }
  0x95   :  { %v732_v6 = vsub.f32 %v604_v3, %v668_v2  ;;  %v4040_v10 = vmul.f32 0.03125, %v96_v4  ;;  %203 = vadd.xlane.f32.xlu1 %v202_v60  ;;  %v4080_v3 = vld [vmem:[%s5508_s1] ss:$0 sm:$0xff] }
  0x96   :  { %v417_v12 = vpop.xlane.xlu1 %416 }
  0x97   :  { %v860_v14 = vadd.f32 1e-05, %v732_v6  ;;  %v669_v16 = vmul.f32 %v4040_v10, %v4040_v10  ;;  %v605_v18 = vmul.f32 0.03125, %v417_v12  ;;  %521 = vadd.xlane.f32.xlu0 %v520_v5  ;;  %v68_v12 = vld [vmem:[%s5506_s0 + $0x150] sm:$0xff] }
  0x98   :  { %v99_v20 = vpop.xlane.xlu0 %98  ;;  %v390_v29 = vmul.f32 %v68_v12, %v68_v12 }
  0x99   :  { %3274 = vrsqrt.f32 %v860_v14  ;;  %v733_v24 = vsub.f32 %v605_v18, %v669_v16  ;;  %v4052_v26 = vmul.f32 0.03125, %v99_v20  ;;  %524 = vadd.xlane.f32.xlu1 %v523_v13  ;;  %v797_v13 = vsub.f32 %v3758_v1, %v4040_v10 }
  0x9a   :  { %v102_v27 = vpop.xlane.xlu1 %101  ;;  %v535_v16 = vsel %vm90_vm0, %v389_v59, 0.0  ;;  %v217_v1 = vsel %vm90_vm0, %v68_v12, 0.0 }
  0x9b   :  { %v861_v30 = vadd.f32 1e-05, %v733_v24  ;;  %v670_v32 = vmul.f32 %v4052_v26, %v4052_v26  ;;  %v4057_v34 = vmul.f32 0.03125, %v102_v27  ;;  %206 = vadd.xlane.f32.xlu0 %v205_v21  ;;  %v69_v24 = vld [vmem:[%s5506_s0 + $0x158] sm:$0xff] }
  0x9c   :  { %v420_v35 = vpop.xlane.xlu0 %419 }
  0x9d   :  { %3276 = vrsqrt.f32 %v861_v30  ;;  %v606_v37 = vmul.f32 0.03125, %v420_v35  ;;  %209 = vadd.xlane.f32.xlu1 %v208_v28  ;;  %v671_v42 = vmul.f32 %v4057_v34, %v4057_v34 }
  0x9e   :  { %v423_v39 = vpop.xlane.xlu1 %422 }
  0x9f   :  { %v734_v43 = vsub.f32 %v606_v37, %v670_v32  ;;  %v607_v45 = vmul.f32 0.03125, %v423_v39  ;;  %527 = vadd.xlane.f32.xlu0 %v526_v36  ;;  %v220_v37 = vsel %vm90_vm0, %v69_v24, 0.0  ;;  %v391_v39 = vmul.f32 %v69_v24, %v69_v24 }
  0xa0   :  { %v105_v47 = vpop.xlane.xlu0 %104 }
  0xa1   :  { %v862_v50 = vadd.f32 1e-05, %v734_v43  ;;  %v735_v51 = vsub.f32 %v607_v45, %v671_v42  ;;  %v4070_v52 = vmul.f32 0.03125, %v105_v47  ;;  %530 = vadd.xlane.f32.xlu1 %v529_v40  ;;  %v798_v43 = vsub.f32 %v3772_v7, %v4052_v26 }
  0xa2   :  { %v108_v56 = vpop.xlane.xlu1 %107  ;;  %v541_v7 = vsel %vm90_vm0, %v391_v39, 0.0 }
  0xa3   :  { %v3275_v60 = vpop.eup %3274  ;;  %3278 = vrsqrt.f32 %v862_v50  ;;  %v863_v62 = vadd.f32 1e-05, %v735_v51  ;;  %v672_v2 = vmul.f32 %v4070_v52, %v4070_v52  ;;  %212 = vadd.xlane.f32.xlu0 %v211_v48  ;;  %v4082_v4 = vmul.f32 0.03125, %v108_v56  ;;  %v70_v51 = vld [vmem:[%s5506_s0 + $0x160] sm:$0xff] }
  0xa4   :  { %v426_v5 = vpop.xlane.xlu0 %425  ;;  %v988_v58 = vmul.f32 %v3275_v60, %v796_v54  ;;  %v538_v48 = vsel %vm90_vm0, %v390_v29, 0.0  ;;  %v799_v54 = vsub.f32 %v3778_v9, %v4057_v34  ;;  %v223_v9 = vsel %vm90_vm0, %v70_v51, 0.0 }
  0xa5   :  { %3280 = vrsqrt.f32 %v863_v62  ;;  %v608_v6 = vmul.f32 0.03125, %v426_v5  ;;  %215 = vadd.xlane.f32.xlu1 %v214_v57  ;;  %v673_v20 = vmul.f32 %v4082_v4, %v4082_v4  ;;  %v800_v24 = vsub.f32 %v3792_v15, %v4070_v52 }
  0xa6   :  { %v429_v14 = vpop.xlane.xlu1 %428  ;;  %v1059_v18 = vmul.f32 %v4080_v3, %v988_v58  ;;  %v392_v58 = vmul.f32 %v70_v51, %v70_v51  ;;  %v801_v15 = vsub.f32 %v3798_v17, %v4082_v4 }
  0xa7   :  { %v3277_v19 = vpop.eup %3276  ;;  %v736_v21 = vsub.f32 %v608_v6, %v672_v2  ;;  %v609_v22 = vmul.f32 0.03125, %v429_v14  ;;  %533 = vadd.xlane.f32.xlu0 %v532_v0  ;;  %v71_v2 = vld [vmem:[%s5506_s0 + $0x168] sm:$0xff] }
  0xa8   :  { %v111_v27 = vpop.xlane.xlu0 %110  ;;  %v1130_v28 = vadd.f32 %v4088_v11, %v1059_v18  ;;  %v989_v10 = vmul.f32 %v3277_v19, %v797_v13  ;;  %v226_v18 = vsel %vm90_vm0, %v71_v2, 0.0 }
  0xa9   :  { %v864_v30 = vadd.f32 1e-05, %v736_v21  ;;  %v737_v32 = vsub.f32 %v609_v22, %v673_v20  ;;  %v4104_v35 = vmul.f32 0.03125, %v111_v27  ;;  %536 = vadd.xlane.f32.xlu1 %v535_v16  ;;  %v393_v20 = vmul.f32 %v71_v2, %v71_v2 }
  0xaa   :  { %v114_v36 = vpop.xlane.xlu1 %113  ;;  %2994 = vmatprep.mubr.msk.f32.mxu0 %vm90_vm0, %v1130_v28  ;;  %v1060_v38 = vmul.f32 %v4080_v3, %v989_v10  ;;  %v544_v10 = vsel %vm90_vm0, %v392_v58, 0.0 }
  0xab   :  { %3282 = vrsqrt.f32 %v864_v30  ;;  %v865_v40 = vadd.f32 1e-05, %v737_v32  ;;  %v674_v42 = vmul.f32 %v4104_v35, %v4104_v35  ;;  %218 = vadd.xlane.f32.xlu0 %v217_v1  ;;  %v4113_v45 = vmul.f32 0.03125, %v114_v36  ;;  %v72_v32 = vld [vmem:[%s5506_s0 + $0x170] sm:$0xff] }
  0xac   :  { %v432_v46 = vpop.xlane.xlu0 %431  ;;  %v1131_v47 = vadd.f32 %v4088_v11, %v1060_v38  ;;  %v547_v36 = vsel %vm90_vm0, %v393_v20, 0.0  ;;  %v229_v17 = vsel %vm90_vm0, %v72_v32, 0.0 }
  0xad   :  { %v3279_v49 = vpop.eup %3278  ;;  %3284 = vrsqrt.f32 %v865_v40  ;;  %v610_v50 = vmul.f32 0.03125, %v432_v46  ;;  %221 = vadd.xlane.f32.xlu1 %v220_v37  ;;  %v675_v59 = vmul.f32 %v4113_v45, %v4113_v45 }
  0xae   :  { %v435_v56 = vpop.xlane.xlu1 %434  ;;  %2995 = vmatmul.mubr.msk.f32.vlgmr.msra.gmra.mrb[0].mxu0 %vm90_vm0, %v1131_v47  ;;  %v990_v26 = vmul.f32 %v3279_v49, %v798_v43  ;;  %v73_v43 = vld [vmem:[%s5506_s0 + $0x178] sm:$0xff] }
  0xaf   :  { %v3281_v57 = vpop.eup %3280  ;;  %v738_v60 = vsub.f32 %v610_v50, %v674_v42  ;;  %v611_v62 = vmul.f32 0.03125, %v435_v56  ;;  %539 = vadd.xlane.f32.xlu0 %v538_v48  ;;  %v394_v48 = vmul.f32 %v72_v32, %v72_v32 }
  0xb0   :  { %v117_v5 = vpop.xlane.xlu0 %116  ;;  %v1061_v34 = vmul.f32 %v4080_v3, %v990_v26  ;;  %v991_v0 = vmul.f32 %v3281_v57, %v799_v54  ;;  %v395_v57 = vmul.f32 %v73_v43, %v73_v43 }
  0xb1   :  { %v866_v6 = vadd.f32 1e-05, %v738_v60  ;;  %v739_v12 = vsub.f32 %v611_v62, %v675_v59  ;;  %v4131_v13 = vmul.f32 0.03125, %v117_v5  ;;  %542 = vadd.xlane.f32.xlu1 %v541_v7  ;;  %v232_v7 = vsel %vm90_vm0, %v73_v43, 0.0 }
  0xb2   :  { %v120_v14 = vpop.xlane.xlu1 %119  ;;  %v1132_v16 = vadd.f32 %v4088_v11, %v1061_v34  ;;  %v1062_v19 = vmul.f32 %v4080_v3, %v991_v0  ;;  %v802_v62 = vsub.f32 %v3812_v23, %v4104_v35  ;;  %v550_v34 = vsel %vm90_vm0, %v394_v48, 0.0 }
  0xb3   :  { %3286 = vrsqrt.f32 %v866_v6  ;;  %v867_v21 = vadd.f32 1e-05, %v739_v12  ;;  %v676_v22 = vmul.f32 %v4131_v13, %v4131_v13  ;;  %224 = vadd.xlane.f32.xlu0 %v223_v9  ;;  %v4140_v27 = vmul.f32 0.03125, %v120_v14  ;;  %v74_v6 = vld [vmem:[%s5506_s0 + $0x180] sm:$0xff] }
  0xb4   :  { %2997 = vmatprep.mubr.msk.f32.mxu0 %vm90_vm0, %v1132_v16  ;;  %v438_v28 = vpop.xlane.xlu0 %437  ;;  %v1133_v1 = vadd.f32 %v4088_v11, %v1062_v19  ;;  %v803_v23 = vsub.f32 %v3818_v25, %v4113_v45  ;;  %v553_v12 = vsel %vm90_vm0, %v395_v57, 0.0  ;;  %v235_v25 = vsel %vm90_vm0, %v74_v6, 0.0 }
  0xb5   :  { %v3283_v29 = vpop.eup %3282  ;;  %3288 = vrsqrt.f32 %v867_v21  ;;  %v612_v30 = vmul.f32 0.03125, %v438_v28  ;;  %227 = vadd.xlane.f32.xlu1 %v226_v18  ;;  %v677_v39 = vmul.f32 %v4140_v27, %v4140_v27  ;;  %v75_v21 = vld [vmem:[%s5506_s0 + $0x188] sm:$0xff]  ;;  %v396_v28 = vmul.f32 %v74_v6, %v74_v6 }
  0xb6   :  { %v441_v52 = vpop.xlane.xlu1 %440  ;;  %2998 = vmatmul.mubr.msk.f32.gmra.mrb[2].mxu0 %vm90_vm0, %v1133_v1  ;;  %v992_v37 = vmul.f32 %v3283_v29, %v800_v24 }
  0xb7   :  { %v3285_v38 = vpop.eup %3284  ;;  %v740_v40 = vsub.f32 %v612_v30, %v676_v22  ;;  %v613_v42 = vmul.f32 0.03125, %v441_v52  ;;  %545 = vadd.xlane.f32.xlu0 %v544_v10 }
  0xb8   :  { %v123_v46 = vpop.xlane.xlu0 %122  ;;  %v1063_v4 = vmul.f32 %v4080_v3, %v992_v37  ;;  %v993_v47 = vmul.f32 %v3285_v38, %v801_v15  ;;  %v238_v15 = vsel %vm90_vm0, %v75_v21, 0.0 }
  0xb9   :  { %v868_v49 = vadd.f32 1e-05, %v740_v40  ;;  %v741_v50 = vsub.f32 %v613_v42, %v677_v39  ;;  %v4159_v51 = vmul.f32 0.03125, %v123_v46  ;;  %548 = vadd.xlane.f32.xlu1 %v547_v36  ;;  %v397_v36 = vmul.f32 %v75_v21, %v75_v21 }
  0xba   :  { %v126_v54 = vpop.xlane.xlu1 %125  ;;  %v1134_v56 = vadd.f32 %v4088_v11, %v1063_v4  ;;  %v1064_v26 = vmul.f32 %v4080_v3, %v993_v47  ;;  %v804_v39 = vsub.f32 %v3832_v31, %v4131_v13  ;;  %v556_v46 = vsel %vm90_vm0, %v396_v28, 0.0  ;;  %v76_v47 = vld [vmem:[%s5506_s0 + $0x190] sm:$0xff] }
  0xbb   :  { %3290 = vrsqrt.f32 %v868_v49  ;;  %v869_v59 = vadd.f32 1e-05, %v741_v50  ;;  %v678_v60 = vmul.f32 %v4159_v51, %v4159_v51  ;;  %230 = vadd.xlane.f32.xlu0 %v229_v17  ;;  %v4168_v2 = vmul.f32 0.03125, %v126_v54 }
  0xbc   :  { %3000 = vmatprep.mubr.msk.f32.mxu0 %vm90_vm0, %v1134_v56  ;;  %v444_v5 = vpop.xlane.xlu0 %443  ;;  %v1135_v9 = vadd.f32 %v4088_v11, %v1064_v26  ;;  %v805_v31 = vsub.f32 %v3838_v33, %v4140_v27  ;;  %v559_v48 = vsel %vm90_vm0, %v397_v36, 0.0  ;;  %v77_v26 = vld [vmem:[%s5506_s0 + $0x198] sm:$0xff]  ;;  %v241_v33 = vsel %vm90_vm0, %v76_v47, 0.0 }
  0xbd   :  { %v3287_v0 = vpop.eup %3286  ;;  %3292 = vrsqrt.f32 %v869_v59  ;;  %v614_v58 = vmul.f32 0.03125, %v444_v5  ;;  %233 = vadd.xlane.f32.xlu1 %v232_v7  ;;  %v679_v18 = vmul.f32 %v4168_v2, %v4168_v2 }
  0xbe   :  { %v447_v35 = vpop.xlane.xlu1 %446  ;;  %3001 = vmatmul.mubr.msk.f32.gmra.mrb[4].mxu0 %vm90_vm0, %v1135_v9  ;;  %v994_v14 = vmul.f32 %v3287_v0, %v802_v62 }
  0xbf   :  { %v3289_v16 = vpop.eup %3288  ;;  %v742_v19 = vsub.f32 %v614_v58, %v678_v60  ;;  %v615_v20 = vmul.f32 0.03125, %v447_v35  ;;  %551 = vadd.xlane.f32.xlu0 %v550_v34  ;;  %v398_v60 = vmul.f32 %v76_v47, %v76_v47  ;;  %v244_v58 = vsel %vm90_vm0, %v77_v26, 0.0 }
  0xc0   :  { %v129_v22 = vpop.xlane.xlu0 %128  ;;  %v1065_v45 = vmul.f32 %v4080_v3, %v994_v14  ;;  %v995_v24 = vmul.f32 %v3289_v16, %v803_v23  ;;  %v399_v23 = vmul.f32 %v77_v26, %v77_v26  ;;  %v806_v14 = vsub.f32 %v3858_v41, %v4159_v51  ;;  %v80_v26 = vld [vmem:[%s5506_s0 + $0x1b0] sm:$0xff] }
  0xc1   :  { %v870_v1 = vadd.f32 1e-05, %v742_v19  ;;  %v743_v10 = vsub.f32 %v615_v20, %v679_v18  ;;  %v4187_v29 = vmul.f32 0.03125, %v129_v22  ;;  %554 = vadd.xlane.f32.xlu1 %v553_v12  ;;  %v562_v20 = vsel %vm90_vm0, %v398_v60, 0.0 }
  0xc2   :  { %v132_v30 = vpop.xlane.xlu1 %131  ;;  %v1136_v32 = vadd.f32 %v4088_v11, %v1065_v45  ;;  %v1066_v52 = vmul.f32 %v4080_v3, %v995_v24  ;;  %v807_v41 = vsub.f32 %v3864_v44, %v4168_v2  ;;  %v565_v45 = vsel %vm90_vm0, %v399_v23, 0.0 }
  0xc3   :  { %3294 = vrsqrt.f32 %v870_v1  ;;  %v871_v37 = vadd.f32 1e-05, %v743_v10  ;;  %v680_v38 = vmul.f32 %v4187_v29, %v4187_v29  ;;  %236 = vadd.xlane.f32.xlu0 %v235_v25  ;;  %v4196_v40 = vmul.f32 0.03125, %v132_v30  ;;  %v78_v25 = vld [vmem:[%s5506_s0 + $0x1a0] sm:$0xff] }
  0xc4   :  { %3003 = vmatprep.mubr.msk.f32.mxu0 %vm90_vm0, %v1136_v32  ;;  %v450_v42 = vpop.xlane.xlu0 %449  ;;  %v1137_v43 = vadd.f32 %v4088_v11, %v1066_v52  ;;  %v79_v32 = vld [vmem:[%s5506_s0 + $0x1a8] sm:$0xff]  ;;  %v247_v44 = vsel %vm90_vm0, %v78_v25, 0.0  ;;  %v400_v36 = vmul.f32 %v78_v25, %v78_v25 }
  0xc5   :  { %v3291_v17 = vpop.eup %3290  ;;  %3296 = vrsqrt.f32 %v871_v37  ;;  %v616_v4 = vmul.f32 0.03125, %v450_v42  ;;  %239 = vadd.xlane.f32.xlu1 %v238_v15  ;;  %v681_v54 = vmul.f32 %v4196_v40, %v4196_v40 }
  0xc6   :  { %v453_v13 = vpop.xlane.xlu1 %452  ;;  %3004 = vmatmul.mubr.msk.f32.gmra.mrb[6].mxu0 %vm90_vm0, %v1137_v43  ;;  %v996_v49 = vmul.f32 %v3291_v17, %v804_v39 }
  0xc7   :  { %v3293_v50 = vpop.eup %3292  ;;  %v744_v56 = vsub.f32 %v616_v4, %v680_v38  ;;  %v617_v7 = vmul.f32 0.03125, %v453_v13  ;;  %557 = vadd.xlane.f32.xlu0 %v556_v46  ;;  %v250_v46 = vsel %vm90_vm0, %v79_v32, 0.0  ;;  %v401_v4 = vmul.f32 %v79_v32, %v79_v32 }
  0xc8   :  { %v135_v57 = vpop.xlane.xlu0 %134  ;;  %v1067_v27 = vmul.f32 %v4080_v3, %v996_v49  ;;  %v997_v59 = vmul.f32 %v3293_v50, %v805_v31  ;;  %v808_v13 = vsub.f32 %v3884_v53, %v4187_v29  ;;  %v809_v53 = vsub.f32 %v3890_v55, %v4196_v40 }
  0xc9   :  { %v872_v62 = vadd.f32 1e-05, %v744_v56  ;;  %v745_v5 = vsub.f32 %v617_v7, %v681_v54  ;;  %v4215_v9 = vmul.f32 0.03125, %v135_v57  ;;  %560 = vadd.xlane.f32.xlu1 %v559_v48  ;;  %v568_v54 = vsel %vm90_vm0, %v400_v36, 0.0  ;;  %v83_v36 = vld [vmem:[%s5506_s0 + $0x1c8] sm:$0xff] }
  0xca   :  { %v138_v34 = vpop.xlane.xlu1 %137  ;;  %v1138_v0 = vadd.f32 %v4088_v11, %v1067_v27  ;;  %v1068_v6 = vmul.f32 %v4080_v3, %v997_v59  ;;  %v571_v57 = vsel %vm90_vm0, %v401_v4, 0.0  ;;  %v253_v55 = vsel %vm90_vm0, %v80_v26, 0.0 }
  0xcb   :  { %3298 = vrsqrt.f32 %v872_v62  ;;  %v873_v35 = vadd.f32 1e-05, %v745_v5  ;;  %v682_v12 = vmul.f32 %v4215_v9, %v4215_v9  ;;  %242 = vadd.xlane.f32.xlu0 %v241_v33  ;;  %v4224_v16 = vmul.f32 0.03125, %v138_v34  ;;  %v81_v5 = vld [vmem:[%s5506_s0 + $0x1b8] sm:$0xff] }
  0xcc   :  { %3006 = vmatprep.mubr.msk.f32.mxu0 %vm90_vm0, %v1138_v0  ;;  %v456_v18 = vpop.xlane.xlu0 %455  ;;  %v1139_v19 = vadd.f32 %v4088_v11, %v1068_v6  ;;  %v810_v25 = vsub.f32 %v3904_v61, %v4215_v9 }
  0xcd   :  { %v3295_v21 = vpop.eup %3294  ;;  %3300 = vrsqrt.f32 %v873_v35  ;;  %v618_v22 = vmul.f32 0.03125, %v456_v18  ;;  %245 = vadd.xlane.f32.xlu1 %v244_v58  ;;  %v683_v1 = vmul.f32 %v4224_v16, %v4224_v16  ;;  %v402_v58 = vmul.f32 %v80_v26, %v80_v26 }
  0xce   :  { %v459_v51 = vpop.xlane.xlu1 %458  ;;  %3007 = vmatmul.mubr.msk.f32.gmra.mrb[8].mxu0 %vm90_vm0, %v1139_v19  ;;  %v998_v24 = vmul.f32 %v3295_v21, %v806_v14  ;;  %v256_v18 = vsel %vm90_vm0, %v81_v5, 0.0  ;;  %v811_v61 = vsub.f32 %v3910_v63, %v4224_v16 }
  0xcf   :  { %v3297_v28 = vpop.eup %3296  ;;  %v746_v10 = vsub.f32 %v618_v22, %v682_v12  ;;  %v619_v30 = vmul.f32 0.03125, %v459_v51  ;;  %563 = vadd.xlane.f32.xlu0 %v562_v20  ;;  %v403_v20 = vmul.f32 %v81_v5, %v81_v5 }
  0xd0   :  { %v141_v15 = vpop.xlane.xlu0 %140  ;;  %v1069_v2 = vmul.f32 %v4080_v3, %v998_v24  ;;  %v999_v52 = vmul.f32 %v3297_v28, %v807_v41  ;;  %v574_v24 = vsel %vm90_vm0, %v402_v58, 0.0 }
  0xd1   :  { %v874_v37 = vadd.f32 1e-05, %v746_v10  ;;  %v747_v38 = vsub.f32 %v619_v30, %v683_v1  ;;  %v4243_v39 = vmul.f32 0.03125, %v141_v15  ;;  %566 = vadd.xlane.f32.xlu1 %v565_v45  ;;  %v82_v10 = vld [vmem:[%s5506_s0 + $0x1c0] sm:$0xff]  ;;  %v577_v30 = vsel %vm90_vm0, %v403_v20, 0.0 }
  0xd2   :  { %v144_v42 = vpop.xlane.xlu1 %143  ;;  %v1140_v43 = vadd.f32 %v4088_v11, %v1069_v2  ;;  %v1070_v17 = vmul.f32 %v4080_v3, %v999_v52  ;;  %v259_v63 = vsel %vm90_vm0, %v82_v10, 0.0 }
  0xd3   :  { %3302 = vrsqrt.f32 %v874_v37  ;;  %v875_v47 = vadd.f32 1e-05, %v747_v38  ;;  %v684_v31 = vmul.f32 %v4243_v39, %v4243_v39  ;;  %248 = vadd.xlane.f32.xlu0 %v247_v44  ;;  %v4252_v48 = vmul.f32 0.03125, %v144_v42 }
  0xd4   :  { %3009 = vmatprep.mubr.msk.f32.mxu0 %vm90_vm0, %v1140_v43  ;;  %v462_v49 = vpop.xlane.xlu0 %461  ;;  %v1141_v50 = vadd.f32 %v4088_v11, %v1070_v17  ;;  %v404_v42 = vmul.f32 %v82_v10, %v82_v10 }
  0xd5   :  { %v3299_v56 = vpop.eup %3298  ;;  %3304 = vrsqrt.f32 %v875_v47  ;;  %v620_v7 = vmul.f32 0.03125, %v462_v49  ;;  %251 = vadd.xlane.f32.xlu1 %v250_v46  ;;  %v685_v59 = vmul.f32 %v4252_v48, %v4252_v48  ;;  %v405_v49 = vmul.f32 %v83_v36, %v83_v36 }
  0xd6   :  { %v465_v29 = vpop.xlane.xlu1 %464  ;;  %3010 = vmatmul.mubr.msk.f32.gmra.mrb[10].mxu0 %vm90_vm0, %v1141_v50  ;;  %v1000_v33 = vmul.f32 %v3299_v56, %v808_v13  ;;  %v812_v56 = vsub.f32 %v3924_v8, %v4243_v39  ;;  %v3658_v8 = vld [vmem:[%s5506_s0 + $0x88] sm:$0xff] }
  0xd7   :  { %v3301_v27 = vpop.eup %3300  ;;  %v748_v60 = vsub.f32 %v620_v7, %v684_v31  ;;  %v621_v62 = vmul.f32 0.03125, %v465_v29  ;;  %569 = vadd.xlane.f32.xlu0 %v568_v54  ;;  %v262_v31 = vsel %vm90_vm0, %v83_v36, 0.0  ;;  %v580_v29 = vsel %vm90_vm0, %v404_v42, 0.0 }
  0xd8   :  { %v147_v34 = vpop.xlane.xlu0 %146  ;;  %v1071_v40 = vmul.f32 %v4080_v3, %v1000_v33  ;;  %v1001_v0 = vmul.f32 %v3301_v27, %v809_v53  ;;  %v84_v27 = vld [vmem:[%s5506_s0 + $0x1d0] sm:$0xff]  ;;  %v813_v39 = vsub.f32 %v3658_v8, %v4252_v48 }
  0xd9   :  { %v876_v6 = vadd.f32 1e-05, %v748_v60  ;;  %v749_v23 = vsub.f32 %v621_v62, %v685_v59  ;;  %v4271_v35 = vmul.f32 0.03125, %v147_v34  ;;  %572 = vadd.xlane.f32.xlu1 %v571_v57  ;;  %v583_v60 = vsel %vm90_vm0, %v405_v49, 0.0 }
  0xda   :  { %v150_v12 = vpop.xlane.xlu1 %149  ;;  %v1142_v14 = vadd.f32 %v4088_v11, %v1071_v40  ;;  %v1072_v19 = vmul.f32 %v4080_v3, %v1001_v0  ;;  %v85_v0 = vld [vmem:[%s5506_s0 + $0x1d8] sm:$0xff]  ;;  %v265_v48 = vsel %vm90_vm0, %v84_v27, 0.0 }
  0xdb   :  { %3306 = vrsqrt.f32 %v876_v6  ;;  %v877_v21 = vadd.f32 1e-05, %v749_v23  ;;  %v686_v22 = vmul.f32 %v4271_v35, %v4271_v35  ;;  %254 = vadd.xlane.f32.xlu0 %v253_v55  ;;  %v4280_v41 = vmul.f32 0.03125, %v150_v12 }
  0xdc   :  { %3012 = vmatprep.mubr.msk.f32.mxu0 %vm90_vm0, %v1142_v14  ;;  %v468_v51 = vpop.xlane.xlu0 %467  ;;  %v1143_v45 = vadd.f32 %v4088_v11, %v1072_v19  ;;  %v406_v12 = vmul.f32 %v84_v27, %v84_v27  ;;  %v3661_v27 = vld [vmem:[%s5506_s0 + $0xa0] sm:$0xff] }
  0xdd   :  { %v3303_v28 = vpop.eup %3302  ;;  %3308 = vrsqrt.f32 %v877_v21  ;;  %v622_v1 = vmul.f32 0.03125, %v468_v51  ;;  %257 = vadd.xlane.f32.xlu1 %v256_v18  ;;  %v687_v44 = vmul.f32 %v4280_v41, %v4280_v41  ;;  %v407_v51 = vmul.f32 %v85_v0, %v85_v0 }
  0xde   :  { %v471_v9 = vpop.xlane.xlu1 %470  ;;  %3013 = vmatmul.mubr.msk.f32.gmra.mrb[12].mxu0 %vm90_vm0, %v1143_v45  ;;  %v1002_v32 = vmul.f32 %v3303_v28, %v810_v25  ;;  %v3659_v28 = vld [vmem:[%s5506_s0 + $0x90] sm:$0xff] }
  0xdf   :  { %v3305_v15 = vpop.eup %3304  ;;  %v750_v2 = vsub.f32 %v622_v1, %v686_v22  ;;  %v623_v52 = vmul.f32 0.03125, %v471_v9  ;;  %575 = vadd.xlane.f32.xlu0 %v574_v24  ;;  %v268_v22 = vsel %vm90_vm0, %v85_v0, 0.0  ;;  %v814_v1 = vsub.f32 %v3659_v28, %v4271_v35  ;;  %v3660_v35 = vld [vmem:[%s5506_s0 + $0x98] sm:$0xff] }
  0xe0   :  { %v153_v37 = vpop.xlane.xlu0 %152  ;;  %v1073_v16 = vmul.f32 %v4080_v3, %v1002_v32  ;;  %v1003_v38 = vmul.f32 %v3305_v15, %v811_v61  ;;  %v589_v36 = vsel %vm90_vm0, %v407_v51, 0.0 }
  0xe1   :  { %v878_v43 = vadd.f32 1e-05, %v750_v2  ;;  %v751_v46 = vsub.f32 %v623_v52, %v687_v44  ;;  %v4299_v17 = vmul.f32 0.03125, %v153_v37  ;;  %578 = vadd.xlane.f32.xlu1 %v577_v30  ;;  %v586_v30 = vsel %vm90_vm0, %v406_v12, 0.0  ;;  %v86_v44 = vld [vmem:[%s5506_s0 + $0x1e0] sm:$0xff] }
  0xe2   :  { %v156_v4 = vpop.xlane.xlu1 %155  ;;  %v1144_v47 = vadd.f32 %v4088_v11, %v1073_v16  ;;  %v1074_v13 = vmul.f32 %v4080_v3, %v1003_v38  ;;  %v815_v2 = vsub.f32 %v3660_v35, %v4280_v41  ;;  %v271_v41 = vsel %vm90_vm0, %v86_v44, 0.0 }
  0xe3   :  { %3310 = vrsqrt.f32 %v878_v43  ;;  %v879_v50 = vadd.f32 1e-05, %v751_v46  ;;  %v688_v54 = vmul.f32 %v4299_v17, %v4299_v17  ;;  %260 = vadd.xlane.f32.xlu0 %v259_v63  ;;  %v4308_v7 = vmul.f32 0.03125, %v156_v4  ;;  %v87_v43 = vld [vmem:[%s5506_s0 + $0x1e8] sm:$0xff] }
  0xe4   :  { %3015 = vmatprep.mubr.msk.f32.mxu0 %vm90_vm0, %v1144_v47  ;;  %v474_v26 = vpop.xlane.xlu0 %473  ;;  %v1145_v53 = vadd.f32 %v4088_v11, %v1074_v13  ;;  %v816_v8 = vsub.f32 %v3661_v27, %v4299_v17  ;;  %v3662_v17 = vld [vmem:[%s5506_s0 + $0xa8] sm:$0xff] }
  0xe5   :  { %v3307_v57 = vpop.eup %3306  ;;  %3312 = vrsqrt.f32 %v879_v50  ;;  %v624_v33 = vmul.f32 0.03125, %v474_v26  ;;  %263 = vadd.xlane.f32.xlu1 %v262_v31  ;;  %v689_v34 = vmul.f32 %v4308_v7, %v4308_v7  ;;  %v408_v31 = vmul.f32 %v86_v44, %v86_v44  ;;  %v3663_v44 = vld [vmem:[%s5506_s0 + $0xb0] sm:$0xff] }
  0xe6   :  { %v477_v59 = vpop.xlane.xlu1 %476  ;;  %3016 = vmatmul.mubr.msk.f32.gmra.mrb[14].mxu0 %vm90_vm0, %v1145_v53  ;;  %v1004_v62 = vmul.f32 %v3307_v57, %v812_v56  ;;  %v274_v26 = vsel %vm90_vm0, %v87_v43, 0.0 }
  0xe7   :  { %v3309_v5 = vpop.eup %3308  ;;  %v752_v55 = vsub.f32 %v624_v33, %v688_v54  ;;  %v625_v40 = vmul.f32 0.03125, %v477_v59  ;;  %581 = vadd.xlane.f32.xlu0 %v580_v29  ;;  %v409_v29 = vmul.f32 %v87_v43, %v87_v43 }
  0xe8   :  { %v159_v58 = vpop.xlane.xlu0 %158  ;;  %v1075_v6 = vmul.f32 %v4080_v3, %v1004_v62  ;;  %v1005_v23 = vmul.f32 %v3309_v5, %v813_v39  ;;  %v592_v62 = vsel %vm90_vm0, %v408_v31, 0.0 }
  0xe9   :  { %v880_v14 = vadd.f32 1e-05, %v752_v55  ;;  %v753_v18 = vsub.f32 %v625_v40, %v689_v34  ;;  %v4329_v19 = vmul.f32 0.03125, %v159_v58  ;;  %584 = vadd.xlane.f32.xlu1 %v583_v60  ;;  %v88_v55 = vld [vmem:[%s5506_s0 + $0x1f0] sm:$0xff]  ;;  %v817_v40 = vsub.f32 %v3662_v17, %v4308_v7  ;;  %v3666_v17 = vld [vmem:[%s5506_s0 + $0xc8] sm:$0xff] }
  0xea   :  { %v162_v20 = vpop.xlane.xlu1 %161  ;;  %v1146_v21 = vadd.f32 %v4088_v11, %v1075_v6  ;;  %v1076_v25 = vmul.f32 %v4080_v3, %v1005_v23  ;;  %v595_v58 = vsel %vm90_vm0, %v409_v29, 0.0  ;;  %v277_v7 = vsel %vm90_vm0, %v88_v55, 0.0 }
  0xeb   :  { %3314 = vrsqrt.f32 %v880_v14  ;;  %v881_v45 = vadd.f32 1e-05, %v753_v18  ;;  %v690_v24 = vmul.f32 %v4329_v19, %v4329_v19  ;;  %266 = vadd.xlane.f32.xlu0 %v265_v48  ;;  %v4340_v10 = vmul.f32 0.03125, %v162_v20  ;;  %v89_v18 = vld [vmem:[%s5506_s0 + $0x1f8] sm:$0xff] }
  0xec   :  { %3018 = vmatprep.mubr.msk.f32.mxu0 %vm90_vm0, %v1146_v21  ;;  %v480_v61 = vpop.xlane.xlu0 %479  ;;  %v1147_v9 = vadd.f32 %v4088_v11, %v1076_v25  ;;  %v410_v25 = vmul.f32 %v88_v55, %v88_v55  ;;  %v818_v35 = vsub.f32 %v3663_v44, %v4329_v19 }
  0xed   :  { %v3311_v32 = vpop.eup %3310  ;;  %3316 = vrsqrt.f32 %v881_v45  ;;  %v626_v15 = vmul.f32 0.03125, %v480_v61  ;;  %269 = vadd.xlane.f32.xlu1 %v268_v22  ;;  %v691_v16 = vmul.f32 %v4340_v10, %v4340_v10  ;;  %v280_v61 = vsel %vm90_vm0, %v89_v18, 0.0 }
  0xee   :  { %v483_v52 = vpop.xlane.xlu1 %482  ;;  %3019 = vmatmul.mubr.msk.f32.gmra.mrb[16].mxu0 %vm90_vm0, %v1147_v9  ;;  %v1006_v37 = vmul.f32 %v3311_v32, %v814_v1 }
  0xef   :  { %v3313_v63 = vpop.eup %3312  ;;  %v754_v38 = vsub.f32 %v626_v15, %v690_v24  ;;  %v627_v42 = vmul.f32 0.03125, %v483_v52  ;;  %587 = vadd.xlane.f32.xlu0 %v586_v30  ;;  %v411_v30 = vmul.f32 %v89_v18, %v89_v18 }
  0xf0   :  { %v165_v46 = vpop.xlane.xlu0 %164  ;;  %v1077_v4 = vmul.f32 %v4080_v3, %v1006_v37  ;;  %v1007_v47 = vmul.f32 %v3313_v63, %v815_v2  ;;  %v598_v37 = vsel %vm90_vm0, %v410_v25, 0.0 }
  0xf1   :  { %v882_v13 = vadd.f32 1e-05, %v754_v38  ;;  %v755_v49 = vsub.f32 %v627_v42, %v691_v16  ;;  %v4361_v50 = vmul.f32 0.03125, %v165_v46  ;;  %590 = vadd.xlane.f32.xlu1 %v589_v36  ;;  %v3664_v38 = vld [vmem:[%s5506_s0 + $0xb8] sm:$0xff]  ;;  %v601_v43 = vsel %vm90_vm0, %v411_v30, 0.0 }
  0xf2   :  { %v168_v54 = vpop.xlane.xlu1 %167  ;;  %v1148_v56 = vadd.f32 %v4088_v11, %v1077_v4  ;;  %v1078_v53 = vmul.f32 %v4080_v3, %v1007_v47  ;;  %v819_v42 = vsub.f32 %v3664_v38, %v4340_v10 }
  0xf3   :  { %3318 = vrsqrt.f32 %v882_v13  ;;  %v883_v57 = vadd.f32 1e-05, %v755_v49  ;;  %v692_v33 = vmul.f32 %v4361_v50, %v4361_v50  ;;  %272 = vadd.xlane.f32.xlu0 %v271_v41  ;;  %v4372_v39 = vmul.f32 0.03125, %v168_v54 }
  0xf4   :  { %3021 = vmatprep.mubr.msk.f32.mxu0 %vm90_vm0, %v1148_v56  ;;  %v486_v59 = vpop.xlane.xlu0 %485  ;;  %v1149_v60 = vadd.f32 %v4088_v11, %v1078_v53 }
  0xf5   :  { %v3315_v5 = vpop.eup %3314  ;;  %3320 = vrsqrt.f32 %v883_v57  ;;  %v628_v34 = vmul.f32 0.03125, %v486_v59  ;;  %275 = vadd.xlane.f32.xlu1 %v274_v26  ;;  %v693_v23 = vmul.f32 %v4372_v39, %v4372_v39 }
  0xf6   :  { %v489_v0 = vpop.xlane.xlu1 %488  ;;  %3022 = vmatmul.mubr.msk.f32.gmra.mrb[18].mxu0 %vm90_vm0, %v1149_v60  ;;  %v1008_v48 = vmul.f32 %v3315_v5, %v816_v8  ;;  %v3665_v8 = vld [vmem:[%s5506_s0 + $0xc0] sm:$0xff] }
  0xf7   :  { %v3317_v6 = vpop.eup %3316  ;;  %v756_v12 = vsub.f32 %v628_v34, %v692_v33  ;;  %v629_v14 = vmul.f32 0.03125, %v489_v0  ;;  %593 = vadd.xlane.f32.xlu0 %v592_v62  ;;  %v820_v59 = vsub.f32 %v3665_v8, %v4361_v50  ;;  %v3671_v8 = vld [vmem:[%s5506_s0 + $0xe0] sm:$0xff] }
  0xf8   :  { %v171_v20 = vpop.xlane.xlu0 %170  ;;  %v1079_v21 = vmul.f32 %v4080_v3, %v1008_v48  ;;  %v1009_v22 = vmul.f32 %v3317_v6, %v817_v40  ;;  %v821_v40 = vsub.f32 %v3666_v17, %v4372_v39  ;;  %v2231_v39 = vld [vmem:[%s5510_s5 + $0x8] sm:$0xff] }
  0xf9   :  { %v884_v51 = vadd.f32 1e-05, %v756_v12  ;;  %v757_v45 = vsub.f32 %v629_v14, %v693_v23  ;;  %v4393_v24 = vmul.f32 0.03125, %v171_v20  ;;  %596 = vadd.xlane.f32.xlu1 %v595_v58  ;;  %v2230_v20 = vld [vmem:[%s5510_s5] sm:$0xff] }
  0xfa   :  { %v174_v28 = vpop.xlane.xlu1 %173  ;;  %v1150_v1 = vadd.f32 %v4088_v11, %v1079_v21  ;;  %v1080_v9 = vmul.f32 %v4080_v3, %v1009_v22  ;;  %v3226_v25 = vpack.c.bf16 %v2231_v39, %v2230_v20 }
  0xfb   :  { %3322 = vrsqrt.f32 %v884_v51  ;;  %v885_v32 = vadd.f32 1e-05, %v757_v45  ;;  %v694_v15 = vmul.f32 %v4393_v24, %v4393_v24  ;;  %278 = vadd.xlane.f32.xlu0 %v277_v7  ;;  %v4404_v2 = vmul.f32 0.03125, %v174_v28 }
  0xfc   :  { %3024 = vmatprep.mubr.msk.f32.mxu0 %vm90_vm0, %v1150_v1  ;;  %v492_v52 = vpop.xlane.xlu0 %491  ;;  %v1151_v36 = vadd.f32 %v4088_v11, %v1080_v9  ;;  %3227 = vmatprep.subr.bf16.mxu0 %v3226_v25  ;;  %v3667_v9 = vld [vmem:[%s5506_s0 + $0xd0] sm:$0xff] }
  0xfd   :  { %v3319_v63 = vpop.eup %3318  ;;  %3324 = vrsqrt.f32 %v885_v32  ;;  %v630_v16 = vmul.f32 0.03125, %v492_v52  ;;  %281 = vadd.xlane.f32.xlu1 %v280_v61  ;;  %v695_v4 = vmul.f32 %v4404_v2, %v4404_v2  ;;  %3258 = vmatprep.subr.bf16.mxu1 %v3226_v25  ;;  %v822_v30 = vsub.f32 %v3667_v9, %v4393_v24  ;;  %v2232_v52 = vld [vmem:[%s5510_s5 + $0x10] sm:$0xff]  ;;  %v3668_v24 = vld [vmem:[%s5506_s0 + $0xd8] sm:$0xff] }
  0xfe   :  { %v495_v19 = vpop.xlane.xlu1 %494  ;;  %3025 = vmatmul.mubr.msk.f32.gmra.mrb[20].mxu0 %vm90_vm0, %v1151_v36  ;;  %v1010_v46 = vmul.f32 %v3319_v63, %v818_v35  ;;  %v2233_v36 = vld [vmem:[%s5510_s5 + $0x18] sm:$0xff]  ;;  %3266 = vmatpush3.bf16.msra.mxu1 %v3226_v25 }
  0xff   :  { %v3321_v41 = vpop.eup %3320  ;;  %v758_v47 = vsub.f32 %v630_v16, %v694_v15  ;;  %v631_v31 = vmul.f32 0.03125, %v495_v19  ;;  %599 = vadd.xlane.f32.xlu0 %v598_v37  ;;  %3229 = vmatpush3.bf16.msra.mxu0 %v3226_v25  ;;  %v823_v37 = vsub.f32 %v3668_v24, %v4404_v2  ;;  %v3230_v16 = vpack.c.bf16 %v2233_v36, %v2232_v52 }
 0x100   :  { %v177_v13 = vpop.xlane.xlu0 %176  ;;  %v1081_v49 = vmul.f32 %v4080_v3, %v1010_v46  ;;  %v1011_v54 = vmul.f32 %v3321_v41, %v819_v42  ;;  %v4476_v41 = vld [vmem:[%s5508_s1] ss:$0 sm:$0xff] }
 0x101   :  { %v886_v56 = vadd.f32 1e-05, %v758_v47  ;;  %v759_v26 = vsub.f32 %v631_v31, %v695_v4  ;;  %v4418_v10 = vmul.f32 0.03125, %v177_v13  ;;  %602 = vadd.xlane.f32.xlu1 %v601_v43  ;;  %3231 = vmatprep.subr.bf16.mxu0 %v3230_v16 }
 0x102   :  { %v180_v53 = vpop.xlane.xlu1 %179  ;;  %v1152_v29 = vadd.f32 %v4088_v11, %v1081_v49  ;;  %v1082_v57 = vmul.f32 %v4080_v3, %v1011_v54  ;;  %3259 = vmatprep.subr.bf16.mxu1 %v3230_v16  ;;  %v2234_v49 = vld [vmem:[%s5510_s5 + $0x20] sm:$0xff]  ;;  %v2235_v54 = vld [vmem:[%s5510_s5 + $0x28] sm:$0xff] }
 0x103   :  { %3326 = vrsqrt.f32 %v886_v56  ;;  %v887_v33 = vadd.f32 1e-05, %v759_v26  ;;  %v696_v27 = vmul.f32 %v4418_v10, %v4418_v10  ;;  %v4428_v60 = vmul.f32 0.03125, %v180_v53  ;;  %3233 = vmatpush3.bf16.msra.mxu0 %v3230_v16  ;;  %3267 = vmatpush3.bf16.msra.mxu1 %v3230_v16  ;;  %v4490_v26 = vld [vmem:[%s5509_s2] ss:$0 sm:$0xff] }
 0x104   :  { %3027 = vmatprep.mubr.msk.f32.mxu0 %vm90_vm0, %v1152_v29  ;;  %v498_v62 = vpop.xlane.xlu0 %497  ;;  %v1153_v5 = vadd.f32 %v4088_v11, %v1082_v57  ;;  %v3234_v57 = vpack.c.bf16 %v2235_v54, %v2234_v49 }
 0x105   :  { %v3323_v34 = vpop.eup %3322  ;;  %3328 = vrsqrt.f32 %v887_v33  ;;  %v632_v55 = vmul.f32 0.03125, %v498_v62  ;;  %v697_v48 = vmul.f32 %v4428_v60, %v4428_v60 }
 0x106   :  { %v501_v0 = vpop.xlane.xlu1 %500  ;;  %3028 = vmatmul.mubr.msk.f32.gmra.mrb[22].mxu0 %vm90_vm0, %v1153_v5  ;;  %v1012_v50 = vmul.f32 %v3323_v34, %v820_v59  ;;  %v824_v59 = vsub.f32 %v3671_v8, %v4418_v10  ;;  %3235 = vmatprep.subr.bf16.mxu0 %v3234_v57  ;;  %v2237_v10 = vld [vmem:[%s5510_s5 + $0x38] sm:$0xff] }
 0x107   :  { %v3325_v58 = vpop.eup %3324  ;;  %v760_v6 = vsub.f32 %v632_v55, %v696_v27  ;;  %v633_v23 = vmul.f32 0.03125, %v501_v0  ;;  %3237 = vmatpush3.bf16.msra.mxu0 %v3234_v57  ;;  %3260 = vmatprep.subr.bf16.mxu1 %v3234_v57  ;;  %v3672_v0 = vld [vmem:[%s5506_s0 + $0xe8] sm:$0xff] }
 0x108   :  { %v183_v12 = vpop.xlane.xlu0 %182  ;;  %v1083_v14 = vmul.f32 %v4080_v3, %v1012_v50  ;;  %v1013_v18 = vmul.f32 %v3325_v58, %v821_v40  ;;  %v2236_v40 = vld [vmem:[%s5510_s5 + $0x30] sm:$0xff]  ;;  %v825_v50 = vsub.f32 %v3672_v0, %v4428_v60  ;;  %3268 = vmatpush3.bf16.msra.mxu1 %v3234_v57 }
 0x109   :  { %v888_v7 = vadd.f32 1e-05, %v760_v6  ;;  %v761_v21 = vsub.f32 %v633_v23, %v697_v48  ;;  %v4446_v22 = vmul.f32 0.03125, %v183_v12  ;;  %v3238_v6 = vpack.c.bf16 %v2237_v10, %v2236_v40 }
 0x10a   :  { %v186_v51 = vpop.xlane.xlu1 %185  ;;  %v1154_v45 = vadd.f32 %v4088_v11, %v1083_v14  ;;  %v1084_v28 = vmul.f32 %v4080_v3, %v1013_v18 }
 0x10b   :  { %3330 = vrsqrt.f32 %v888_v7  ;;  %v889_v1 = vadd.f32 1e-05, %v761_v21  ;;  %v698_v61 = vmul.f32 %v4446_v22, %v4446_v22  ;;  %v4456_v32 = vmul.f32 0.03125, %v186_v51  ;;  %3239 = vmatprep.subr.bf16.mxu0 %v3238_v6  ;;  %3261 = vmatprep.subr.bf16.mxu1 %v3238_v6  ;;  %v2238_v51 = vld [vmem:[%s5510_s5 + $0x40] sm:$0xff] }
 0x10c   :  { %3030 = vmatprep.mubr.msk.f32.mxu0 %vm90_vm0, %v1154_v45  ;;  %v504_v15 = vpop.xlane.xlu0 %503  ;;  %v1155_v3 = vadd.f32 %v4088_v11, %v1084_v28  ;;  %3241 = vmatpush3.bf16.msra.mxu0 %v3238_v6  ;;  %v2239_v45 = vld [vmem:[%s5510_s5 + $0x48] sm:$0xff] }
 0x10d   :  { %v3327_v44 = vpop.eup %3326  ;;  %3332 = vrsqrt.f32 %v889_v1  ;;  %v634_v35 = vmul.f32 0.03125, %v504_v15  ;;  %v699_v42 = vmul.f32 %v4456_v32, %v4456_v32  ;;  %v3242_v9 = vpack.c.bf16 %v2239_v45, %v2238_v51  ;;  %3269 = vmatpush3.bf16.msra.mxu1 %v3238_v6 }
 0x10e   :  { %v507_v11 = vpop.xlane.xlu1 %506  ;;  %3031 = vmatmul.mubr.msk.f32.gmra.mrb[24].mxu0 %vm90_vm0, %v1155_v3  ;;  %v1014_v63 = vmul.f32 %v3327_v44, %v822_v30  ;;  %v3673_v3 = vld [vmem:[%s5506_s0 + $0xf0] sm:$0xff] }
 0x10f   :  { %v3329_v38 = vpop.eup %3328  ;;  %v762_v19 = vsub.f32 %v634_v35, %v698_v61  ;;  %v635_v43 = vmul.f32 0.03125, %v507_v11  ;;  %v826_v44 = vsub.f32 %v3673_v3, %v4446_v22  ;;  %3243 = vmatprep.subr.bf16.mxu0 %v3242_v9  ;;  %v2240_v11 = vld [vmem:[%s5510_s5 + $0x50] sm:$0xff]  ;;  %v2241_v22 = vld [vmem:[%s5510_s5 + $0x58] sm:$0xff]  ;;  %3262 = vmatprep.subr.bf16.mxu1 %v3242_v9 }
 0x110   :  { %v189_v46 = vpop.xlane.xlu0 %188  ;;  %v1085_v4 = vmul.f32 %v4476_v41, %v1014_v63  ;;  %v1015_v2 = vmul.f32 %v3329_v38, %v823_v37  ;;  %3245 = vmatpush3.bf16.msra.mxu0 %v3242_v9  ;;  %v3674_v63 = vld [vmem:[%s5506_s0 + $0xf8] sm:$0xff]  ;;  %v3677_v3 = vld [vmem:[%s5506_s0 + $0x110] sm:$0xff] }
 0x111   :  { %v890_v47 = vadd.f32 1e-05, %v762_v19  ;;  %v763_v31 = vsub.f32 %v635_v43, %v699_v42  ;;  %v4479_v13 = vmul.f32 0.03125, %v189_v46  ;;  %v827_v16 = vsub.f32 %v3674_v63, %v4456_v32  ;;  %3270 = vmatpush3.bf16.msra.mxu1 %v3242_v9 }
 0x112   :  { %v192_v56 = vpop.xlane.xlu1 %191  ;;  %v1156_v53 = vadd.f32 %v4490_v26, %v1085_v4  ;;  %v1086_v29 = vmul.f32 %v4476_v41, %v1015_v2  ;;  %v3246_v19 = vpack.c.bf16 %v2241_v22, %v2240_v11  ;;  %v3678_v22 = vld [vmem:[%s5506_s0 + $0x118] sm:$0xff] }
 0x113   :  { %3334 = vrsqrt.f32 %v890_v47  ;;  %v891_v33 = vadd.f32 1e-05, %v763_v31  ;;  %v700_v27 = vmul.f32 %v4479_v13, %v4479_v13  ;;  %v4500_v62 = vmul.f32 0.03125, %v192_v56 }
 0x114   :  { %3033 = vmatprep.mubr.msk.f32.mxu0 %vm90_vm0, %v1156_v53  ;;  %v510_v5 = vpop.xlane.xlu0 %509  ;;  %v1157_v34 = vadd.f32 %v4490_v26, %v1086_v29  ;;  %3247 = vmatprep.subr.bf16.mxu0 %v3246_v19  ;;  %v2242_v53 = vld [vmem:[%s5510_s5 + $0x60] sm:$0xff]  ;;  %v2243_v29 = vld [vmem:[%s5510_s5 + $0x68] sm:$0xff] }
 0x115   :  { %v3331_v55 = vpop.eup %3330  ;;  %3336 = vrsqrt.f32 %v891_v33  ;;  %v636_v17 = vmul.f32 0.03125, %v510_v5  ;;  %v701_v12 = vmul.f32 %v4500_v62, %v4500_v62  ;;  %3263 = vmatprep.subr.bf16.mxu1 %v3246_v19  ;;  %3249 = vmatpush3.bf16.msra.mxu0 %v3246_v19  ;;  %v3250_v8 = vpack.c.bf16 %v2243_v29, %v2242_v53 }
 0x116   :  { %v513_v58 = vpop.xlane.xlu1 %512  ;;  %3034 = vmatmul.mubr.msk.f32.gmra.mrb[26].mxu0 %vm90_vm0, %v1157_v34  ;;  %v1016_v48 = vmul.f32 %v3331_v55, %v824_v59  ;;  %3271 = vmatpush3.bf16.msra.mxu1 %v3246_v19  ;;  %v3675_v34 = vld [vmem:[%s5506_s0 + $0x100] sm:$0xff] }
 0x117   :  { %v3333_v23 = vpop.eup %3332  ;;  %v764_v14 = vsub.f32 %v636_v17, %v700_v27  ;;  %v637_v18 = vmul.f32 0.03125, %v513_v58  ;;  %v828_v55 = vsub.f32 %v3675_v34, %v4479_v13  ;;  %3251 = vmatprep.subr.bf16.mxu0 %v3250_v8  ;;  %v2244_v58 = vld [vmem:[%s5510_s5 + $0x70] sm:$0xff]  ;;  %v2245_v13 = vld [vmem:[%s5510_s5 + $0x78] sm:$0xff]  ;;  %3264 = vmatprep.subr.bf16.mxu1 %v3250_v8 }
 0x118   :  { %v195_v20 = vpop.xlane.xlu0 %194  ;;  %v1087_v39 = vmul.f32 %v4476_v41, %v1016_v48  ;;  %v1017_v7 = vmul.f32 %v3333_v23, %v825_v50  ;;  %v3676_v48 = vld [vmem:[%s5506_s0 + $0x108] sm:$0xff] }
 0x119   :  { %v892_v21 = vadd.f32 1e-05, %v764_v14  ;;  %v765_v60 = vsub.f32 %v637_v18, %v701_v12  ;;  %v4518_v25 = vmul.f32 0.03125, %v195_v20  ;;  %3253 = vmatpush3.bf16.msra.mxu0 %v3250_v8  ;;  %v829_v6 = vsub.f32 %v3676_v48, %v4500_v62 }
 0x11a   :  { %v198_v28 = vpop.xlane.xlu1 %197  ;;  %v1158_v1 = vadd.f32 %v4490_v26, %v1087_v39  ;;  %v1088_v61 = vmul.f32 %v4476_v41, %v1017_v7  ;;  %v3254_v14 = vpack.c.bf16 %v2245_v13, %v2244_v58  ;;  %3272 = vmatpush3.bf16.msra.mxu1 %v3250_v8 }
 0x11b   :  { %3338 = vrsqrt.f32 %v892_v21  ;;  %v893_v30 = vadd.f32 1e-05, %v765_v60  ;;  %v702_v15 = vmul.f32 %v4518_v25, %v4518_v25  ;;  %v4534_v35 = vmul.f32 0.03125, %v198_v28 }
 0x11c   :  { %3036 = vmatprep.mubr.msk.f32.mxu0 %vm90_vm0, %v1158_v1  ;;  %v516_v52 = vpop.xlane.xlu0 %515  ;;  %v1159_v36 = vadd.f32 %v4490_v26, %v1088_v61  ;;  %3255 = vmatprep.subr.bf16.mxu0 %v3254_v14 }
 0x11d   :  { %v3335_v24 = vpop.eup %3334  ;;  %3340 = vrsqrt.f32 %v893_v30  ;;  %v638_v37 = vmul.f32 0.03125, %v516_v52  ;;  %v703_v46 = vmul.f32 %v4534_v35, %v4534_v35  ;;  %3265 = vmatprep.subr.bf16.mxu1 %v3254_v14  ;;  %3257 = vmatpush3.bf16.msra.mxu0 %v3254_v14  ;;  %v831_v63 = vsub.f32 %v3678_v22, %v4534_v35 }
 0x11e   :  { %v519_v38 = vpop.xlane.xlu1 %518  ;;  %3037 = vmatmul.mubr.msk.f32.gmra.mrb[28].mxu0 %vm90_vm0, %v1159_v36  ;;  %v1018_v42 = vmul.f32 %v3335_v24, %v826_v44  ;;  %3273 = vmatpush3.bf16.msra.mxu1 %v3254_v14  ;;  %v830_v44 = vsub.f32 %v3677_v3, %v4518_v25 }
 0x11f   :  { %v3337_v43 = vpop.eup %3336  ;;  %v766_v4 = vsub.f32 %v638_v37, %v702_v15  ;;  %v639_v2 = vmul.f32 0.03125, %v519_v38 }
 0x120   :  { %v201_v47 = vpop.xlane.xlu0 %200  ;;  %v1089_v31 = vmul.f32 %v4476_v41, %v1018_v42  ;;  %v1019_v49 = vmul.f32 %v3337_v43, %v827_v16 }
 0x121   :  { %v894_v54 = vadd.f32 1e-05, %v766_v4  ;;  %v767_v32 = vsub.f32 %v639_v2, %v703_v46  ;;  %v4552_v56 = vmul.f32 0.03125, %v201_v47 }
 0x122   :  { %v204_v57 = vpop.xlane.xlu1 %203  ;;  %v1160_v33 = vadd.f32 %v4490_v26, %v1089_v31  ;;  %v1090_v27 = vmul.f32 %v4476_v41, %v1019_v49 }
 0x123   :  { %3342 = vrsqrt.f32 %v894_v54  ;;  %v895_v59 = vadd.f32 1e-05, %v767_v32  ;;  %v704_v5 = vmul.f32 %v4552_v56, %v4552_v56  ;;  %v4568_v17 = vmul.f32 0.03125, %v204_v57  ;;  %v3679_v57 = vld [vmem:[%s5506_s0 + $0x120] sm:$0xff] }
 0x124   :  { %3039 = vmatprep.mubr.msk.f32.mxu0 %vm90_vm0, %v1160_v33  ;;  %v522_v40 = vpop.xlane.xlu0 %521  ;;  %v1161_v10 = vadd.f32 %v4490_v26, %v1090_v27  ;;  %v832_v33 = vsub.f32 %v3679_v57, %v4552_v56 }
 0x125   :  { %v3339_v0 = vpop.eup %3338  ;;  %3344 = vrsqrt.f32 %v895_v59  ;;  %v640_v50 = vmul.f32 0.03125, %v522_v40  ;;  %v705_v20 = vmul.f32 %v4568_v17, %v4568_v17 }
 0x126   :  { %v525_v23 = vpop.xlane.xlu1 %524  ;;  %3040 = vmatmul.mubr.msk.f32.gmra.mrb[30].mxu0 %vm90_vm0, %v1161_v10  ;;  %v1020_v12 = vmul.f32 %v3339_v0, %v828_v55  ;;  %v3680_v55 = vld [vmem:[%s5506_s0 + $0x128] sm:$0xff] }
 0x127   :  { %v3341_v18 = vpop.eup %3340  ;;  %v768_v39 = vsub.f32 %v640_v50, %v704_v5  ;;  %v641_v7 = vmul.f32 0.03125, %v525_v23  ;;  %v833_v40 = vsub.f32 %v3680_v55, %v4568_v17 }
 0x128   :  { %v207_v21 = vpop.xlane.xlu0 %206  ;;  %v1091_v60 = vmul.f32 %v4476_v41, %v1020_v12  ;;  %v1021_v51 = vmul.f32 %v3341_v18, %v829_v6 }
 0x129   :  { %v896_v45 = vadd.f32 1e-05, %v768_v39  ;;  %v769_v62 = vsub.f32 %v641_v7, %v705_v20  ;;  %v4586_v28 = vmul.f32 0.03125, %v207_v21 }
 0x12a   :  { %v210_v1 = vpop.xlane.xlu1 %209  ;;  %v1162_v61 = vadd.f32 %v4490_v26, %v1091_v60  ;;  %v1092_v9 = vmul.f32 %v4476_v41, %v1021_v51  ;;  %v3681_v60 = vld [vmem:[%s5506_s0 + $0x130] sm:$0xff] }
 0x12b   :  { %3346 = vrsqrt.f32 %v896_v45  ;;  %v897_v30 = vadd.f32 1e-05, %v769_v62  ;;  %v706_v15 = vmul.f32 %v4586_v28, %v4586_v28  ;;  %v4596_v52 = vmul.f32 0.03125, %v210_v1 }
 0x12c   :  { %3042 = vmatprep.mubr.msk.f32.mxu0 %vm90_vm0, %v1162_v61  ;;  %v528_v36 = vpop.xlane.xlu0 %527  ;;  %v1163_v24 = vadd.f32 %v4490_v26, %v1092_v9  ;;  %v834_v51 = vsub.f32 %v3681_v60, %v4586_v28 }
 0x12d   :  { %v3343_v37 = vpop.eup %3342  ;;  %3348 = vrsqrt.f32 %v897_v30  ;;  %v642_v11 = vmul.f32 0.03125, %v528_v36  ;;  %v707_v42 = vmul.f32 %v4596_v52, %v4596_v52  ;;  %v3682_v30 = vld [vmem:[%s5506_s0 + $0x138] sm:$0xff] }
 0x12e   :  { %v531_v16 = vpop.xlane.xlu1 %530  ;;  %3043 = vmatmul.mubr.msk.f32.gmra.mrb[32].mxu0 %vm90_vm0, %v1163_v24  ;;  %v1022_v25 = vmul.f32 %v3343_v37, %v830_v44 }
 0x12f   :  { %v3345_v38 = vpop.eup %3344  ;;  %v770_v19 = vsub.f32 %v642_v11, %v706_v15  ;;  %v643_v43 = vmul.f32 0.03125, %v531_v16  ;;  %v835_v15 = vsub.f32 %v3682_v30, %v4596_v52 }
 0x130   :  { %v213_v46 = vpop.xlane.xlu0 %212  ;;  %v1093_v4 = vmul.f32 %v4476_v41, %v1022_v25  ;;  %v1023_v2 = vmul.f32 %v3345_v38, %v831_v63 }
 0x131   :  { %v898_v47 = vadd.f32 1e-05, %v770_v19  ;;  %v771_v31 = vsub.f32 %v643_v43, %v707_v42  ;;  %v4608_v49 = vmul.f32 0.03125, %v213_v46 }
 0x132   :  { %v216_v54 = vpop.xlane.xlu1 %215  ;;  %v1164_v35 = vadd.f32 %v4490_v26, %v1093_v4  ;;  %v1094_v32 = vmul.f32 %v4476_v41, %v1023_v2  ;;  %v3683_v4 = vld [vmem:[%s5506_s0 + $0x140] sm:$0xff] }
 0x133   :  { %3350 = vrsqrt.f32 %v898_v47  ;;  %v899_v53 = vadd.f32 1e-05, %v771_v31  ;;  %v708_v29 = vmul.f32 %v4608_v49, %v4608_v49  ;;  %v4618_v27 = vmul.f32 0.03125, %v216_v54 }
 0x134   :  { %3045 = vmatprep.mubr.msk.f32.mxu0 %vm90_vm0, %v1164_v35  ;;  %v534_v8 = vpop.xlane.xlu0 %533  ;;  %v1165_v59 = vadd.f32 %v4490_v26, %v1094_v32  ;;  %v836_v2 = vsub.f32 %v3683_v4, %v4608_v49 }
 0x135   :  { %v3347_v5 = vpop.eup %3346  ;;  %3352 = vrsqrt.f32 %v899_v53  ;;  %v644_v34 = vmul.f32 0.03125, %v534_v8  ;;  %v709_v50 = vmul.f32 %v4618_v27, %v4618_v27  ;;  %v3684_v53 = vld [vmem:[%s5506_s0 + $0x148] sm:$0xff] }
 0x136   :  { %v537_v10 = vpop.xlane.xlu1 %536  ;;  %3046 = vmatmul.mubr.msk.f32.gmra.mrb[34].mxu0 %vm90_vm0, %v1165_v59  ;;  %v1024_v56 = vmul.f32 %v3347_v5, %v832_v33 }
 0x137   :  { %v3349_v0 = vpop.eup %3348  ;;  %v772_v58 = vsub.f32 %v644_v34, %v708_v29  ;;  %v645_v13 = vmul.f32 0.03125, %v537_v10  ;;  %v837_v29 = vsub.f32 %v3684_v53, %v4618_v27 }
 0x138   :  { %v219_v48 = vpop.xlane.xlu0 %218  ;;  %v1095_v6 = vmul.f32 %v4476_v41, %v1024_v56  ;;  %v1025_v23 = vmul.f32 %v3349_v0, %v833_v40 }
 0x139   :  { %v900_v12 = vadd.f32 1e-05, %v772_v58  ;;  %v773_v14 = vsub.f32 %v645_v13, %v709_v50  ;;  %v4630_v18 = vmul.f32 0.03125, %v219_v48 }
 0x13a   :  { %v222_v20 = vpop.xlane.xlu1 %221  ;;  %v1166_v17 = vadd.f32 %v4490_v26, %v1095_v6  ;;  %v1096_v39 = vmul.f32 %v4476_v41, %v1025_v23  ;;  %v3685_v6 = vld [vmem:[%s5506_s0 + $0x150] sm:$0xff] }
 0x13b   :  { %3354 = vrsqrt.f32 %v900_v12  ;;  %v901_v7 = vadd.f32 1e-05, %v773_v14  ;;  %v710_v21 = vmul.f32 %v4630_v18, %v4630_v18  ;;  %v4640_v45 = vmul.f32 0.03125, %v222_v20 }
 0x13c   :  { %3048 = vmatprep.mubr.msk.f32.mxu0 %vm90_vm0, %v1166_v17  ;;  %v540_v62 = vpop.xlane.xlu0 %539  ;;  %v1167_v1 = vadd.f32 %v4490_v26, %v1096_v39  ;;  %v838_v23 = vsub.f32 %v3685_v6, %v4630_v18 }
 0x13d   :  { %v3351_v61 = vpop.eup %3350  ;;  %3356 = vrsqrt.f32 %v901_v7  ;;  %v646_v9 = vmul.f32 0.03125, %v540_v62  ;;  %v711_v36 = vmul.f32 %v4640_v45, %v4640_v45  ;;  %v3686_v7 = vld [vmem:[%s5506_s0 + $0x158] sm:$0xff] }
 0x13e   :  { %v543_v3 = vpop.xlane.xlu1 %542  ;;  %3049 = vmatmul.mubr.msk.f32.gmra.mrb[36].mxu0 %vm90_vm0, %v1167_v1  ;;  %v1026_v28 = vmul.f32 %v3351_v61, %v834_v51 }
 0x13f   :  { %v3353_v44 = vpop.eup %3352  ;;  %v774_v24 = vsub.f32 %v646_v9, %v710_v21  ;;  %v647_v37 = vmul.f32 0.03125, %v543_v3  ;;  %v839_v21 = vsub.f32 %v3686_v7, %v4640_v45 }
 0x140   :  { %v225_v11 = vpop.xlane.xlu0 %224  ;;  %v1097_v22 = vmul.f32 %v4476_v41, %v1026_v28  ;;  %v1027_v63 = vmul.f32 %v3353_v44, %v835_v15 }
 0x141   :  { %v902_v16 = vadd.f32 1e-05, %v774_v24  ;;  %v775_v25 = vsub.f32 %v647_v37, %v711_v36  ;;  %v4652_v38 = vmul.f32 0.03125, %v225_v11 }
 0x142   :  { %v228_v42 = vpop.xlane.xlu1 %227  ;;  %v1168_v52 = vadd.f32 %v4490_v26, %v1097_v22  ;;  %v1098_v19 = vmul.f32 %v4476_v41, %v1027_v63  ;;  %v3687_v22 = vld [vmem:[%s5506_s0 + $0x160] sm:$0xff] }
 0x143   :  { %3358 = vrsqrt.f32 %v902_v16  ;;  %v903_v43 = vadd.f32 1e-05, %v775_v25  ;;  %v712_v46 = vmul.f32 %v4652_v38, %v4652_v38  ;;  %v4662_v47 = vmul.f32 0.03125, %v228_v42 }
 0x144   :  { %3051 = vmatprep.mubr.msk.f32.mxu0 %vm90_vm0, %v1168_v52  ;;  %v546_v31 = vpop.xlane.xlu0 %545  ;;  %v1169_v54 = vadd.f32 %v4490_v26, %v1098_v19  ;;  %v840_v63 = vsub.f32 %v3687_v22, %v4652_v38 }
 0x145   :  { %v3355_v35 = vpop.eup %3354  ;;  %3360 = vrsqrt.f32 %v903_v43  ;;  %v648_v32 = vmul.f32 0.03125, %v546_v31  ;;  %v713_v8 = vmul.f32 %v4662_v47, %v4662_v47  ;;  %v3688_v43 = vld [vmem:[%s5506_s0 + $0x168] sm:$0xff] }
 0x146   :  { %v549_v57 = vpop.xlane.xlu1 %548  ;;  %3052 = vmatmul.mubr.msk.f32.gmra.mrb[38].mxu0 %vm90_vm0, %v1169_v54  ;;  %v1028_v49 = vmul.f32 %v3355_v35, %v836_v2 }
 0x147   :  { %v3357_v33 = vpop.eup %3356  ;;  %v776_v59 = vsub.f32 %v648_v32, %v712_v46  ;;  %v649_v5 = vmul.f32 0.03125, %v549_v57  ;;  %v841_v46 = vsub.f32 %v3688_v43, %v4662_v47 }
 0x148   :  { %v231_v34 = vpop.xlane.xlu0 %230  ;;  %v1099_v55 = vmul.f32 %v4476_v41, %v1028_v49  ;;  %v1029_v40 = vmul.f32 %v3357_v33, %v837_v29 }
 0x149   :  { %v904_v10 = vadd.f32 1e-05, %v776_v59  ;;  %v777_v56 = vsub.f32 %v649_v5, %v713_v8  ;;  %v4674_v0 = vmul.f32 0.03125, %v231_v34 }
 0x14a   :  { %v234_v50 = vpop.xlane.xlu1 %233  ;;  %v1170_v27 = vadd.f32 %v4490_v26, %v1099_v55  ;;  %v1100_v58 = vmul.f32 %v4476_v41, %v1029_v40  ;;  %v3689_v55 = vld [vmem:[%s5506_s0 + $0x170] sm:$0xff] }
 0x14b   :  { %3362 = vrsqrt.f32 %v904_v10  ;;  %v905_v13 = vadd.f32 1e-05, %v777_v56  ;;  %v714_v48 = vmul.f32 %v4674_v0, %v4674_v0  ;;  %v4684_v12 = vmul.f32 0.03125, %v234_v50 }
 0x14c   :  { %3054 = vmatprep.mubr.msk.f32.mxu0 %vm90_vm0, %v1170_v27  ;;  %v552_v14 = vpop.xlane.xlu0 %551  ;;  %v1171_v20 = vadd.f32 %v4490_v26, %v1100_v58  ;;  %v842_v40 = vsub.f32 %v3689_v55, %v4674_v0 }
 0x14d   :  { %v3359_v17 = vpop.eup %3358  ;;  %3364 = vrsqrt.f32 %v905_v13  ;;  %v650_v39 = vmul.f32 0.03125, %v552_v14  ;;  %v715_v62 = vmul.f32 %v4684_v12, %v4684_v12  ;;  %v3690_v13 = vld [vmem:[%s5506_s0 + $0x178] sm:$0xff] }
 0x14e   :  { %v555_v60 = vpop.xlane.xlu1 %554  ;;  %3055 = vmatmul.mubr.msk.f32.gmra.mrb[40].mxu0 %vm90_vm0, %v1171_v20  ;;  %v1030_v18 = vmul.f32 %v3359_v17, %v838_v23 }
 0x14f   :  { %v3361_v51 = vpop.eup %3360  ;;  %v778_v1 = vsub.f32 %v650_v39, %v714_v48  ;;  %v651_v61 = vmul.f32 0.03125, %v555_v60  ;;  %v843_v48 = vsub.f32 %v3690_v13, %v4684_v12 }
 0x150   :  { %v237_v9 = vpop.xlane.xlu0 %236  ;;  %v1101_v30 = vmul.f32 %v4476_v41, %v1030_v18  ;;  %v1031_v15 = vmul.f32 %v3361_v51, %v839_v21 }
 0x151   :  { %v906_v3 = vadd.f32 1e-05, %v778_v1  ;;  %v779_v28 = vsub.f32 %v651_v61, %v715_v62  ;;  %v4696_v44 = vmul.f32 0.03125, %v237_v9 }
 0x152   :  { %v240_v36 = vpop.xlane.xlu1 %239  ;;  %v1172_v45 = vadd.f32 %v4490_v26, %v1101_v30  ;;  %v1102_v24 = vmul.f32 %v4476_v41, %v1031_v15  ;;  %v3691_v30 = vld [vmem:[%s5506_s0 + $0x180] sm:$0xff] }
 0x153   :  { %3366 = vrsqrt.f32 %v906_v3  ;;  %v907_v37 = vadd.f32 1e-05, %v779_v28  ;;  %v716_v11 = vmul.f32 %v4696_v44, %v4696_v44  ;;  %v4706_v16 = vmul.f32 0.03125, %v240_v36 }
 0x154   :  { %3057 = vmatprep.mubr.msk.f32.mxu0 %vm90_vm0, %v1172_v45  ;;  %v558_v25 = vpop.xlane.xlu0 %557  ;;  %v1173_v42 = vadd.f32 %v4490_v26, %v1102_v24  ;;  %v844_v15 = vsub.f32 %v3691_v30, %v4696_v44 }
 0x155   :  { %v3363_v52 = vpop.eup %3362  ;;  %3368 = vrsqrt.f32 %v907_v37  ;;  %v652_v19 = vmul.f32 0.03125, %v558_v25  ;;  %v717_v31 = vmul.f32 %v4706_v16, %v4706_v16  ;;  %v3692_v37 = vld [vmem:[%s5506_s0 + $0x188] sm:$0xff] }
 0x156   :  { %v561_v4 = vpop.xlane.xlu1 %560  ;;  %3058 = vmatmul.mubr.msk.f32.gmra.mrb[42].mxu0 %vm90_vm0, %v1173_v42  ;;  %v1032_v38 = vmul.f32 %v3363_v52, %v840_v63 }
 0x157   :  { %v3365_v2 = vpop.eup %3364  ;;  %v780_v54 = vsub.f32 %v652_v19, %v716_v11  ;;  %v653_v35 = vmul.f32 0.03125, %v561_v4  ;;  %v845_v11 = vsub.f32 %v3692_v37, %v4706_v16 }
 0x158   :  { %v243_v32 = vpop.xlane.xlu0 %242  ;;  %v1103_v53 = vmul.f32 %v4476_v41, %v1032_v38  ;;  %v1033_v29 = vmul.f32 %v3365_v2, %v841_v46 }
 0x159   :  { %v908_v57 = vadd.f32 1e-05, %v780_v54  ;;  %v781_v49 = vsub.f32 %v653_v35, %v717_v31  ;;  %v4718_v33 = vmul.f32 0.03125, %v243_v32 }
 0x15a   :  { %v246_v8 = vpop.xlane.xlu1 %245  ;;  %v1174_v47 = vadd.f32 %v4490_v26, %v1103_v53  ;;  %v1104_v59 = vmul.f32 %v4476_v41, %v1033_v29  ;;  %v3693_v53 = vld [vmem:[%s5506_s0 + $0x190] sm:$0xff] }
 0x15b   :  { %3370 = vrsqrt.f32 %v908_v57  ;;  %v909_v5 = vadd.f32 1e-05, %v781_v49  ;;  %v718_v34 = vmul.f32 %v4718_v33, %v4718_v33  ;;  %v4728_v10 = vmul.f32 0.03125, %v246_v8 }
 0x15c   :  { %3060 = vmatprep.mubr.msk.f32.mxu0 %vm90_vm0, %v1174_v47  ;;  %v564_v56 = vpop.xlane.xlu0 %563  ;;  %v1175_v50 = vadd.f32 %v4490_v26, %v1104_v59  ;;  %v846_v29 = vsub.f32 %v3693_v53, %v4718_v33 }
 0x15d   :  { %v3367_v27 = vpop.eup %3366  ;;  %3372 = vrsqrt.f32 %v909_v5  ;;  %v654_v58 = vmul.f32 0.03125, %v564_v56  ;;  %v719_v14 = vmul.f32 %v4728_v10, %v4728_v10  ;;  %v3694_v5 = vld [vmem:[%s5506_s0 + $0x198] sm:$0xff] }
 0x15e   :  { %v567_v6 = vpop.xlane.xlu1 %566  ;;  %3061 = vmatmul.mubr.msk.f32.gmra.mrb[44].mxu0 %vm90_vm0, %v1175_v50  ;;  %v1034_v0 = vmul.f32 %v3367_v27, %v842_v40 }
 0x15f   :  { %v3369_v23 = vpop.eup %3368  ;;  %v782_v20 = vsub.f32 %v654_v58, %v718_v34  ;;  %v655_v17 = vmul.f32 0.03125, %v567_v6  ;;  %v847_v34 = vsub.f32 %v3694_v5, %v4728_v10 }
 0x160   :  { %v249_v39 = vpop.xlane.xlu0 %248  ;;  %v1105_v7 = vmul.f32 %v4476_v41, %v1034_v0  ;;  %v1035_v21 = vmul.f32 %v3369_v23, %v843_v48 }
 0x161   :  { %v910_v60 = vadd.f32 1e-05, %v782_v20  ;;  %v783_v18 = vsub.f32 %v655_v17, %v719_v14  ;;  %v4740_v51 = vmul.f32 0.03125, %v249_v39 }
 0x162   :  { %v252_v62 = vpop.xlane.xlu1 %251  ;;  %v1176_v12 = vadd.f32 %v4490_v26, %v1105_v7  ;;  %v1106_v1 = vmul.f32 %v4476_v41, %v1035_v21  ;;  %v3695_v7 = vld [vmem:[%s5506_s0 + $0x1a0] sm:$0xff] }
 0x163   :  { %3374 = vrsqrt.f32 %v910_v60  ;;  %v911_v61 = vadd.f32 1e-05, %v783_v18  ;;  %v720_v9 = vmul.f32 %v4740_v51, %v4740_v51  ;;  %v4750_v3 = vmul.f32 0.03125, %v252_v62 }
 0x164   :  { %3063 = vmatprep.mubr.msk.f32.mxu0 %vm90_vm0, %v1176_v12  ;;  %v570_v28 = vpop.xlane.xlu0 %569  ;;  %v1177_v36 = vadd.f32 %v4490_v26, %v1106_v1  ;;  %v848_v21 = vsub.f32 %v3695_v7, %v4740_v51  ;;  %v3699_v7 = vld [vmem:[%s5506_s0 + $0x1c0] sm:$0xff] }
 0x165   :  { %v3371_v45 = vpop.eup %3370  ;;  %3376 = vrsqrt.f32 %v911_v61  ;;  %v656_v24 = vmul.f32 0.03125, %v570_v28  ;;  %v721_v25 = vmul.f32 %v4750_v3, %v4750_v3  ;;  %v3696_v61 = vld [vmem:[%s5506_s0 + $0x1a8] sm:$0xff] }
 0x166   :  { %v573_v22 = vpop.xlane.xlu1 %572  ;;  %3064 = vmatmul.mubr.msk.f32.gmra.mrb[46].mxu0 %vm90_vm0, %v1177_v36  ;;  %v1036_v44 = vmul.f32 %v3371_v45, %v844_v15 }
 0x167   :  { %v3373_v63 = vpop.eup %3372  ;;  %v784_v42 = vsub.f32 %v656_v24, %v720_v9  ;;  %v657_v52 = vmul.f32 0.03125, %v573_v22  ;;  %v849_v9 = vsub.f32 %v3696_v61, %v4750_v3 }
 0x168   :  { %v255_v19 = vpop.xlane.xlu0 %254  ;;  %v1107_v43 = vmul.f32 %v4476_v41, %v1036_v44  ;;  %v1037_v46 = vmul.f32 %v3373_v63, %v845_v11 }
 0x169   :  { %v912_v4 = vadd.f32 1e-05, %v784_v42  ;;  %v785_v38 = vsub.f32 %v657_v52, %v721_v25  ;;  %v4762_v2 = vmul.f32 0.03125, %v255_v19 }
 0x16a   :  { %v258_v31 = vpop.xlane.xlu1 %257  ;;  %v1178_v16 = vadd.f32 %v4490_v26, %v1107_v43  ;;  %v1108_v54 = vmul.f32 %v4476_v41, %v1037_v46  ;;  %v3697_v43 = vld [vmem:[%s5506_s0 + $0x1b0] sm:$0xff] }
 0x16b   :  { %3378 = vrsqrt.f32 %v912_v4  ;;  %v913_v35 = vadd.f32 1e-05, %v785_v38  ;;  %v722_v32 = vmul.f32 %v4762_v2, %v4762_v2  ;;  %v4772_v57 = vmul.f32 0.03125, %v258_v31 }
 0x16c   :  { %3066 = vmatprep.mubr.msk.f32.mxu0 %vm90_vm0, %v1178_v16  ;;  %v576_v49 = vpop.xlane.xlu0 %575  ;;  %v1179_v8 = vadd.f32 %v4490_v26, %v1108_v54  ;;  %v850_v46 = vsub.f32 %v3697_v43, %v4762_v2 }
 0x16d   :  { %v3375_v47 = vpop.eup %3374  ;;  %3380 = vrsqrt.f32 %v913_v35  ;;  %v658_v59 = vmul.f32 0.03125, %v576_v49  ;;  %v723_v56 = vmul.f32 %v4772_v57, %v4772_v57  ;;  %v3698_v35 = vld [vmem:[%s5506_s0 + $0x1b8] sm:$0xff] }
 0x16e   :  { %v579_v55 = vpop.xlane.xlu1 %578  ;;  %3067 = vmatmul.mubr.msk.f32.gmra.mrb[48].mxu0 %vm90_vm0, %v1179_v8  ;;  %v1038_v33 = vmul.f32 %v3375_v47, %v846_v29 }
 0x16f   :  { %v3377_v40 = vpop.eup %3376  ;;  %v786_v50 = vsub.f32 %v658_v59, %v722_v32  ;;  %v659_v27 = vmul.f32 0.03125, %v579_v55  ;;  %v851_v32 = vsub.f32 %v3698_v35, %v4772_v57  ;;  %v4830_v59 = vld [vmem:[%s5511_s4] ss:$0 sm:$0xff] }
 0x170   :  { %v261_v58 = vpop.xlane.xlu0 %260  ;;  %v1109_v13 = vmul.f32 %v4476_v41, %v1038_v33  ;;  %v1039_v48 = vmul.f32 %v3377_v40, %v847_v34 }
 0x171   :  { %v914_v6 = vadd.f32 1e-05, %v786_v50  ;;  %v787_v0 = vsub.f32 %v659_v27, %v723_v56  ;;  %v4784_v23 = vmul.f32 0.03125, %v261_v58 }
 0x172   :  { %v264_v14 = vpop.xlane.xlu1 %263  ;;  %v1180_v10 = vadd.f32 %v4490_v26, %v1109_v13  ;;  %v1110_v20 = vmul.f32 %v4476_v41, %v1039_v48 }
 0x173   :  { %3382 = vrsqrt.f32 %v914_v6  ;;  %v915_v17 = vadd.f32 1e-05, %v787_v0  ;;  %v724_v39 = vmul.f32 %v4784_v23, %v4784_v23  ;;  %v4794_v60 = vmul.f32 0.03125, %v264_v14 }
 0x174   :  { %3069 = vmatprep.mubr.msk.f32.mxu0 %vm90_vm0, %v1180_v10  ;;  %v582_v18 = vpop.xlane.xlu0 %581  ;;  %v1181_v62 = vadd.f32 %v4490_v26, %v1110_v20 }
 0x175   :  { %v3379_v12 = vpop.eup %3378  ;;  %3384 = vrsqrt.f32 %v915_v17  ;;  %v660_v1 = vmul.f32 0.03125, %v582_v18  ;;  %v725_v28 = vmul.f32 %v4794_v60, %v4794_v60 }
 0x176   :  { %v585_v30 = vpop.xlane.xlu1 %584  ;;  %3070 = vmatmul.mubr.msk.f32.gmra.mrb[50].mxu0 %vm90_vm0, %v1181_v62  ;;  %v1040_v51 = vmul.f32 %v3379_v12, %v848_v21  ;;  %v852_v21 = vsub.f32 %v3699_v7, %v4784_v23  ;;  %v3700_v62 = vld [vmem:[%s5506_s0 + $0x1c8] sm:$0xff] }
 0x177   :  { %v3381_v15 = vpop.eup %3380  ;;  %v788_v36 = vsub.f32 %v660_v1, %v724_v39  ;;  %v661_v45 = vmul.f32 0.03125, %v585_v30  ;;  %v853_v12 = vsub.f32 %v3700_v62, %v4794_v60 }
 0x178   :  { %v267_v24 = vpop.xlane.xlu0 %266  ;;  %v1111_v37 = vmul.f32 %v4476_v41, %v1040_v51  ;;  %v1041_v11 = vmul.f32 %v3381_v15, %v849_v9 }
 0x179   :  { %v916_v22 = vadd.f32 1e-05, %v788_v36  ;;  %v789_v44 = vsub.f32 %v661_v45, %v725_v28  ;;  %v4806_v63 = vmul.f32 0.03125, %v267_v24 }
 0x17a   :  { %v270_v25 = vpop.xlane.xlu1 %269  ;;  %v1182_v3 = vadd.f32 %v4490_v26, %v1111_v37  ;;  %v1112_v42 = vmul.f32 %v4476_v41, %v1041_v11 }
 0x17b   :  { %3386 = vrsqrt.f32 %v916_v22  ;;  %v917_v52 = vadd.f32 1e-05, %v789_v44  ;;  %v726_v19 = vmul.f32 %v4806_v63, %v4806_v63  ;;  %v4816_v4 = vmul.f32 0.03125, %v270_v25 }
 0x17c   :  { %3072 = vmatprep.mubr.msk.f32.mxu0 %vm90_vm0, %v1182_v3  ;;  %v588_v38 = vpop.xlane.xlu0 %587  ;;  %v1183_v31 = vadd.f32 %v4490_v26, %v1112_v42 }
 0x17d   :  { %v3383_v16 = vpop.eup %3382  ;;  %3388 = vrsqrt.f32 %v917_v52  ;;  %v662_v54 = vmul.f32 0.03125, %v588_v38  ;;  %v727_v49 = vmul.f32 %v4816_v4, %v4816_v4 }
 0x17e   :  { %v591_v53 = vpop.xlane.xlu1 %590  ;;  %3073 = vmatmul.mubr.msk.f32.gmra.mrb[52].mxu0 %vm90_vm0, %v1183_v31  ;;  %v1042_v2 = vmul.f32 %v3383_v16, %v850_v46 }
 0x17f   :  { %v3385_v29 = vpop.eup %3384  ;;  %v790_v8 = vsub.f32 %v662_v54, %v726_v19  ;;  %v663_v47 = vmul.f32 0.03125, %v591_v53 }
 0x180   :  { %v273_v5 = vpop.xlane.xlu0 %272  ;;  %v1113_v34 = vmul.f32 %v4476_v41, %v1042_v2  ;;  %v1043_v55 = vmul.f32 %v3385_v29, %v851_v32  ;;  %v3702_v2 = vld [vmem:[%s5506_s0 + $0x1d8] sm:$0xff] }
 0x181   :  { %v918_v57 = vadd.f32 1e-05, %v790_v8  ;;  %v791_v33 = vsub.f32 %v663_v47, %v727_v49  ;;  %v4833_v40 = vmul.f32 0.03125, %v273_v5  ;;  %v2996_v56 = vpop.f32.mrb[0].mxu0  ;;  %v855_v29 = vsub.f32 %v3702_v2, %v4816_v4 }
 0x182   :  { %v4836_v50 = vadd.f32 %v2996_v56, %v4830_v59  ;;  %v276_v27 = vpop.xlane.xlu1 %275  ;;  %v1463_v58 = vpop.f32.mrb[1].mxu0  ;;  %v1184_v13 = vadd.f32 %v4490_v26, %v1113_v34  ;;  %v1114_v48 = vmul.f32 %v4476_v41, %v1043_v55  ;;  %v4895_v56 = vld [vmem:[%s5508_s1] ss:$0 sm:$0xff] }
 0x183   :  { %3390 = vrsqrt.f32 %v918_v57  ;;  %v919_v6 = vadd.f32 1e-05, %v791_v33  ;;  %v728_v0 = vmul.f32 %v4833_v40, %v4833_v40  ;;  %v4842_v14 = vmul.f32 0.03125, %v276_v27 }
 0x184   :  { %v4845_v10 = vadd.f32 %v4830_v59, %v1463_v58  ;;  %3075 = vmatprep.mubr.msk.f32.mxu0 %vm90_vm0, %v1184_v13  ;;  %v594_v20 = vpop.xlane.xlu0 %593  ;;  %v1185_v17 = vadd.f32 %v4490_v26, %v1114_v48  ;;  %v2774_v1 = vmul.f32 -1.442695, %v4836_v50 }
 0x185   :  { %v3387_v39 = vpop.eup %3386  ;;  %3392 = vrsqrt.f32 %v919_v6  ;;  %v664_v18 = vmul.f32 0.03125, %v594_v20  ;;  %v729_v51 = vmul.f32 %v4842_v14, %v4842_v14 }
 0x186   :  { %v2773_v61 = vmul.f32 -1.442695, %v4845_v10  ;;  %v597_v9 = vpop.xlane.xlu1 %596  ;;  %3076 = vmatmul.mubr.msk.f32.gmra.mrb[54].mxu0 %vm90_vm0, %v1185_v17  ;;  %v1044_v28 = vmul.f32 %v3387_v39, %v852_v21 }
 0x187   :  { %v3389_v30 = vpop.eup %3388  ;;  %v792_v23 = vsub.f32 %v664_v18, %v728_v0  ;;  %v665_v15 = vmul.f32 0.03125, %v597_v9  ;;  %v3704_v0 = vld [vmem:[%s5506_s0 + $0x1e0] sm:$0xff]  ;;  %v3706_v9 = vld [vmem:[%s5506_s0 + $0x1e8] sm:$0xff] }
 0x188   :  { %3394 = vpow2.f32 %v2773_v61  ;;  %v279_v36 = vpop.xlane.xlu0 %278  ;;  %v1045_v45 = vmul.f32 %v3389_v30, %v853_v12  ;;  %v1115_v22 = vmul.f32 %v4476_v41, %v1044_v28  ;;  %v856_v20 = vsub.f32 %v3704_v0, %v4833_v40  ;;  %v4913_v18 = vld [vmem:[%s5509_s2] ss:$0 sm:$0xff] }
 0x189   :  { %v920_v24 = vadd.f32 1e-05, %v792_v23  ;;  %v793_v37 = vsub.f32 %v665_v15, %v729_v51  ;;  %v4862_v60 = vmul.f32 0.03125, %v279_v36  ;;  %v2999_v11 = vpop.f32.mrb[2].mxu0  ;;  %3396 = vpow2.f32 %v2774_v1 }
 0x18a   :  { %v4866_v44 = vadd.f32 %v2999_v11, %v4830_v59  ;;  %v282_v25 = vpop.xlane.xlu1 %281  ;;  %v1473_v3 = vpop.f32.mrb[3].mxu0  ;;  %v1116_v42 = vmul.f32 %v4476_v41, %v1045_v45  ;;  %v1186_v31 = vadd.f32 %v4490_v26, %v1115_v22  ;;  %v3701_v41 = vld [vmem:[%s5506_s0 + $0x1d0] sm:$0xff]  ;;  %v857_v30 = vsub.f32 %v3706_v9, %v4842_v14 }
 0x18b   :  { %3398 = vrsqrt.f32 %v920_v24  ;;  %v921_v52 = vadd.f32 1e-05, %v793_v37  ;;  %v730_v19 = vmul.f32 %v4862_v60, %v4862_v60  ;;  %v4872_v46 = vmul.f32 0.03125, %v282_v25 }
 0x18c   :  { %v2776_v43 = vmul.f32 -1.442695, %v4866_v44  ;;  %v4875_v38 = vadd.f32 %v4830_v59, %v1473_v3  ;;  %v600_v16 = vpop.xlane.xlu0 %599  ;;  %v854_v35 = vsub.f32 %v3701_v41, %v4806_v63  ;;  %v1187_v53 = vadd.f32 %v4490_v26, %v1116_v42  ;;  %3078 = vmatprep.mubr.msk.f32.mxu0 %vm90_vm0, %v1186_v31  ;;  %v3707_v31 = vld [vmem:[%s5506_s0 + $0x1f0] sm:$0xff] }
 0x18d   :  { %v3391_v54 = vpop.eup %3390  ;;  %3400 = vrsqrt.f32 %v921_v52  ;;  %v666_v32 = vmul.f32 0.03125, %v600_v16  ;;  %v731_v63 = vmul.f32 %v4872_v46, %v4872_v46  ;;  %v858_v16 = vsub.f32 %v3707_v31, %v4862_v60 }
 0x18e   :  { %3402 = vpow2.f32 %v2776_v43  ;;  %v2775_v49 = vmul.f32 -1.442695, %v4875_v38  ;;  %v603_v8 = vpop.xlane.xlu1 %602  ;;  %3079 = vmatmul.mubr.msk.f32.gmra.mrb[56].mxu0 %vm90_vm0, %v1187_v53  ;;  %v1046_v26 = vmul.f32 %v3391_v54, %v854_v35  ;;  %v3708_v35 = vld [vmem:[%s5506_s0 + $0x1f8] sm:$0xff] }
 0x18f   :  { %v3393_v47 = vpop.eup %3392  ;;  %v794_v5 = vsub.f32 %v666_v32, %v730_v19  ;;  %v667_v34 = vmul.f32 0.03125, %v603_v8  ;;  %v859_v32 = vsub.f32 %v3708_v35, %v4872_v46 }
 0x190   :  { %3404 = vpow2.f32 %v2775_v49  ;;  %v1047_v55 = vmul.f32 %v3393_v47, %v855_v29  ;;  %v1117_v27 = vmul.f32 %v4895_v56, %v1046_v26 }
 0x191   :  { %v922_v57 = vadd.f32 1e-05, %v794_v5  ;;  %v795_v33 = vsub.f32 %v667_v34, %v731_v63  ;;  %v3002_v4 = vpop.f32.mrb[4].mxu0 }
 0x192   :  { %v3395_v58 = vpop.eup %3394  ;;  %v4899_v13 = vadd.f32 %v3002_v4, %v4830_v59  ;;  %v1483_v48 = vpop.f32.mrb[5].mxu0  ;;  %v1118_v6 = vmul.f32 %v4895_v56, %v1047_v55  ;;  %v1188_v62 = vadd.f32 %v4913_v18, %v1117_v27 }
 0x193   :  { %v923_v17 = vadd.f32 1e-05, %v795_v33  ;;  %v4907_v39 = vadd.f32 %v4830_v59, %v1483_v48  ;;  %v3397_v7 = vpop.eup %3396  ;;  %3406 = vrsqrt.f32 %v922_v57  ;;  %v1974_v61 = vadd.f32 1.0, %v3395_v58 }
 0x194   :  { %v2778_v21 = vmul.f32 -1.442695, %v4899_v13  ;;  %v1189_v12 = vadd.f32 %v4913_v18, %v1118_v6  ;;  %3081 = vmatprep.mubr.msk.f32.mxu0 %vm90_vm0, %v1188_v62  ;;  %v1975_v28 = vadd.f32 1.0, %v3397_v7 }
 0x195   :  { %v3399_v1 = vpop.eup %3398  ;;  %v2777_v40 = vmul.f32 -1.442695, %v4907_v39  ;;  %3408 = vrsqrt.f32 %v923_v17 }
 0x196   :  { %v1048_v51 = vmul.f32 %v3399_v1, %v856_v20  ;;  %3410 = vpow2.f32 %v2778_v21  ;;  %3082 = vmatmul.mubr.msk.f32.gmra.mrb[58].mxu0 %vm90_vm0, %v1189_v12 }
 0x197   :  { %v3401_v23 = vpop.eup %3400  ;;  %3412 = vpow2.f32 %v2777_v40 }
 0x198   :  { %v3403_v15 = vpop.eup %3402  ;;  %v1119_v36 = vmul.f32 %v4895_v56, %v1048_v51  ;;  %v1049_v45 = vmul.f32 %v3401_v23, %v857_v30  ;;  %3414 = vrcp.f32 %v1974_v61 }
 0x199   :  { %v3005_v24 = vpop.f32.mrb[6].mxu0  ;;  %3416 = vrcp.f32 %v1975_v28  ;;  %v1977_v52 = vadd.f32 1.0, %v3403_v15 }
 0x19a   :  { %v3405_v37 = vpop.eup %3404  ;;  %v4926_v11 = vadd.f32 %v3005_v24, %v4830_v59  ;;  %v1493_v14 = vpop.f32.mrb[7].mxu0  ;;  %v1190_v22 = vadd.f32 %v4913_v18, %v1119_v36  ;;  %v1120_v25 = vmul.f32 %v4895_v56, %v1049_v45 }
 0x19b   :  { %v1976_v3 = vadd.f32 1.0, %v3405_v37  ;;  %v4931_v42 = vadd.f32 %v4830_v59, %v1493_v14 }
 0x19c   :  { %v2780_v19 = vmul.f32 -1.442695, %v4926_v11  ;;  %3084 = vmatprep.mubr.msk.f32.mxu0 %vm90_vm0, %v1190_v22  ;;  %v1191_v43 = vadd.f32 %v4913_v18, %v1120_v25 }
 0x19d   :  { %3418 = vrcp.f32 %v1976_v3  ;;  %v2779_v54 = vmul.f32 -1.442695, %v4931_v42  ;;  %v3407_v41 = vpop.eup %3406 }
 0x19e   :  { %3420 = vpow2.f32 %v2780_v19  ;;  %3085 = vmatmul.mubr.msk.f32.gmra.mrb[60].mxu0 %vm90_vm0, %v1191_v43  ;;  %v1050_v53 = vmul.f32 %v3407_v41, %v858_v16 }
 0x19f   :  { %3422 = vpow2.f32 %v2779_v54  ;;  %v3409_v2 = vpop.eup %3408 }
 0x1a0   :  { %3424 = vrcp.f32 %v1977_v52  ;;  %v3411_v29 = vpop.eup %3410  ;;  %v1121_v60 = vmul.f32 %v4895_v56, %v1050_v53  ;;  %v1051_v8 = vmul.f32 %v3409_v2, %v859_v32 }
 0x1a1   :  { %v3008_v49 = vpop.f32.mrb[8].mxu0  ;;  %v3413_v47 = vpop.eup %3412  ;;  %v1979_v63 = vadd.f32 1.0, %v3411_v29 }
 0x1a2   :  { %v4948_v5 = vadd.f32 %v3008_v49, %v4830_v59  ;;  %v1503_v34 = vpop.f32.mrb[9].mxu0  ;;  %v3415_v26 = vpop.eup %3414  ;;  %v1978_v55 = vadd.f32 1.0, %v3413_v47  ;;  %v1192_v46 = vadd.f32 %v4913_v18, %v1121_v60  ;;  %v1122_v33 = vmul.f32 %v4895_v56, %v1051_v8 }
 0x1a3   :  { %v4951_v57 = vadd.f32 %v4830_v59, %v1503_v34  ;;  %3426 = vrcp.f32 %v1979_v63  ;;  %v3417_v48 = vpop.eup %3416  ;;  %v2166_v6 = vmul.f32 %v3415_v26, %v4845_v10 }
 0x1a4   :  { %v2782_v4 = vmul.f32 -1.442695, %v4948_v5  ;;  %3428 = vrcp.f32 %v1978_v55  ;;  %3087 = vmatprep.mubr.msk.f32.mxu0 %vm90_vm0, %v1192_v46  ;;  %v1193_v58 = vadd.f32 %v4913_v18, %v1122_v33  ;;  %v2167_v17 = vmul.f32 %v3417_v48, %v4836_v50 }
 0x1a5   :  { %v2781_v27 = vmul.f32 -1.442695, %v4951_v57 }
 0x1a6   :  { %3430 = vpow2.f32 %v2782_v4  ;;  %3088 = vmatmul.mubr.msk.f32.gmra.mrb[62].mxu0 %vm90_vm0, %v1193_v58 }
 0x1a7   :  { %v3419_v0 = vpop.eup %3418  ;;  %3432 = vpow2.f32 %v2781_v27  ;;  %3122 = vmatprep.mubr.f32.mxu0 %v2166_v6 }
 0x1a8   :  { %v3421_v20 = vpop.eup %3420  ;;  %v2168_v12 = vmul.f32 %v3419_v0, %v4875_v38 }
 0x1a9   :  { %v3423_v56 = vpop.eup %3422  ;;  %v1981_v7 = vadd.f32 1.0, %v3421_v20  ;;  %v3011_v21 = vpop.f32.mrb[10].mxu0 }
 0x1aa   :  { %v3425_v62 = vpop.eup %3424  ;;  %v1980_v1 = vadd.f32 1.0, %v3423_v56  ;;  %v4964_v18 = vadd.f32 %v3011_v21, %v4830_v59  ;;  %v1513_v10 = vpop.f32.mrb[11].mxu0  ;;  %3123 = vmatmul.mubr.f32.vlgmr.msra.gmra.mrb[64].mxu0 %v2167_v17 }
 0x1ab   :  { %3434 = vrcp.f32 %v1981_v7  ;;  %v4967_v61 = vadd.f32 %v4830_v59, %v1513_v10  ;;  %3125 = vmatprep.mubr.f32.mxu0 %v2168_v12  ;;  %v2169_v50 = vmul.f32 %v3425_v62, %v4866_v44 }
 0x1ac   :  { %3436 = vrcp.f32 %v1980_v1  ;;  %v2784_v40 = vmul.f32 -1.442695, %v4964_v18 }
 0x1ad   :  { %v2783_v9 = vmul.f32 -1.442695, %v4967_v61  ;;  %v3427_v30 = vpop.eup %3426 }
 0x1ae   :  { %3438 = vpow2.f32 %v2784_v40  ;;  %v3429_v38 = vpop.eup %3428  ;;  %3126 = vmatmul.mubr.f32.gmra.mrb[66].mxu0 %v2169_v50  ;;  %v2171_v28 = vmul.f32 %v3427_v30, %v4899_v13 }
 0x1af   :  { %3440 = vpow2.f32 %v2783_v9  ;;  %v2170_v23 = vmul.f32 %v3429_v38, %v4907_v39 }
 0x1b0   :  { %v3431_v51 = vpop.eup %3430 }
 0x1b1   :  { %v3433_v15 = vpop.eup %3432  ;;  %v1983_v36 = vadd.f32 1.0, %v3431_v51  ;;  %v3014_v45 = vpop.f32.mrb[12].mxu0  ;;  %3128 = vmatprep.mubr.f32.mxu0 %v2170_v23 }
 0x1b2   :  { %v1982_v24 = vadd.f32 1.0, %v3433_v15  ;;  %v4975_v37 = vadd.f32 %v3014_v45, %v4830_v59  ;;  %v1523_v44 = vpop.f32.mrb[13].mxu0  ;;  %3129 = vmatmul.mubr.f32.gmra.mrb[68].mxu0 %v2171_v28 }
 0x1b3   :  { %3442 = vrcp.f32 %v1983_v36  ;;  %v4978_v14 = vadd.f32 %v4830_v59, %v1523_v44 }
 0x1b4   :  { %3444 = vrcp.f32 %v1982_v24  ;;  %v2786_v22 = vmul.f32 -1.442695, %v4975_v37 }
 0x1b5   :  { %v3435_v39 = vpop.eup %3434  ;;  %v2785_v25 = vmul.f32 -1.442695, %v4978_v14 }
 0x1b6   :  { %v3437_v13 = vpop.eup %3436  ;;  %3446 = vpow2.f32 %v2786_v22  ;;  %v2173_v19 = vmul.f32 %v3435_v39, %v4926_v11 }
 0x1b7   :  { %3448 = vpow2.f32 %v2785_v25  ;;  %v2172_v3 = vmul.f32 %v3437_v13, %v4931_v42 }
 0x1b8   :  { %v3439_v52 = vpop.eup %3438 }
 0x1b9   :  { %v3441_v43 = vpop.eup %3440  ;;  %v1985_v31 = vadd.f32 1.0, %v3439_v52  ;;  %v3017_v16 = vpop.f32.mrb[14].mxu0  ;;  %3131 = vmatprep.mubr.f32.mxu1 %v2172_v3 }
 0x1ba   :  { %v1984_v54 = vadd.f32 1.0, %v3441_v43  ;;  %v4985_v41 = vadd.f32 %v3017_v16, %v4830_v59  ;;  %v1533_v35 = vpop.f32.mrb[15].mxu0  ;;  %3132 = vmatmul.mubr.f32.vlgmr.msra.gmra.mrb[0].mxu1 %v2173_v19 }
 0x1bb   :  { %3450 = vrcp.f32 %v1985_v31  ;;  %v4988_v32 = vadd.f32 %v4830_v59, %v1533_v35 }
 0x1bc   :  { %3452 = vrcp.f32 %v1984_v54  ;;  %v2788_v42 = vmul.f32 -1.442695, %v4985_v41 }
 0x1bd   :  { %v3443_v53 = vpop.eup %3442  ;;  %v2787_v11 = vmul.f32 -1.442695, %v4988_v32 }
 0x1be   :  { %v3445_v2 = vpop.eup %3444  ;;  %3454 = vpow2.f32 %v2788_v42  ;;  %v2175_v60 = vmul.f32 %v3443_v53, %v4948_v5 }
 0x1bf   :  { %v2174_v29 = vmul.f32 %v3445_v2, %v4951_v57  ;;  %3456 = vpow2.f32 %v2787_v11 }
 0x1c0   :  { %v3447_v49 = vpop.eup %3446 }
 0x1c1   :  { %v3449_v8 = vpop.eup %3448  ;;  %v1987_v47 = vadd.f32 1.0, %v3447_v49  ;;  %v3020_v63 = vpop.f32.mrb[16].mxu0  ;;  %3134 = vmatprep.mubr.f32.mxu1 %v2174_v29 }
 0x1c2   :  { %v1986_v34 = vadd.f32 1.0, %v3449_v8  ;;  %v4995_v26 = vadd.f32 %v3020_v63, %v4830_v59  ;;  %v1543_v55 = vpop.f32.mrb[17].mxu0  ;;  %3135 = vmatmul.mubr.f32.gmra.mrb[2].mxu1 %v2175_v60 }
 0x1c3   :  { %3458 = vrcp.f32 %v1987_v47  ;;  %v4998_v46 = vadd.f32 %v4830_v59, %v1543_v55 }
 0x1c4   :  { %3460 = vrcp.f32 %v1986_v34  ;;  %v2790_v57 = vmul.f32 -1.442695, %v4995_v26 }
 0x1c5   :  { %v3451_v33 = vpop.eup %3450  ;;  %v2789_v5 = vmul.f32 -1.442695, %v4998_v46 }
 0x1c6   :  { %v3453_v4 = vpop.eup %3452  ;;  %3462 = vpow2.f32 %v2790_v57  ;;  %v2177_v48 = vmul.f32 %v3451_v33, %v4964_v18 }
 0x1c7   :  { %v2176_v27 = vmul.f32 %v3453_v4, %v4967_v61  ;;  %3464 = vpow2.f32 %v2789_v5 }
 0x1c8   :  { %v3455_v58 = vpop.eup %3454 }
 0x1c9   :  { %v3457_v6 = vpop.eup %3456  ;;  %v1989_v0 = vadd.f32 1.0, %v3455_v58  ;;  %v3023_v20 = vpop.f32.mrb[18].mxu0  ;;  %3137 = vmatprep.mubr.f32.mxu1 %v2176_v27 }
 0x1ca   :  { %v1988_v56 = vadd.f32 1.0, %v3457_v6  ;;  %v5005_v17 = vadd.f32 %v3023_v20, %v4830_v59  ;;  %v1553_v7 = vpop.f32.mrb[19].mxu0  ;;  %3138 = vmatmul.mubr.f32.gmra.mrb[4].mxu1 %v2177_v48 }
 0x1cb   :  { %3466 = vrcp.f32 %v1989_v0  ;;  %v5008_v21 = vadd.f32 %v4830_v59, %v1553_v7 }
 0x1cc   :  { %3468 = vrcp.f32 %v1988_v56  ;;  %v2792_v62 = vmul.f32 -1.442695, %v5005_v17 }
 0x1cd   :  { %v3459_v12 = vpop.eup %3458  ;;  %v2791_v1 = vmul.f32 -1.442695, %v5008_v21 }
 0x1ce   :  { %v3461_v18 = vpop.eup %3460  ;;  %3470 = vpow2.f32 %v2792_v62  ;;  %v2179_v40 = vmul.f32 %v3459_v12, %v4975_v37 }
 0x1cf   :  { %v2178_v10 = vmul.f32 %v3461_v18, %v4978_v14  ;;  %3472 = vpow2.f32 %v2791_v1 }
 0x1d0   :  { %v3463_v61 = vpop.eup %3462 }
 0x1d1   :  { %v3465_v50 = vpop.eup %3464  ;;  %v1991_v9 = vadd.f32 1.0, %v3463_v61  ;;  %v3026_v30 = vpop.f32.mrb[20].mxu0  ;;  %3140 = vmatprep.mubr.f32.mxu1 %v2178_v10 }
 0x1d2   :  { %v1990_v38 = vadd.f32 1.0, %v3465_v50  ;;  %v5015_v51 = vadd.f32 %v3026_v30, %v4830_v59  ;;  %v1563_v23 = vpop.f32.mrb[21].mxu0  ;;  %3141 = vmatmul.mubr.f32.gmra.mrb[6].mxu1 %v2179_v40 }
 0x1d3   :  { %3474 = vrcp.f32 %v1991_v9  ;;  %v5018_v15 = vadd.f32 %v4830_v59, %v1563_v23 }
 0x1d4   :  { %3476 = vrcp.f32 %v1990_v38  ;;  %v2794_v28 = vmul.f32 -1.442695, %v5015_v51 }
 0x1d5   :  { %v3467_v36 = vpop.eup %3466  ;;  %v2793_v45 = vmul.f32 -1.442695, %v5018_v15 }
 0x1d6   :  { %v3469_v24 = vpop.eup %3468  ;;  %3478 = vpow2.f32 %v2794_v28  ;;  %v2181_v14 = vmul.f32 %v3467_v36, %v4985_v41 }
 0x1d7   :  { %v2180_v37 = vmul.f32 %v3469_v24, %v4988_v32  ;;  %3480 = vpow2.f32 %v2793_v45 }
 0x1d8   :  { %v3471_v44 = vpop.eup %3470 }
 0x1d9   :  { %v3473_v22 = vpop.eup %3472  ;;  %v1993_v39 = vadd.f32 1.0, %v3471_v44  ;;  %v3029_v25 = vpop.f32.mrb[22].mxu0  ;;  %3143 = vmatprep.mubr.f32.mxu1 %v2180_v37 }
 0x1da   :  { %v1992_v13 = vadd.f32 1.0, %v3473_v22  ;;  %v5025_v3 = vadd.f32 %v3029_v25, %v4830_v59  ;;  %v1573_v52 = vpop.f32.mrb[23].mxu0  ;;  %3144 = vmatmul.mubr.f32.gmra.mrb[8].mxu1 %v2181_v14 }
 0x1db   :  { %3482 = vrcp.f32 %v1993_v39  ;;  %v5028_v19 = vadd.f32 %v4830_v59, %v1573_v52 }
 0x1dc   :  { %3484 = vrcp.f32 %v1992_v13  ;;  %v2796_v43 = vmul.f32 -1.442695, %v5025_v3 }
 0x1dd   :  { %v3475_v31 = vpop.eup %3474  ;;  %v2795_v16 = vmul.f32 -1.442695, %v5028_v19 }
 0x1de   :  { %v3477_v54 = vpop.eup %3476  ;;  %3486 = vpow2.f32 %v2796_v43  ;;  %v2183_v32 = vmul.f32 %v3475_v31, %v4995_v26 }
 0x1df   :  { %v2182_v41 = vmul.f32 %v3477_v54, %v4998_v46  ;;  %3488 = vpow2.f32 %v2795_v16 }
 0x1e0   :  { %v3479_v35 = vpop.eup %3478 }
 0x1e1   :  { %v3481_v42 = vpop.eup %3480  ;;  %v1995_v53 = vadd.f32 1.0, %v3479_v35  ;;  %v3032_v11 = vpop.f32.mrb[24].mxu0  ;;  %3146 = vmatprep.mubr.f32.mxu1 %v2182_v41 }
 0x1e2   :  { %v1994_v2 = vadd.f32 1.0, %v3481_v42  ;;  %v5035_v29 = vadd.f32 %v3032_v11, %v4830_v59  ;;  %v1583_v49 = vpop.f32.mrb[25].mxu0  ;;  %3147 = vmatmul.mubr.f32.gmra.mrb[10].mxu1 %v2183_v32 }
 0x1e3   :  { %3490 = vrcp.f32 %v1995_v53  ;;  %v5038_v60 = vadd.f32 %v4830_v59, %v1583_v49 }
 0x1e4   :  { %3492 = vrcp.f32 %v1994_v2  ;;  %v2798_v8 = vmul.f32 -1.442695, %v5035_v29 }
 0x1e5   :  { %v3483_v47 = vpop.eup %3482  ;;  %v2797_v63 = vmul.f32 -1.442695, %v5038_v60 }
 0x1e6   :  { %v3485_v34 = vpop.eup %3484  ;;  %3494 = vpow2.f32 %v2798_v8  ;;  %v2185_v46 = vmul.f32 %v3483_v47, %v5005_v17 }
 0x1e7   :  { %v2184_v26 = vmul.f32 %v3485_v34, %v5008_v21  ;;  %3496 = vpow2.f32 %v2797_v63 }
 0x1e8   :  { %v3487_v55 = vpop.eup %3486 }
 0x1e9   :  { %v3489_v57 = vpop.eup %3488  ;;  %v1997_v33 = vadd.f32 1.0, %v3487_v55  ;;  %v3035_v5 = vpop.f32.mrb[26].mxu0  ;;  %3149 = vmatprep.mubr.f32.mxu1 %v2184_v26 }
 0x1ea   :  { %v1996_v4 = vadd.f32 1.0, %v3489_v57  ;;  %v5045_v27 = vadd.f32 %v3035_v5, %v4830_v59  ;;  %v1593_v58 = vpop.f32.mrb[27].mxu0  ;;  %3150 = vmatmul.mubr.f32.gmra.mrb[12].mxu1 %v2185_v46 }
 0x1eb   :  { %3498 = vrcp.f32 %v1997_v33  ;;  %v5048_v48 = vadd.f32 %v4830_v59, %v1593_v58 }
 0x1ec   :  { %3500 = vrcp.f32 %v1996_v4  ;;  %v2800_v6 = vmul.f32 -1.442695, %v5045_v27 }
 0x1ed   :  { %v3491_v0 = vpop.eup %3490  ;;  %v2799_v20 = vmul.f32 -1.442695, %v5048_v48 }
 0x1ee   :  { %v3493_v56 = vpop.eup %3492  ;;  %3502 = vpow2.f32 %v2800_v6  ;;  %v2187_v21 = vmul.f32 %v3491_v0, %v5015_v51 }
 0x1ef   :  { %v2186_v17 = vmul.f32 %v3493_v56, %v5018_v15  ;;  %3504 = vpow2.f32 %v2799_v20 }
 0x1f0   :  { %v3495_v7 = vpop.eup %3494 }
 0x1f1   :  { %v3497_v62 = vpop.eup %3496  ;;  %v1999_v12 = vadd.f32 1.0, %v3495_v7  ;;  %v3038_v1 = vpop.f32.mrb[28].mxu0  ;;  %3152 = vmatprep.mubr.f32.mxu1 %v2186_v17 }
 0x1f2   :  { %v1998_v18 = vadd.f32 1.0, %v3497_v62  ;;  %v5055_v10 = vadd.f32 %v3038_v1, %v4830_v59  ;;  %v1603_v61 = vpop.f32.mrb[29].mxu0  ;;  %3153 = vmatmul.mubr.f32.gmra.mrb[14].mxu1 %v2187_v21 }
 0x1f3   :  { %3506 = vrcp.f32 %v1999_v12  ;;  %v5058_v40 = vadd.f32 %v4830_v59, %v1603_v61 }
 0x1f4   :  { %3508 = vrcp.f32 %v1998_v18  ;;  %v2802_v50 = vmul.f32 -1.442695, %v5055_v10 }
 0x1f5   :  { %v3499_v9 = vpop.eup %3498  ;;  %v2801_v30 = vmul.f32 -1.442695, %v5058_v40 }
 0x1f6   :  { %v3501_v38 = vpop.eup %3500  ;;  %3510 = vpow2.f32 %v2802_v50  ;;  %v2189_v15 = vmul.f32 %v3499_v9, %v5025_v3 }
 0x1f7   :  { %v2188_v51 = vmul.f32 %v3501_v38, %v5028_v19  ;;  %3512 = vpow2.f32 %v2801_v30 }
 0x1f8   :  { %v3503_v23 = vpop.eup %3502 }
 0x1f9   :  { %v3505_v28 = vpop.eup %3504  ;;  %v2001_v36 = vadd.f32 1.0, %v3503_v23  ;;  %v3041_v45 = vpop.f32.mrb[30].mxu0  ;;  %3155 = vmatprep.mubr.f32.mxu1 %v2188_v51 }
 0x1fa   :  { %v2000_v24 = vadd.f32 1.0, %v3505_v28  ;;  %v5065_v37 = vadd.f32 %v3041_v45, %v4830_v59  ;;  %v1613_v44 = vpop.f32.mrb[31].mxu0  ;;  %3156 = vmatmul.mubr.f32.gmra.mrb[16].mxu1 %v2189_v15 }
 0x1fb   :  { %3514 = vrcp.f32 %v2001_v36  ;;  %v5068_v14 = vadd.f32 %v4830_v59, %v1613_v44 }
 0x1fc   :  { %3516 = vrcp.f32 %v2000_v24  ;;  %v2804_v22 = vmul.f32 -1.442695, %v5065_v37 }
 0x1fd   :  { %v3507_v39 = vpop.eup %3506  ;;  %v2803_v25 = vmul.f32 -1.442695, %v5068_v14 }
 0x1fe   :  { %v3509_v13 = vpop.eup %3508  ;;  %3518 = vpow2.f32 %v2804_v22  ;;  %v2191_v19 = vmul.f32 %v3507_v39, %v5035_v29 }
 0x1ff   :  { %v2190_v3 = vmul.f32 %v3509_v13, %v5038_v60  ;;  %3520 = vpow2.f32 %v2803_v25 }
 0x200   :  { %v3511_v52 = vpop.eup %3510 }
 0x201   :  { %v3513_v43 = vpop.eup %3512  ;;  %v2003_v31 = vadd.f32 1.0, %v3511_v52  ;;  %v3044_v16 = vpop.f32.mrb[32].mxu0  ;;  %3158 = vmatprep.mubr.f32.mxu1 %v2190_v3 }
 0x202   :  { %v2002_v54 = vadd.f32 1.0, %v3513_v43  ;;  %v5075_v41 = vadd.f32 %v3044_v16, %v4830_v59  ;;  %v1623_v35 = vpop.f32.mrb[33].mxu0  ;;  %3159 = vmatmul.mubr.f32.gmra.mrb[18].mxu1 %v2191_v19 }
 0x203   :  { %3522 = vrcp.f32 %v2003_v31  ;;  %v5078_v32 = vadd.f32 %v4830_v59, %v1623_v35 }
 0x204   :  { %3524 = vrcp.f32 %v2002_v54  ;;  %v2806_v42 = vmul.f32 -1.442695, %v5075_v41 }
 0x205   :  { %v3515_v53 = vpop.eup %3514  ;;  %v2805_v11 = vmul.f32 -1.442695, %v5078_v32 }
 0x206   :  { %v3517_v2 = vpop.eup %3516  ;;  %3526 = vpow2.f32 %v2806_v42  ;;  %v2193_v60 = vmul.f32 %v3515_v53, %v5045_v27 }
 0x207   :  { %v2192_v29 = vmul.f32 %v3517_v2, %v5048_v48  ;;  %3528 = vpow2.f32 %v2805_v11 }
 0x208   :  { %v3519_v49 = vpop.eup %3518 }
 0x209   :  { %v3521_v8 = vpop.eup %3520  ;;  %v2005_v47 = vadd.f32 1.0, %v3519_v49  ;;  %v3047_v63 = vpop.f32.mrb[34].mxu0  ;;  %3161 = vmatprep.mubr.f32.mxu1 %v2192_v29 }
 0x20a   :  { %v2004_v34 = vadd.f32 1.0, %v3521_v8  ;;  %v5085_v26 = vadd.f32 %v3047_v63, %v4830_v59  ;;  %v1633_v55 = vpop.f32.mrb[35].mxu0  ;;  %3162 = vmatmul.mubr.f32.gmra.mrb[20].mxu1 %v2193_v60 }
 0x20b   :  { %3530 = vrcp.f32 %v2005_v47  ;;  %v5088_v46 = vadd.f32 %v4830_v59, %v1633_v55 }
 0x20c   :  { %3532 = vrcp.f32 %v2004_v34  ;;  %v2808_v57 = vmul.f32 -1.442695, %v5085_v26 }
 0x20d   :  { %v3523_v33 = vpop.eup %3522  ;;  %v2807_v5 = vmul.f32 -1.442695, %v5088_v46 }
 0x20e   :  { %v3525_v4 = vpop.eup %3524  ;;  %3534 = vpow2.f32 %v2808_v57  ;;  %v2195_v48 = vmul.f32 %v3523_v33, %v5055_v10 }
 0x20f   :  { %v2194_v27 = vmul.f32 %v3525_v4, %v5058_v40  ;;  %3536 = vpow2.f32 %v2807_v5 }
 0x210   :  { %v3527_v58 = vpop.eup %3526 }
 0x211   :  { %v3529_v6 = vpop.eup %3528  ;;  %v2007_v0 = vadd.f32 1.0, %v3527_v58  ;;  %v3050_v20 = vpop.f32.mrb[36].mxu0  ;;  %3164 = vmatprep.mubr.f32.mxu1 %v2194_v27 }
 0x212   :  { %v2006_v56 = vadd.f32 1.0, %v3529_v6  ;;  %v5095_v17 = vadd.f32 %v3050_v20, %v4830_v59  ;;  %v1643_v7 = vpop.f32.mrb[37].mxu0  ;;  %3165 = vmatmul.mubr.f32.gmra.mrb[22].mxu1 %v2195_v48 }
 0x213   :  { %3538 = vrcp.f32 %v2007_v0  ;;  %v5098_v21 = vadd.f32 %v4830_v59, %v1643_v7 }
 0x214   :  { %3540 = vrcp.f32 %v2006_v56  ;;  %v2810_v62 = vmul.f32 -1.442695, %v5095_v17 }
 0x215   :  { %v3531_v12 = vpop.eup %3530  ;;  %v2809_v1 = vmul.f32 -1.442695, %v5098_v21 }
 0x216   :  { %v3533_v18 = vpop.eup %3532  ;;  %3542 = vpow2.f32 %v2810_v62  ;;  %v2197_v40 = vmul.f32 %v3531_v12, %v5065_v37 }
 0x217   :  { %v2196_v10 = vmul.f32 %v3533_v18, %v5068_v14  ;;  %3544 = vpow2.f32 %v2809_v1  ;;  %v5147_v18 = vld [vmem:[%s5511_s4] ss:$0 sm:$0xff] }
 0x218   :  { %v3535_v61 = vpop.eup %3534 }
 0x219   :  { %v3537_v50 = vpop.eup %3536  ;;  %v2009_v9 = vadd.f32 1.0, %v3535_v61  ;;  %v3053_v30 = vpop.f32.mrb[38].mxu0  ;;  %3167 = vmatprep.mubr.f32.mxu1 %v2196_v10 }
 0x21a   :  { %v2008_v38 = vadd.f32 1.0, %v3537_v50  ;;  %v5105_v51 = vadd.f32 %v3053_v30, %v4830_v59  ;;  %v1653_v23 = vpop.f32.mrb[39].mxu0  ;;  %3168 = vmatmul.mubr.f32.gmra.mrb[24].mxu1 %v2197_v40 }
 0x21b   :  { %3546 = vrcp.f32 %v2009_v9  ;;  %v5108_v15 = vadd.f32 %v4830_v59, %v1653_v23 }
 0x21c   :  { %3548 = vrcp.f32 %v2008_v38  ;;  %v2812_v28 = vmul.f32 -1.442695, %v5105_v51 }
 0x21d   :  { %v3539_v36 = vpop.eup %3538  ;;  %v2811_v45 = vmul.f32 -1.442695, %v5108_v15 }
 0x21e   :  { %v3541_v24 = vpop.eup %3540  ;;  %3550 = vpow2.f32 %v2812_v28  ;;  %v2199_v14 = vmul.f32 %v3539_v36, %v5075_v41 }
 0x21f   :  { %v2198_v37 = vmul.f32 %v3541_v24, %v5078_v32  ;;  %3552 = vpow2.f32 %v2811_v45 }
 0x220   :  { %v3543_v44 = vpop.eup %3542 }
 0x221   :  { %v3545_v22 = vpop.eup %3544  ;;  %v2011_v39 = vadd.f32 1.0, %v3543_v44  ;;  %v3056_v25 = vpop.f32.mrb[40].mxu0  ;;  %3170 = vmatprep.mubr.f32.mxu1 %v2198_v37 }
 0x222   :  { %v2010_v13 = vadd.f32 1.0, %v3545_v22  ;;  %v5115_v3 = vadd.f32 %v3056_v25, %v4830_v59  ;;  %v1663_v52 = vpop.f32.mrb[41].mxu0  ;;  %3171 = vmatmul.mubr.f32.gmra.mrb[26].mxu1 %v2199_v14 }
 0x223   :  { %3554 = vrcp.f32 %v2011_v39  ;;  %v5118_v19 = vadd.f32 %v4830_v59, %v1663_v52 }
 0x224   :  { %3556 = vrcp.f32 %v2010_v13  ;;  %v2814_v43 = vmul.f32 -1.442695, %v5115_v3 }
 0x225   :  { %v3547_v31 = vpop.eup %3546  ;;  %v2813_v16 = vmul.f32 -1.442695, %v5118_v19 }
 0x226   :  { %v3549_v54 = vpop.eup %3548  ;;  %3558 = vpow2.f32 %v2814_v43  ;;  %v2201_v32 = vmul.f32 %v3547_v31, %v5085_v26 }
 0x227   :  { %v2200_v41 = vmul.f32 %v3549_v54, %v5088_v46  ;;  %3560 = vpow2.f32 %v2813_v16 }
 0x228   :  { %v3551_v35 = vpop.eup %3550 }
 0x229   :  { %v3553_v42 = vpop.eup %3552  ;;  %v2013_v53 = vadd.f32 1.0, %v3551_v35  ;;  %v3059_v11 = vpop.f32.mrb[42].mxu0  ;;  %3173 = vmatprep.mubr.f32.mxu1 %v2200_v41 }
 0x22a   :  { %v2012_v2 = vadd.f32 1.0, %v3553_v42  ;;  %v5125_v29 = vadd.f32 %v3059_v11, %v4830_v59  ;;  %v1673_v49 = vpop.f32.mrb[43].mxu0  ;;  %3174 = vmatmul.mubr.f32.gmra.mrb[28].mxu1 %v2201_v32 }
 0x22b   :  { %3562 = vrcp.f32 %v2013_v53  ;;  %v5128_v60 = vadd.f32 %v4830_v59, %v1673_v49 }
 0x22c   :  { %3564 = vrcp.f32 %v2012_v2  ;;  %v2816_v8 = vmul.f32 -1.442695, %v5125_v29 }
 0x22d   :  { %v3555_v47 = vpop.eup %3554  ;;  %v2815_v63 = vmul.f32 -1.442695, %v5128_v60 }
 0x22e   :  { %v3557_v34 = vpop.eup %3556  ;;  %3566 = vpow2.f32 %v2816_v8  ;;  %v2203_v46 = vmul.f32 %v3555_v47, %v5095_v17 }
 0x22f   :  { %v2202_v26 = vmul.f32 %v3557_v34, %v5098_v21  ;;  %3568 = vpow2.f32 %v2815_v63 }
 0x230   :  { %v3559_v55 = vpop.eup %3558 }
 0x231   :  { %v3561_v57 = vpop.eup %3560  ;;  %v2015_v33 = vadd.f32 1.0, %v3559_v55  ;;  %v3062_v5 = vpop.f32.mrb[44].mxu0  ;;  %3176 = vmatprep.mubr.f32.mxu1 %v2202_v26 }
 0x232   :  { %v2014_v4 = vadd.f32 1.0, %v3561_v57  ;;  %v5135_v27 = vadd.f32 %v3062_v5, %v4830_v59  ;;  %v1683_v58 = vpop.f32.mrb[45].mxu0  ;;  %3177 = vmatmul.mubr.f32.gmra.mrb[30].mxu1 %v2203_v46 }
 0x233   :  { %3570 = vrcp.f32 %v2015_v33  ;;  %v5138_v48 = vadd.f32 %v4830_v59, %v1683_v58 }
 0x234   :  { %3572 = vrcp.f32 %v2014_v4  ;;  %v2818_v6 = vmul.f32 -1.442695, %v5135_v27 }
 0x235   :  { %v3563_v0 = vpop.eup %3562  ;;  %v2817_v20 = vmul.f32 -1.442695, %v5138_v48 }
 0x236   :  { %v3565_v56 = vpop.eup %3564  ;;  %3574 = vpow2.f32 %v2818_v6  ;;  %v2205_v21 = vmul.f32 %v3563_v0, %v5105_v51 }
 0x237   :  { %v2204_v17 = vmul.f32 %v3565_v56, %v5108_v15  ;;  %3576 = vpow2.f32 %v2817_v20 }
 0x238   :  { %v3567_v7 = vpop.eup %3566 }
 0x239   :  { %v3569_v62 = vpop.eup %3568  ;;  %v2017_v12 = vadd.f32 1.0, %v3567_v7  ;;  %v3065_v1 = vpop.f32.mrb[46].mxu0  ;;  %3179 = vmatprep.mubr.f32.mxu1 %v2204_v17 }
 0x23a   :  { %v2016_v59 = vadd.f32 1.0, %v3569_v62  ;;  %v5150_v10 = vadd.f32 %v5147_v18, %v3065_v1  ;;  %v1693_v61 = vpop.f32.mrb[47].mxu0  ;;  %3180 = vmatmul.mubr.f32.gmra.mrb[32].mxu1 %v2205_v21 }
 0x23b   :  { %3578 = vrcp.f32 %v2017_v12  ;;  %v5153_v40 = vadd.f32 %v5147_v18, %v1693_v61 }
 0x23c   :  { %3580 = vrcp.f32 %v2016_v59  ;;  %v2820_v50 = vmul.f32 -1.442695, %v5150_v10 }
 0x23d   :  { %v3571_v9 = vpop.eup %3570  ;;  %v2819_v30 = vmul.f32 -1.442695, %v5153_v40 }
 0x23e   :  { %v3573_v38 = vpop.eup %3572  ;;  %3582 = vpow2.f32 %v2820_v50  ;;  %v2207_v15 = vmul.f32 %v3571_v9, %v5115_v3 }
 0x23f   :  { %v2206_v51 = vmul.f32 %v3573_v38, %v5118_v19  ;;  %3584 = vpow2.f32 %v2819_v30 }
 0x240   :  { %v3575_v23 = vpop.eup %3574 }
 0x241   :  { %v3577_v28 = vpop.eup %3576  ;;  %v2019_v36 = vadd.f32 1.0, %v3575_v23  ;;  %v3068_v45 = vpop.f32.mrb[48].mxu0  ;;  %3182 = vmatprep.mubr.f32.mxu1 %v2206_v51 }
 0x242   :  { %v2018_v24 = vadd.f32 1.0, %v3577_v28  ;;  %v5160_v37 = vadd.f32 %v5147_v18, %v3068_v45  ;;  %v1703_v44 = vpop.f32.mrb[49].mxu0  ;;  %3183 = vmatmul.mubr.f32.gmra.mrb[34].mxu1 %v2207_v15 }
 0x243   :  { %3586 = vrcp.f32 %v2019_v36  ;;  %v5163_v14 = vadd.f32 %v5147_v18, %v1703_v44 }
 0x244   :  { %3588 = vrcp.f32 %v2018_v24  ;;  %v2822_v22 = vmul.f32 -1.442695, %v5160_v37 }
 0x245   :  { %v3579_v39 = vpop.eup %3578  ;;  %v2821_v25 = vmul.f32 -1.442695, %v5163_v14 }
 0x246   :  { %v3581_v13 = vpop.eup %3580  ;;  %3590 = vpow2.f32 %v2822_v22  ;;  %v2209_v19 = vmul.f32 %v3579_v39, %v5125_v29 }
 0x247   :  { %v2208_v3 = vmul.f32 %v3581_v13, %v5128_v60  ;;  %3592 = vpow2.f32 %v2821_v25 }
 0x248   :  { %v3583_v52 = vpop.eup %3582 }
 0x249   :  { %v3585_v43 = vpop.eup %3584  ;;  %v2021_v31 = vadd.f32 1.0, %v3583_v52  ;;  %v3071_v16 = vpop.f32.mrb[50].mxu0  ;;  %3185 = vmatprep.mubr.f32.mxu1 %v2208_v3 }
 0x24a   :  { %v2020_v54 = vadd.f32 1.0, %v3585_v43  ;;  %v5170_v41 = vadd.f32 %v5147_v18, %v3071_v16  ;;  %v1713_v35 = vpop.f32.mrb[51].mxu0  ;;  %3186 = vmatmul.mubr.f32.gmra.mrb[36].mxu1 %v2209_v19 }
 0x24b   :  { %3594 = vrcp.f32 %v2021_v31  ;;  %v5173_v32 = vadd.f32 %v5147_v18, %v1713_v35 }
 0x24c   :  { %3596 = vrcp.f32 %v2020_v54  ;;  %v2824_v42 = vmul.f32 -1.442695, %v5170_v41 }
 0x24d   :  { %v3587_v53 = vpop.eup %3586  ;;  %v2823_v11 = vmul.f32 -1.442695, %v5173_v32 }
 0x24e   :  { %v3589_v2 = vpop.eup %3588  ;;  %3598 = vpow2.f32 %v2824_v42  ;;  %v2211_v60 = vmul.f32 %v3587_v53, %v5135_v27 }
 0x24f   :  { %v2210_v29 = vmul.f32 %v3589_v2, %v5138_v48  ;;  %3600 = vpow2.f32 %v2823_v11 }
 0x250   :  { %v3591_v49 = vpop.eup %3590 }
 0x251   :  { %v3593_v8 = vpop.eup %3592  ;;  %v2023_v47 = vadd.f32 1.0, %v3591_v49  ;;  %v3074_v63 = vpop.f32.mrb[52].mxu0  ;;  %3188 = vmatprep.mubr.f32.mxu1 %v2210_v29 }
 0x252   :  { %v2022_v34 = vadd.f32 1.0, %v3593_v8  ;;  %v5180_v26 = vadd.f32 %v5147_v18, %v3074_v63  ;;  %v1723_v55 = vpop.f32.mrb[53].mxu0  ;;  %3189 = vmatmul.mubr.f32.gmra.mrb[38].mxu1 %v2211_v60 }
 0x253   :  { %3602 = vrcp.f32 %v2023_v47  ;;  %v5183_v46 = vadd.f32 %v5147_v18, %v1723_v55 }
 0x254   :  { %3604 = vrcp.f32 %v2022_v34  ;;  %v2826_v57 = vmul.f32 -1.442695, %v5180_v26 }
 0x255   :  { %v3595_v33 = vpop.eup %3594  ;;  %v2825_v5 = vmul.f32 -1.442695, %v5183_v46 }
 0x256   :  { %v3597_v4 = vpop.eup %3596  ;;  %3606 = vpow2.f32 %v2826_v57  ;;  %v2213_v48 = vmul.f32 %v3595_v33, %v5150_v10 }
 0x257   :  { %v2212_v27 = vmul.f32 %v3597_v4, %v5153_v40  ;;  %3608 = vpow2.f32 %v2825_v5 }
 0x258   :  { %v3599_v58 = vpop.eup %3598 }
 0x259   :  { %v3601_v6 = vpop.eup %3600  ;;  %v2025_v0 = vadd.f32 1.0, %v3599_v58  ;;  %v3077_v20 = vpop.f32.mrb[54].mxu0  ;;  %3191 = vmatprep.mubr.f32.mxu1 %v2212_v27 }
 0x25a   :  { %v2024_v56 = vadd.f32 1.0, %v3601_v6  ;;  %v5190_v17 = vadd.f32 %v5147_v18, %v3077_v20  ;;  %v1733_v7 = vpop.f32.mrb[55].mxu0  ;;  %3192 = vmatmul.mubr.f32.gmra.mrb[40].mxu1 %v2213_v48  ;;  %v5238_v6 = vld [vmem:[%s5512_s6] ss:$0 sm:$0xff] }
 0x25b   :  { %3610 = vrcp.f32 %v2025_v0  ;;  %v5193_v21 = vadd.f32 %v5147_v18, %v1733_v7 }
 0x25c   :  { %3612 = vrcp.f32 %v2024_v56  ;;  %v2828_v62 = vmul.f32 -1.442695, %v5190_v17 }
 0x25d   :  { %v3603_v12 = vpop.eup %3602  ;;  %v2827_v1 = vmul.f32 -1.442695, %v5193_v21 }
 0x25e   :  { %v3605_v59 = vpop.eup %3604  ;;  %3614 = vpow2.f32 %v2828_v62  ;;  %v2215_v40 = vmul.f32 %v3603_v12, %v5160_v37 }
 0x25f   :  { %v2214_v10 = vmul.f32 %v3605_v59, %v5163_v14  ;;  %3616 = vpow2.f32 %v2827_v1 }
 0x260   :  { %v3607_v61 = vpop.eup %3606 }
 0x261   :  { %v3609_v50 = vpop.eup %3608  ;;  %v2027_v9 = vadd.f32 1.0, %v3607_v61  ;;  %3194 = vmatprep.mubr.f32.mxu1 %v2214_v10  ;;  %v3080_v38 = vpop.f32.mrb[56].mxu0 }
 0x262   :  { %v2026_v30 = vadd.f32 1.0, %v3609_v50  ;;  %3195 = vmatmul.mubr.f32.gmra.mrb[42].mxu1 %v2215_v40  ;;  %v5200_v51 = vadd.f32 %v5147_v18, %v3080_v38  ;;  %v1743_v23 = vpop.f32.mrb[57].mxu0 }
 0x263   :  { %3618 = vrcp.f32 %v2027_v9  ;;  %v5203_v15 = vadd.f32 %v5147_v18, %v1743_v23 }
 0x264   :  { %3620 = vrcp.f32 %v2026_v30  ;;  %v2830_v36 = vmul.f32 -1.442695, %v5200_v51 }
 0x265   :  { %v3611_v28 = vpop.eup %3610  ;;  %v2829_v24 = vmul.f32 -1.442695, %v5203_v15 }
 0x266   :  { %v3613_v45 = vpop.eup %3612  ;;  %3622 = vpow2.f32 %v2830_v36  ;;  %v2217_v14 = vmul.f32 %v3611_v28, %v5170_v41 }
 0x267   :  { %v2216_v37 = vmul.f32 %v3613_v45, %v5173_v32  ;;  %3624 = vpow2.f32 %v2829_v24 }
 0x268   :  { %v3615_v44 = vpop.eup %3614 }
 0x269   :  { %v3617_v22 = vpop.eup %3616  ;;  %v2029_v39 = vadd.f32 1.0, %v3615_v44  ;;  %3197 = vmatprep.mubr.f32.mxu1 %v2216_v37  ;;  %v3083_v13 = vpop.f32.mrb[58].mxu0 }
 0x26a   :  { %v2028_v25 = vadd.f32 1.0, %v3617_v22  ;;  %3198 = vmatmul.mubr.f32.gmra.mrb[44].mxu1 %v2217_v14  ;;  %v5210_v3 = vadd.f32 %v5147_v18, %v3083_v13  ;;  %v1753_v52 = vpop.f32.mrb[59].mxu0 }
 0x26b   :  { %3626 = vrcp.f32 %v2029_v39  ;;  %v5213_v19 = vadd.f32 %v5147_v18, %v1753_v52 }
 0x26c   :  { %3628 = vrcp.f32 %v2028_v25  ;;  %v2832_v31 = vmul.f32 -1.442695, %v5210_v3 }
 0x26d   :  { %v3619_v43 = vpop.eup %3618  ;;  %v2831_v54 = vmul.f32 -1.442695, %v5213_v19 }
 0x26e   :  { %v3621_v16 = vpop.eup %3620  ;;  %3630 = vpow2.f32 %v2832_v31  ;;  %v2219_v35 = vmul.f32 %v3619_v43, %v5180_v26 }
 0x26f   :  { %v2218_v41 = vmul.f32 %v3621_v16, %v5183_v46  ;;  %3632 = vpow2.f32 %v2831_v54 }
 0x270   :  { %v3623_v32 = vpop.eup %3622 }
 0x271   :  { %v3086_v42 = vpop.f32.mrb[60].mxu0  ;;  %3200 = vmatprep.mubr.f32.mxu1 %v2218_v41  ;;  %v3625_v53 = vpop.eup %3624  ;;  %v2031_v11 = vadd.f32 1.0, %v3623_v32 }
 0x272   :  { %v5220_v2 = vadd.f32 %v5147_v18, %v3086_v42  ;;  %v1763_v29 = vpop.f32.mrb[61].mxu0  ;;  %3201 = vmatmul.mubr.f32.gmra.mrb[46].mxu1 %v2219_v35  ;;  %v2030_v49 = vadd.f32 1.0, %v3625_v53 }
 0x273   :  { %v5223_v60 = vadd.f32 %v5147_v18, %v1763_v29  ;;  %3634 = vrcp.f32 %v2031_v11 }
 0x274   :  { %v2834_v8 = vmul.f32 -1.442695, %v5220_v2  ;;  %3636 = vrcp.f32 %v2030_v49 }
 0x275   :  { %v3627_v47 = vpop.eup %3626  ;;  %v2833_v63 = vmul.f32 -1.442695, %v5223_v60 }
 0x276   :  { %v3629_v34 = vpop.eup %3628  ;;  %3638 = vpow2.f32 %v2834_v8  ;;  %v2221_v55 = vmul.f32 %v3627_v47, %v5190_v17 }
 0x277   :  { %v2220_v26 = vmul.f32 %v3629_v34, %v5193_v21  ;;  %3640 = vpow2.f32 %v2833_v63 }
 0x278   :  { %v3631_v46 = vpop.eup %3630 }
 0x279   :  { %3203 = vmatprep.mubr.f32.mxu1 %v2220_v26  ;;  %v3633_v57 = vpop.eup %3632  ;;  %v2033_v33 = vadd.f32 1.0, %v3631_v46  ;;  %v3089_v5 = vpop.f32.mrb[62].mxu0 }
 0x27a   :  { %3204 = vmatmul.mubr.f32.gmra.mrb[48].mxu1 %v2221_v55  ;;  %v2032_v4 = vadd.f32 1.0, %v3633_v57  ;;  %v5230_v27 = vadd.f32 %v5147_v18, %v3089_v5  ;;  %v1773_v58 = vpop.f32.mrb[63].mxu0 }
 0x27b   :  { %3642 = vrcp.f32 %v2033_v33  ;;  %v5233_v48 = vadd.f32 %v5147_v18, %v1773_v58 }
 0x27c   :  { %3644 = vrcp.f32 %v2032_v4  ;;  %v2836_v0 = vmul.f32 -1.442695, %v5230_v27 }
 0x27d   :  { %v3635_v20 = vpop.eup %3634  ;;  %v2835_v56 = vmul.f32 -1.442695, %v5233_v48  ;;  %v3124_v17 = vpop.f32.mrb[64].mxu0 }
 0x27e   :  { %v3637_v7 = vpop.eup %3636  ;;  %3646 = vpow2.f32 %v2836_v0  ;;  %v2325_v21 = vadd.f32 %v3124_v17, %v5238_v6  ;;  %v2319_v62 = vpop.f32.mrb[65].mxu0  ;;  %v2223_v10 = vmul.f32 %v3635_v20, %v5200_v51 }
 0x27f   :  { %v2222_v18 = vmul.f32 %v3637_v7, %v5203_v15  ;;  %3648 = vpow2.f32 %v2835_v56  ;;  %v2320_v1 = vadd.f32 %v5238_v6, %v2319_v62 }
 0x280   :  { %v3639_v12 = vpop.eup %3638  ;;  %2639 = vst [vmem:[%s5513_s7 + $0x8] sm:$0xff] %v2325_v21 }
 0x281   :  { %v3641_v59 = vpop.eup %3640  ;;  %v2035_v61 = vadd.f32 1.0, %v3639_v12  ;;  %2638 = vst [vmem:[%s5513_s7] sm:$0xff] %v2320_v1  ;;  %v3127_v50 = vpop.f32.mrb[66].mxu0  ;;  %3206 = vmatprep.mubr.f32.mxu1 %v2222_v18 }
 0x282   :  { %v2034_v40 = vadd.f32 1.0, %v3641_v59  ;;  %v2335_v9 = vadd.f32 %v3127_v50, %v5238_v6  ;;  %v2329_v30 = vpop.f32.mrb[67].mxu0  ;;  %3207 = vmatmul.mubr.f32.gmra.mrb[50].mxu1 %v2223_v10 }
 0x283   :  { %3650 = vrcp.f32 %v2035_v61  ;;  %v2330_v38 = vadd.f32 %v5238_v6, %v2329_v30 }
 0x284   :  { %3652 = vrcp.f32 %v2034_v40  ;;  %2641 = vst [vmem:[%s5513_s7 + $0x18] sm:$0xff] %v2335_v9 }
 0x285   :  { %v3643_v51 = vpop.eup %3642  ;;  %2640 = vst [vmem:[%s5513_s7 + $0x10] sm:$0xff] %v2330_v38  ;;  %v3130_v23 = vpop.f32.mrb[68].mxu0 }
 0x286   :  { %v3645_v15 = vpop.eup %3644  ;;  %v2345_v28 = vadd.f32 %v3130_v23, %v5238_v6  ;;  %v2339_v36 = vpop.f32.mrb[69].mxu0  ;;  %v2225_v44 = vmul.f32 %v3643_v51, %v5210_v3 }
 0x287   :  { %v2224_v45 = vmul.f32 %v3645_v15, %v5213_v19  ;;  %v2340_v24 = vadd.f32 %v5238_v6, %v2339_v36 }
 0x288   :  { %v3647_v37 = vpop.eup %3646  ;;  %2643 = vst [vmem:[%s5513_s7 + $0x28] sm:$0xff] %v2345_v28 }
 0x289   :  { %v3649_v14 = vpop.eup %3648  ;;  %v2037_v22 = vadd.f32 1.0, %v3647_v37  ;;  %2642 = vst [vmem:[%s5513_s7 + $0x20] sm:$0xff] %v2340_v24  ;;  %3209 = vmatprep.mubr.f32.mxu1 %v2224_v45 }
 0x28a   :  { %v2036_v39 = vadd.f32 1.0, %v3649_v14  ;;  %3210 = vmatmul.mubr.f32.gmra.mrb[52].mxu1 %v2225_v44 }
 0x28b   :  { %3654 = vrcp.f32 %v2037_v22 }
 0x28c   :  { %3656 = vrcp.f32 %v2036_v39 }
 0x28d   :  { %v3651_v25 = vpop.eup %3650  ;;  %v3133_v13 = vpop.f32.mrb[0].mxu1 }
 0x28e   :  { %v3653_v52 = vpop.eup %3652  ;;  %v2355_v3 = vadd.f32 %v3133_v13, %v5238_v6  ;;  %v2349_v19 = vpop.f32.mrb[1].mxu1  ;;  %v2227_v16 = vmul.f32 %v3651_v25, %v5220_v2 }
 0x28f   :  { %v2226_v43 = vmul.f32 %v3653_v52, %v5223_v60  ;;  %v2350_v31 = vadd.f32 %v5238_v6, %v2349_v19 }
 0x290   :  { %2645 = vst [vmem:[%s5513_s7 + $0x38] sm:$0xff] %v2355_v3 }
 0x291   :  { %2644 = vst [vmem:[%s5513_s7 + $0x30] sm:$0xff] %v2350_v31  ;;  %3212 = vmatprep.mubr.f32.mxu1 %v2226_v43 }
 0x292   :  { %3213 = vmatmul.mubr.f32.gmra.mrb[54].mxu1 %v2227_v16 }
 0x295   :  { %v3136_v54 = vpop.f32.mrb[2].mxu1  ;;  %v3655_v41 = vpop.eup %3654 }
 0x296   :  { %v2365_v35 = vadd.f32 %v3136_v54, %v5238_v6  ;;  %v2359_v32 = vpop.f32.mrb[3].mxu1  ;;  %v3657_v42 = vpop.eup %3656  ;;  %v2229_v2 = vmul.f32 %v3655_v41, %v5230_v27 }
 0x297   :  { %v2360_v53 = vadd.f32 %v5238_v6, %v2359_v32  ;;  %v2228_v11 = vmul.f32 %v3657_v42, %v5233_v48 }
 0x298   :  { %2647 = vst [vmem:[%s5513_s7 + $0x48] sm:$0xff] %v2365_v35 }
 0x299   :  { %2646 = vst [vmem:[%s5513_s7 + $0x40] sm:$0xff] %v2360_v53  ;;  %3215 = vmatprep.mubr.f32.mxu1 %v2228_v11 }
 0x29a   :  { %3216 = vmatmul.mubr.f32.gmra.mrb[56].mxu1 %v2229_v2 }
 0x29d   :  { %v3139_v29 = vpop.f32.mrb[4].mxu1 }
 0x29e   :  { %v2375_v49 = vadd.f32 %v3139_v29, %v5238_v6  ;;  %v2369_v60 = vpop.f32.mrb[5].mxu1 }
 0x29f   :  { %v2370_v8 = vadd.f32 %v5238_v6, %v2369_v60 }
 0x2a0   :  { %2649 = vst [vmem:[%s5513_s7 + $0x58] sm:$0xff] %v2375_v49 }
 0x2a1   :  { %2648 = vst [vmem:[%s5513_s7 + $0x50] sm:$0xff] %v2370_v8 }
 0x2a5   :  { %v3142_v47 = vpop.f32.mrb[6].mxu1 }
 0x2a6   :  { %v2385_v63 = vadd.f32 %v3142_v47, %v5238_v6  ;;  %v2379_v34 = vpop.f32.mrb[7].mxu1 }
 0x2a7   :  { %v2380_v26 = vadd.f32 %v5238_v6, %v2379_v34 }
 0x2a8   :  { %2651 = vst [vmem:[%s5513_s7 + $0x68] sm:$0xff] %v2385_v63 }
 0x2a9   :  { %2650 = vst [vmem:[%s5513_s7 + $0x60] sm:$0xff] %v2380_v26 }
 0x2ad   :  { %v3145_v55 = vpop.f32.mrb[8].mxu1 }
 0x2ae   :  { %v2395_v46 = vadd.f32 %v3145_v55, %v5238_v6  ;;  %v2389_v57 = vpop.f32.mrb[9].mxu1 }
 0x2af   :  { %v2390_v33 = vadd.f32 %v5238_v6, %v2389_v57 }
 0x2b0   :  { %2653 = vst [vmem:[%s5513_s7 + $0x78] sm:$0xff] %v2395_v46 }
 0x2b1   :  { %2652 = vst [vmem:[%s5513_s7 + $0x70] sm:$0xff] %v2390_v33 }
 0x2b5   :  { %v3148_v5 = vpop.f32.mrb[10].mxu1 }
 0x2b6   :  { %v2405_v4 = vadd.f32 %v3148_v5, %v5238_v6  ;;  %v2399_v27 = vpop.f32.mrb[11].mxu1 }
 0x2b7   :  { %v2400_v58 = vadd.f32 %v5238_v6, %v2399_v27 }
 0x2b8   :  { %2655 = vst [vmem:[%s5513_s7 + $0x88] sm:$0xff] %v2405_v4 }
 0x2b9   :  { %2654 = vst [vmem:[%s5513_s7 + $0x80] sm:$0xff] %v2400_v58 }
 0x2bd   :  { %v3151_v48 = vpop.f32.mrb[12].mxu1 }
 0x2be   :  { %v2415_v0 = vadd.f32 %v3151_v48, %v5238_v6  ;;  %v2409_v20 = vpop.f32.mrb[13].mxu1 }
 0x2bf   :  { %v2410_v56 = vadd.f32 %v5238_v6, %v2409_v20 }
 0x2c0   :  { %2657 = vst [vmem:[%s5513_s7 + $0x98] sm:$0xff] %v2415_v0 }
 0x2c1   :  { %2656 = vst [vmem:[%s5513_s7 + $0x90] sm:$0xff] %v2410_v56 }
 0x2c5   :  { %v3154_v17 = vpop.f32.mrb[14].mxu1 }
 0x2c6   :  { %v2425_v7 = vadd.f32 %v3154_v17, %v5238_v6  ;;  %v2419_v21 = vpop.f32.mrb[15].mxu1 }
 0x2c7   :  { %v2420_v62 = vadd.f32 %v5238_v6, %v2419_v21 }
 0x2c8   :  { %2659 = vst [vmem:[%s5513_s7 + $0xa8] sm:$0xff] %v2425_v7 }
 0x2c9   :  { %2658 = vst [vmem:[%s5513_s7 + $0xa0] sm:$0xff] %v2420_v62 }
 0x2cd   :  { %v3157_v12 = vpop.f32.mrb[16].mxu1 }
 0x2ce   :  { %v2435_v18 = vadd.f32 %v3157_v12, %v5238_v6  ;;  %v2429_v1 = vpop.f32.mrb[17].mxu1 }
 0x2cf   :  { %v2430_v59 = vadd.f32 %v5238_v6, %v2429_v1 }
 0x2d0   :  { %2661 = vst [vmem:[%s5513_s7 + $0xb8] sm:$0xff] %v2435_v18 }
 0x2d1   :  { %2660 = vst [vmem:[%s5513_s7 + $0xb0] sm:$0xff] %v2430_v59 }
 0x2d5   :  { %v3160_v10 = vpop.f32.mrb[18].mxu1 }
 0x2d6   :  { %v2445_v61 = vadd.f32 %v3160_v10, %v5238_v6  ;;  %v2439_v40 = vpop.f32.mrb[19].mxu1 }
 0x2d7   :  { %v2440_v50 = vadd.f32 %v5238_v6, %v2439_v40 }
 0x2d8   :  { %2663 = vst [vmem:[%s5513_s7 + $0xc8] sm:$0xff] %v2445_v61 }
 0x2d9   :  { %2662 = vst [vmem:[%s5513_s7 + $0xc0] sm:$0xff] %v2440_v50 }
 0x2dd   :  { %v3163_v9 = vpop.f32.mrb[20].mxu1 }
 0x2de   :  { %v2455_v30 = vadd.f32 %v3163_v9, %v5238_v6  ;;  %v2449_v38 = vpop.f32.mrb[21].mxu1 }
 0x2df   :  { %v2450_v51 = vadd.f32 %v5238_v6, %v2449_v38 }
 0x2e0   :  { %2665 = vst [vmem:[%s5513_s7 + $0xd8] sm:$0xff] %v2455_v30 }
 0x2e1   :  { %2664 = vst [vmem:[%s5513_s7 + $0xd0] sm:$0xff] %v2450_v51 }
 0x2e5   :  { %v3166_v23 = vpop.f32.mrb[22].mxu1 }
 0x2e6   :  { %v2465_v15 = vadd.f32 %v3166_v23, %v5238_v6  ;;  %v2459_v28 = vpop.f32.mrb[23].mxu1 }
 0x2e7   :  { %v2460_v36 = vadd.f32 %v5238_v6, %v2459_v28 }
 0x2e8   :  { %2667 = vst [vmem:[%s5513_s7 + $0xe8] sm:$0xff] %v2465_v15 }
 0x2e9   :  { %2666 = vst [vmem:[%s5513_s7 + $0xe0] sm:$0xff] %v2460_v36 }
 0x2ed   :  { %v3169_v45 = vpop.f32.mrb[24].mxu1 }
 0x2ee   :  { %v2475_v24 = vadd.f32 %v3169_v45, %v5238_v6  ;;  %v2469_v37 = vpop.f32.mrb[25].mxu1 }
 0x2ef   :  { %v2470_v44 = vadd.f32 %v5238_v6, %v2469_v37 }
 0x2f0   :  { %2669 = vst [vmem:[%s5513_s7 + $0xf8] sm:$0xff] %v2475_v24 }
 0x2f1   :  { %2668 = vst [vmem:[%s5513_s7 + $0xf0] sm:$0xff] %v2470_v44 }
 0x2f5   :  { %v3172_v14 = vpop.f32.mrb[26].mxu1 }
 0x2f6   :  { %v2485_v22 = vadd.f32 %v3172_v14, %v5238_v6  ;;  %v2479_v39 = vpop.f32.mrb[27].mxu1 }
 0x2f7   :  { %v2480_v25 = vadd.f32 %v5238_v6, %v2479_v39 }
 0x2f8   :  { %2671 = vst [vmem:[%s5513_s7 + $0x108] sm:$0xff] %v2485_v22 }
 0x2f9   :  { %2670 = vst [vmem:[%s5513_s7 + $0x100] sm:$0xff] %v2480_v25 }
 0x2fd   :  { %v3175_v13 = vpop.f32.mrb[28].mxu1 }
 0x2fe   :  { %v2495_v52 = vadd.f32 %v3175_v13, %v5238_v6  ;;  %v2489_v3 = vpop.f32.mrb[29].mxu1 }
 0x2ff   :  { %v2490_v19 = vadd.f32 %v5238_v6, %v2489_v3 }
 0x300   :  { %2673 = vst [vmem:[%s5513_s7 + $0x118] sm:$0xff] %v2495_v52 }
 0x301   :  { %2672 = vst [vmem:[%s5513_s7 + $0x110] sm:$0xff] %v2490_v19 }
 0x305   :  { %v3178_v43 = vpop.f32.mrb[30].mxu1 }
 0x306   :  { %v2505_v31 = vadd.f32 %v3178_v43, %v5238_v6  ;;  %v2499_v16 = vpop.f32.mrb[31].mxu1 }
 0x307   :  { %v2500_v54 = vadd.f32 %v5238_v6, %v2499_v16 }
 0x308   :  { %2675 = vst [vmem:[%s5513_s7 + $0x128] sm:$0xff] %v2505_v31 }
 0x309   :  { %2674 = vst [vmem:[%s5513_s7 + $0x120] sm:$0xff] %v2500_v54 }
 0x30d   :  { %v3181_v41 = vpop.f32.mrb[32].mxu1 }
 0x30e   :  { %v2515_v35 = vadd.f32 %v3181_v41, %v5238_v6  ;;  %v2509_v32 = vpop.f32.mrb[33].mxu1 }
 0x30f   :  { %v2510_v42 = vadd.f32 %v5238_v6, %v2509_v32 }
 0x310   :  { %2677 = vst [vmem:[%s5513_s7 + $0x138] sm:$0xff] %v2515_v35 }
 0x311   :  { %2676 = vst [vmem:[%s5513_s7 + $0x130] sm:$0xff] %v2510_v42 }
 0x315   :  { %v3184_v53 = vpop.f32.mrb[34].mxu1 }
 0x316   :  { %v2525_v11 = vadd.f32 %v3184_v53, %v5238_v6  ;;  %v2519_v2 = vpop.f32.mrb[35].mxu1 }
 0x317   :  { %v2520_v29 = vadd.f32 %v5238_v6, %v2519_v2 }
 0x318   :  { %2679 = vst [vmem:[%s5513_s7 + $0x148] sm:$0xff] %v2525_v11 }
 0x319   :  { %2678 = vst [vmem:[%s5513_s7 + $0x140] sm:$0xff] %v2520_v29 }
 0x31d   :  { %v3187_v49 = vpop.f32.mrb[36].mxu1 }
 0x31e   :  { %v2535_v60 = vadd.f32 %v3187_v49, %v5238_v6  ;;  %v2529_v8 = vpop.f32.mrb[37].mxu1 }
 0x31f   :  { %v2530_v47 = vadd.f32 %v5238_v6, %v2529_v8 }
 0x320   :  { %2681 = vst [vmem:[%s5513_s7 + $0x158] sm:$0xff] %v2535_v60 }
 0x321   :  { %2680 = vst [vmem:[%s5513_s7 + $0x150] sm:$0xff] %v2530_v47 }
 0x325   :  { %v3190_v63 = vpop.f32.mrb[38].mxu1 }
 0x326   :  { %v2545_v34 = vadd.f32 %v3190_v63, %v5238_v6  ;;  %v2539_v26 = vpop.f32.mrb[39].mxu1 }
 0x327   :  { %v2540_v55 = vadd.f32 %v5238_v6, %v2539_v26 }
 0x328   :  { %2683 = vst [vmem:[%s5513_s7 + $0x168] sm:$0xff] %v2545_v34 }
 0x329   :  { %2682 = vst [vmem:[%s5513_s7 + $0x160] sm:$0xff] %v2540_v55 }
 0x32d   :  { %v3193_v46 = vpop.f32.mrb[40].mxu1 }
 0x32e   :  { %v2555_v57 = vadd.f32 %v3193_v46, %v5238_v6  ;;  %v2549_v33 = vpop.f32.mrb[41].mxu1 }
 0x32f   :  { %v2550_v5 = vadd.f32 %v5238_v6, %v2549_v33 }
 0x330   :  { %2685 = vst [vmem:[%s5513_s7 + $0x178] sm:$0xff] %v2555_v57 }
 0x331   :  { %2684 = vst [vmem:[%s5513_s7 + $0x170] sm:$0xff] %v2550_v5 }
 0x335   :  { %v3196_v4 = vpop.f32.mrb[42].mxu1 }
 0x336   :  { %v2565_v27 = vadd.f32 %v3196_v4, %v5238_v6  ;;  %v2559_v58 = vpop.f32.mrb[43].mxu1 }
 0x337   :  { %v2560_v48 = vadd.f32 %v5238_v6, %v2559_v58 }
 0x338   :  { %2687 = vst [vmem:[%s5513_s7 + $0x188] sm:$0xff] %v2565_v27 }
 0x339   :  { %2686 = vst [vmem:[%s5513_s7 + $0x180] sm:$0xff] %v2560_v48 }
 0x33d   :  { %v3199_v0 = vpop.f32.mrb[44].mxu1 }
 0x33e   :  { %v2575_v20 = vadd.f32 %v3199_v0, %v5238_v6  ;;  %v2569_v56 = vpop.f32.mrb[45].mxu1 }
 0x33f   :  { %v2570_v17 = vadd.f32 %v5238_v6, %v2569_v56 }
 0x340   :  { %2689 = vst [vmem:[%s5513_s7 + $0x198] sm:$0xff] %v2575_v20 }
 0x341   :  { %2688 = vst [vmem:[%s5513_s7 + $0x190] sm:$0xff] %v2570_v17 }
 0x345   :  { %v3202_v7 = vpop.f32.mrb[46].mxu1 }
 0x346   :  { %v2585_v21 = vadd.f32 %v3202_v7, %v5238_v6  ;;  %v2579_v62 = vpop.f32.mrb[47].mxu1 }
 0x347   :  { %v2580_v12 = vadd.f32 %v5238_v6, %v2579_v62 }
 0x348   :  { %2691 = vst [vmem:[%s5513_s7 + $0x1a8] sm:$0xff] %v2585_v21 }
 0x349   :  { %2690 = vst [vmem:[%s5513_s7 + $0x1a0] sm:$0xff] %v2580_v12 }
 0x34d   :  { %v3205_v18 = vpop.f32.mrb[48].mxu1 }
 0x34e   :  { %v2595_v1 = vadd.f32 %v3205_v18, %v5238_v6  ;;  %v2589_v59 = vpop.f32.mrb[49].mxu1 }
 0x34f   :  { %v2590_v10 = vadd.f32 %v5238_v6, %v2589_v59 }
 0x350   :  { %2693 = vst [vmem:[%s5513_s7 + $0x1b8] sm:$0xff] %v2595_v1 }
 0x351   :  { %2692 = vst [vmem:[%s5513_s7 + $0x1b0] sm:$0xff] %v2590_v10 }
 0x355   :  { %v3208_v61 = vpop.f32.mrb[50].mxu1 }
 0x356   :  { %v2605_v40 = vadd.f32 %v3208_v61, %v5238_v6  ;;  %v2599_v50 = vpop.f32.mrb[51].mxu1 }
 0x357   :  { %v2600_v9 = vadd.f32 %v5238_v6, %v2599_v50 }
 0x358   :  { %2695 = vst [vmem:[%s5513_s7 + $0x1c8] sm:$0xff] %v2605_v40 }
 0x359   :  { %2694 = vst [vmem:[%s5513_s7 + $0x1c0] sm:$0xff] %v2600_v9 }
 0x35d   :  { %v3211_v30 = vpop.f32.mrb[52].mxu1 }
 0x35e   :  { %v2615_v38 = vadd.f32 %v3211_v30, %v5238_v6  ;;  %v2609_v51 = vpop.f32.mrb[53].mxu1 }
 0x35f   :  { %v2610_v23 = vadd.f32 %v5238_v6, %v2609_v51 }
 0x360   :  { %2697 = vst [vmem:[%s5513_s7 + $0x1d8] sm:$0xff] %v2615_v38 }
 0x361   :  { %2696 = vst [vmem:[%s5513_s7 + $0x1d0] sm:$0xff] %v2610_v23 }
 0x365   :  { %v3214_v15 = vpop.f32.mrb[54].mxu1 }
 0x366   :  { %v2625_v28 = vadd.f32 %v3214_v15, %v5238_v6  ;;  %v2619_v36 = vpop.f32.mrb[55].mxu1 }
 0x367   :  { %v2620_v45 = vadd.f32 %v5238_v6, %v2619_v36 }
 0x368   :  { %2699 = vst [vmem:[%s5513_s7 + $0x1e8] sm:$0xff] %v2625_v28 }
 0x369   :  { %2698 = vst [vmem:[%s5513_s7 + $0x1e0] sm:$0xff] %v2620_v45 }
 0x36d   :  { %v3217_v24 = vpop.f32.mrb[56].mxu1 }
 0x36e   :  { %v2635_v37 = vadd.f32 %v3217_v24, %v5238_v6  ;;  %v2629_v44 = vpop.f32.mrb[57].mxu1 }
 0x36f   :  { %v2630_v14 = vadd.f32 %v5238_v6, %v2629_v44 }
 0x370   :  { %2701 = vst [vmem:[%s5513_s7 + $0x1f8] sm:$0xff] %v2635_v37 }
 0x371   :  { %2700 = vst [vmem:[%s5513_s7 + $0x1f0] sm:$0xff] %v2630_v14 }

</bundles_post_ra>
